<compile_context>
chip_gen: v5e
topology: v5e:2x2
jax: 0.10.0
libtpu: 0.0.40
codegen_flags: <defaults>
</compile_context>

<pallas_src>
import jax
import jax.numpy as jnp
from jax import lax
from jax.experimental import pallas as pl
from jax.experimental.pallas import tpu as pltpu


_LANE = 128
_ROW_TILE = 512                       # <=512 rows keeps v5e happy too
_VMEM_LIMIT = 32 * 1024 * 1024        # fits v7x scoped VMEM, fine on v5e/v6e


def _round_up(a, b):
    return (a + b - 1) // b * b


def _row_tiling(m):
    """Pick (row_tile, padded_rows) for an M-row GEMM."""
    if m >= _ROW_TILE:
        return _ROW_TILE, _round_up(m, _ROW_TILE)
    t = _round_up(m, 16)              # bf16 sublane-friendly single block
    return t, t


def _pad2d(x, rows, cols):
    r, c = x.shape
    return jnp.pad(x, ((0, rows - r), (0, cols - c)))


def _compiler_params():
    return pltpu.CompilerParams(
        dimension_semantics=("parallel",),
        vmem_limit_bytes=_VMEM_LIMIT,
    )


# ---------------------------------------------------------------------------
# Pallas kernels
# ---------------------------------------------------------------------------
def _conv_pool_kernel(p0_ref, p1_ref, p2_ref, p3_ref, w_ref, b_ref, o_ref):
    """Fused conv-as-GEMM + bias + ReLU + 2x2/2 max-pool.

    p{0..3} are im2col patch tiles for the four positions of each pool
    window; max over the four f32 MXU accumulators implements the pool
    (bias add and ReLU commute with the max)."""
    w = w_ref[...]
    y0 = jnp.dot(p0_ref[...], w, preferred_element_type=jnp.float32)
    y1 = jnp.dot(p1_ref[...], w, preferred_element_type=jnp.float32)
    y2 = jnp.dot(p2_ref[...], w, preferred_element_type=jnp.float32)
    y3 = jnp.dot(p3_ref[...], w, preferred_element_type=jnp.float32)
    y = jnp.maximum(jnp.maximum(y0, y1), jnp.maximum(y2, y3))
    y = jnp.maximum(y + b_ref[...], 0.0)
    o_ref[...] = y.astype(o_ref.dtype)


def _mlp_kernel(x_ref, w1_ref, b1_ref, w2_ref, b2_ref, o_ref):
    """Fused fc1 + ReLU + fc2; weights stay resident across row tiles."""
    h = jnp.dot(x_ref[...], w1_ref[...], preferred_element_type=jnp.float32)
    h = jnp.maximum(h + b1_ref[...], 0.0).astype(jnp.bfloat16)
    y = jnp.dot(h, w2_ref[...], preferred_element_type=jnp.float32)
    o_ref[...] = y + b2_ref[...]


# ---------------------------------------------------------------------------
# Conv (+pool) as GEMM
# ---------------------------------------------------------------------------
def _pool_patches(x):
    """im2col patches grouped by 2x2 pool position.

    x: (B, H, W, C) NHWC.  Returns ([4 x (B*PH*PW, 25*C)], PH, PW) where each
    matrix's columns are ordered (kh, kw, cin), matching the prepared weight
    row order."""
    B, H, W, C = x.shape
    OH, OW = H - 4, W - 4
    PH, PW = OH // 2, OW // 2
    mats = []
    for dy in range(2):
        for dx in range(2):
            sl = [
                x[:, dy + i:dy + i + 2 * PH:2, dx + j:dx + j + 2 * PW:2, :]
                for i in range(5) for j in range(5)
            ]
            p = jnp.stack(sl, axis=3)                      # (B, PH, PW, 25, C)
            mats.append(p.reshape(B * PH * PW, 25 * C))
    return mats, PH, PW


def conv_relu_pool(x_nhwc, w_mat, b_row):
    """5x5 valid conv (stride 1) + bias + ReLU + 2x2/2 max-pool.

    x_nhwc: (B, H, W, C) bf16.  w_mat: (K_pad, 128) bf16, rows ordered
    (kh, kw, cin) and zero-padded.  b_row: (1, 128) f32 zero-padded.
    Returns (B, PH, PW, 128) bf16 (channels >= Cout are exactly zero)."""
    B = x_nhwc.shape[0]
    mats, PH, PW = _pool_patches(x_nhwc)
    m = B * PH * PW
    k_pad = w_mat.shape[0]
    tm, m_pad = _row_tiling(m)
    mats = [_pad2d(p, m_pad, k_pad).astype(jnp.bfloat16) for p in mats]

    p_spec = pl.BlockSpec((tm, k_pad), lambda i: (i, 0))
    out = pl.pallas_call(
        _conv_pool_kernel,
        out_shape=jax.ShapeDtypeStruct((m_pad, _LANE), jnp.bfloat16),
        grid=(m_pad // tm,),
        in_specs=[p_spec, p_spec, p_spec, p_spec,
                  pl.BlockSpec((k_pad, _LANE), lambda i: (0, 0)),
                  pl.BlockSpec((1, _LANE), lambda i: (0, 0))],
        out_specs=pl.BlockSpec((tm, _LANE), lambda i: (i, 0)),
        compiler_params=_compiler_params(),
    )(*mats, w_mat, b_row)
    return out[:m].reshape(B, PH, PW, _LANE)


def mlp(x, w1, b1, w2, b2):
    """x: (B, K1) bf16 -> (B, 128) f32 logits (columns >= 10 are zero)."""
    B, K1 = x.shape
    H = w1.shape[1]
    N = w2.shape[1]
    tb, b_pad = _row_tiling(B)
    xp = _pad2d(x, b_pad, K1).astype(jnp.bfloat16)
    out = pl.pallas_call(
        _mlp_kernel,
        out_shape=jax.ShapeDtypeStruct((b_pad, N), jnp.float32),
        grid=(b_pad // tb,),
        in_specs=[pl.BlockSpec((tb, K1), lambda i: (i, 0)),
                  pl.BlockSpec((K1, H), lambda i: (0, 0)),
                  pl.BlockSpec((1, H), lambda i: (0, 0)),
                  pl.BlockSpec((H, N), lambda i: (0, 0)),
                  pl.BlockSpec((1, N), lambda i: (0, 0))],
        out_specs=pl.BlockSpec((tb, N), lambda i: (i, 0)),
        compiler_params=_compiler_params(),
    )(xp, w1, b1, w2, b2)
    return out[:B]


# ---------------------------------------------------------------------------
# Parameters
# ---------------------------------------------------------------------------
def init_params(key):
    ks = jax.random.split(key, 8)

    def u(k, shape, fan_in):
        bound = 1.0 / jnp.sqrt(fan_in)
        return jax.random.uniform(k, shape, jnp.float32, -bound, bound)

    return {
        "conv1_w": u(ks[0], (20, 1, 5, 5), 1 * 5 * 5),
        "conv1_b": u(ks[1], (20,), 1 * 5 * 5),
        "conv2_w": u(ks[2], (50, 20, 5, 5), 20 * 5 * 5),
        "conv2_b": u(ks[3], (50,), 20 * 5 * 5),
        "fc1_w":   u(ks[4], (500, 800), 800),   # PyTorch Linear: (out, in)
        "fc1_b":   u(ks[5], (500,), 800),
        "fc2_w":   u(ks[6], (10, 500), 500),
        "fc2_b":   u(ks[7], (10,), 500),
    }


def prepare_params(p):
    """One-time permutation / padding into MXU- and lane-friendly layouts."""
    def conv_mat(w, b, k_pad):
        cout, cin, kh, kw = w.shape
        wm = jnp.transpose(w, (2, 3, 1, 0)).reshape(kh * kw * cin, cout)
        wm = _pad2d(wm, k_pad, _LANE).astype(jnp.bfloat16)
        bm = jnp.pad(b, (0, _LANE - cout)).reshape(1, _LANE).astype(jnp.float32)
        return wm, bm

    w1, b1 = conv_mat(p["conv1_w"], p["conv1_b"], 32)    # K 25  -> 32
    w2, b2 = conv_mat(p["conv2_w"], p["conv2_b"], 512)   # K 500 -> 512

    # fc1: torch columns are (c, h, w) over the (50, 4, 4) conv2 output; the
    # kernel feeds a (4, 4, 128) channel-padded NHWC flatten, so permute and
    # pad the weight columns once here (no runtime activation transpose).
    f1 = p["fc1_w"].reshape(500, 50, 4, 4)               # (out, c, h, w)
    f1 = jnp.transpose(f1, (2, 3, 1, 0))                 # (h, w, c, out)
    f1 = jnp.pad(f1, ((0, 0), (0, 0), (0, _LANE - 50), (0, 12)))
    fc1_w = f1.reshape(4 * 4 * _LANE, 512).astype(jnp.bfloat16)
    fc1_b = jnp.pad(p["fc1_b"], (0, 12)).reshape(1, 512).astype(jnp.float32)

    fc2_w = _pad2d(p["fc2_w"].T, 512, _LANE).astype(jnp.bfloat16)
    fc2_b = jnp.pad(p["fc2_b"], (0, _LANE - 10)).reshape(1, _LANE)
    fc2_b = fc2_b.astype(jnp.float32)

    return {"conv1_w": w1, "conv1_b": b1, "conv2_w": w2, "conv2_b": b2,
            "fc1_w": fc1_w, "fc1_b": fc1_b, "fc2_w": fc2_w, "fc2_b": fc2_b}


# ---------------------------------------------------------------------------
# LeNet5 forward
# ---------------------------------------------------------------------------
@jax.jit
def lenet5_forward(x_nchw, prep):
    # NCHW (PyTorch) -> NHWC for the kernels.
    x = jnp.transpose(x_nchw, (0, 2, 3, 1)).astype(jnp.bfloat16)   # (N,28,28,1)
    n = x.shape[0]
    y = conv_relu_pool(x, prep["conv1_w"], prep["conv1_b"])        # (N,12,12,128)
    y = y[..., :20]                                                # valid channels
    y = conv_relu_pool(y, prep["conv2_w"], prep["conv2_b"])        # (N,4,4,128)
    y = y.reshape(n, 4 * 4 * _LANE)                                # lane-dense flatten
    logits = mlp(y, prep["fc1_w"], prep["fc1_b"],
                 prep["fc2_w"], prep["fc2_b"])                     # (N,128) f32
    return logits[:, :10]


# Pure-JAX f32 reference for a correctness sanity check.
def lenet5_reference(x_nchw, p):
    x = x_nchw.astype(jnp.float32)
    dn = ("NCHW", "OIHW", "NCHW")
    x = lax.conv_general_dilated(x, p["conv1_w"], (1, 1), "VALID",
                                 dimension_numbers=dn)
    x = jax.nn.relu(x + p["conv1_b"][None, :, None, None])
    x = lax.reduce_window(x, -jnp.inf, lax.max, (1, 1, 2, 2), (1, 1, 2, 2), "VALID")
    x = lax.conv_general_dilated(x, p["conv2_w"], (1, 1), "VALID",
                                 dimension_numbers=dn)
    x = jax.nn.relu(x + p["conv2_b"][None, :, None, None])
    x = lax.reduce_window(x, -jnp.inf, lax.max, (1, 1, 2, 2), (1, 1, 2, 2), "VALID")
    x = x.reshape(x.shape[0], -1)
    x = jax.nn.relu(x @ p["fc1_w"].T + p["fc1_b"])
    return x @ p["fc2_w"].T + p["fc2_b"]


if __name__ == "__main__":
    key = jax.random.PRNGKey(0)
    k_in, k_par = jax.random.split(key)
    # LeNet5 requires 28x28 single-channel inputs (4*4*50 flatten constraint).
    x = jax.random.normal(k_in, (2, 1, 28, 28), dtype=jnp.float32)
    params = init_params(k_par)
    prep = prepare_params(params)

    out = lenet5_forward(x, prep)
    out = jax.block_until_ready(out)

    ref = lenet5_reference(x, params)
    assert out.shape == (2, 10)
    # bf16 MXU operands -> relaxed tolerance vs the f32 reference.
    assert jnp.allclose(out, ref, atol=5e-2, rtol=5e-2), (
        "mismatch vs reference, max abs err = "
        f"{float(jnp.max(jnp.abs(out - ref))):.5f}")
    print("KERNEL_OK")
</pallas_src>

<mosaic_0001>
module attributes {stable_mosaic.version = 11 : i64} {
  func.func @_conv_pool_kernel(%arg0: i32, %arg1: memref<288x32xbf16, #tpu.memory_space<vmem>>, %arg2: memref<288x32xbf16, #tpu.memory_space<vmem>>, %arg3: memref<288x32xbf16, #tpu.memory_space<vmem>>, %arg4: memref<288x32xbf16, #tpu.memory_space<vmem>>, %arg5: memref<32x128xbf16, #tpu.memory_space<vmem>>, %arg6: memref<1x128xf32, #tpu.memory_space<vmem>>, %arg7: memref<288x128xbf16, #tpu.memory_space<vmem>>) attributes {dimension_semantics = [#tpu.dimension_semantics<parallel>], iteration_bounds = array<i64: 1>, scalar_prefetch = 0 : i64, scratch_operands = 0 : i64, tpu.core_type = #tpu.core_type<tc>, window_params = [{transform_indices = @transform_0, window_bounds = array<i64: 288, 32>}, {transform_indices = @transform_1, window_bounds = array<i64: 288, 32>}, {transform_indices = @transform_2, window_bounds = array<i64: 288, 32>}, {transform_indices = @transform_3, window_bounds = array<i64: 288, 32>}, {pipeline_mode = #tpu.pipeline_mode<synchronous>, transform_indices = @transform_4, window_bounds = array<i64: 32, 128>}, {pipeline_mode = #tpu.pipeline_mode<synchronous>, transform_indices = @transform_5, window_bounds = array<i64: 1, 128>}, {transform_indices = @transform_6, window_bounds = array<i64: 288, 128>}]} {
    %c0 = arith.constant 0 : index
    %c0_0 = arith.constant 0 : index
    %0 = vector.load %arg5[%c0, %c0_0] : memref<32x128xbf16, #tpu.memory_space<vmem>>, vector<32x128xbf16>
    %c0_1 = arith.constant 0 : index
    %c0_2 = arith.constant 0 : index
    %1 = vector.load %arg1[%c0_1, %c0_2] : memref<288x32xbf16, #tpu.memory_space<vmem>>, vector<288x32xbf16>
    %cst = arith.constant dense<0.000000e+00> : vector<288x128xf32>
    %2 = tpu.matmul %1, %0, %cst {dimension_numbers = #tpu.dot_dimension_numbers<[1], [0], [0], [1], [0, 0, 1, 1], [], []>} : vector<288x32xbf16>, vector<32x128xbf16>, vector<288x128xf32> -> vector<288x128xf32>
    %c0_3 = arith.constant 0 : index
    %c0_4 = arith.constant 0 : index
    %3 = vector.load %arg2[%c0_3, %c0_4] : memref<288x32xbf16, #tpu.memory_space<vmem>>, vector<288x32xbf16>
    %cst_5 = arith.constant dense<0.000000e+00> : vector<288x128xf32>
    %4 = tpu.matmul %3, %0, %cst_5 {dimension_numbers = #tpu.dot_dimension_numbers<[1], [0], [0], [1], [0, 0, 1, 1], [], []>} : vector<288x32xbf16>, vector<32x128xbf16>, vector<288x128xf32> -> vector<288x128xf32>
    %c0_6 = arith.constant 0 : index
    %c0_7 = arith.constant 0 : index
    %5 = vector.load %arg3[%c0_6, %c0_7] : memref<288x32xbf16, #tpu.memory_space<vmem>>, vector<288x32xbf16>
    %cst_8 = arith.constant dense<0.000000e+00> : vector<288x128xf32>
    %6 = tpu.matmul %5, %0, %cst_8 {dimension_numbers = #tpu.dot_dimension_numbers<[1], [0], [0], [1], [0, 0, 1, 1], [], []>} : vector<288x32xbf16>, vector<32x128xbf16>, vector<288x128xf32> -> vector<288x128xf32>
    %c0_9 = arith.constant 0 : index
    %c0_10 = arith.constant 0 : index
    %7 = vector.load %arg4[%c0_9, %c0_10] : memref<288x32xbf16, #tpu.memory_space<vmem>>, vector<288x32xbf16>
    %cst_11 = arith.constant dense<0.000000e+00> : vector<288x128xf32>
    %8 = tpu.matmul %7, %0, %cst_11 {dimension_numbers = #tpu.dot_dimension_numbers<[1], [0], [0], [1], [0, 0, 1, 1], [], []>} : vector<288x32xbf16>, vector<32x128xbf16>, vector<288x128xf32> -> vector<288x128xf32>
    %9 = arith.maximumf %2, %4 : vector<288x128xf32>
    %10 = arith.maximumf %6, %8 : vector<288x128xf32>
    %11 = arith.maximumf %9, %10 : vector<288x128xf32>
    %c0_12 = arith.constant 0 : index
    %c0_13 = arith.constant 0 : index
    %12 = vector.load %arg6[%c0_12, %c0_13] : memref<1x128xf32, #tpu.memory_space<vmem>>, vector<1x128xf32>
    %13 = vector.broadcast %12 : vector<1x128xf32> to vector<288x128xf32>
    %14 = arith.addf %11, %13 : vector<288x128xf32>
    %cst_14 = arith.constant 0.000000e+00 : f32
    %15 = vector.broadcast %cst_14 : f32 to vector<288x128xf32>
    %16 = arith.maximumf %14, %15 : vector<288x128xf32>
    %17 = arith.truncf %16 : vector<288x128xf32> to vector<288x128xbf16>
    %c0_15 = arith.constant 0 : index
    %c0_16 = arith.constant 0 : index
    %18 = vector.load %arg7[%c0_15, %c0_16] : memref<288x128xbf16, #tpu.memory_space<vmem>>, vector<288x128xbf16>
    tpu.vector_store %arg7[%c0_15, %c0_16], %17 {strides = array<i32>} : memref<288x128xbf16, #tpu.memory_space<vmem>>, vector<288x128xbf16>,
    return
  }
  func.func @transform_0(%arg0: i32) -> (i32, i32) {
    %c0_i32 = arith.constant 0 : i32
    %c0_i32_0 = arith.constant 0 : i32
    return %arg0, %c0_i32 : i32, i32
  }
  func.func @transform_1(%arg0: i32) -> (i32, i32) {
    %c0_i32 = arith.constant 0 : i32
    %c0_i32_0 = arith.constant 0 : i32
    return %arg0, %c0_i32 : i32, i32
  }
  func.func @transform_2(%arg0: i32) -> (i32, i32) {
    %c0_i32 = arith.constant 0 : i32
    %c0_i32_0 = arith.constant 0 : i32
    return %arg0, %c0_i32 : i32, i32
  }
  func.func @transform_3(%arg0: i32) -> (i32, i32) {
    %c0_i32 = arith.constant 0 : i32
    %c0_i32_0 = arith.constant 0 : i32
    return %arg0, %c0_i32 : i32, i32
  }
  func.func @transform_4(%arg0: i32) -> (i32, i32) {
    %c0_i32 = arith.constant 0 : i32
    %c0_i32_0 = arith.constant 0 : i32
    %c0_i32_1 = arith.constant 0 : i32
    return %c0_i32, %c0_i32_0 : i32, i32
  }
  func.func @transform_5(%arg0: i32) -> (i32, i32) {
    %c0_i32 = arith.constant 0 : i32
    %c0_i32_0 = arith.constant 0 : i32
    %c0_i32_1 = arith.constant 0 : i32
    return %c0_i32, %c0_i32_0 : i32, i32
  }
  func.func @transform_6(%arg0: i32) -> (i32, i32) {
    %c0_i32 = arith.constant 0 : i32
    %c0_i32_0 = arith.constant 0 : i32
    return %arg0, %c0_i32 : i32, i32
  }
}

module attributes {stable_mosaic.version = 11 : i64} {
  func.func @_conv_pool_kernel(%arg0: i32, %arg1: memref<32x512xbf16, #tpu.memory_space<vmem>>, %arg2: memref<32x512xbf16, #tpu.memory_space<vmem>>, %arg3: memref<32x512xbf16, #tpu.memory_space<vmem>>, %arg4: memref<32x512xbf16, #tpu.memory_space<vmem>>, %arg5: memref<512x128xbf16, #tpu.memory_space<vmem>>, %arg6: memref<1x128xf32, #tpu.memory_space<vmem>>, %arg7: memref<32x128xbf16, #tpu.memory_space<vmem>>) attributes {dimension_semantics = [#tpu.dimension_semantics<parallel>], iteration_bounds = array<i64: 1>, scalar_prefetch = 0 : i64, scratch_operands = 0 : i64, tpu.core_type = #tpu.core_type<tc>, window_params = [{transform_indices = @transform_0, window_bounds = array<i64: 32, 512>}, {transform_indices = @transform_1, window_bounds = array<i64: 32, 512>}, {transform_indices = @transform_2, window_bounds = array<i64: 32, 512>}, {transform_indices = @transform_3, window_bounds = array<i64: 32, 512>}, {pipeline_mode = #tpu.pipeline_mode<synchronous>, transform_indices = @transform_4, window_bounds = array<i64: 512, 128>}, {pipeline_mode = #tpu.pipeline_mode<synchronous>, transform_indices = @transform_5, window_bounds = array<i64: 1, 128>}, {transform_indices = @transform_6, window_bounds = array<i64: 32, 128>}]} {
    %c0 = arith.constant 0 : index
    %c0_0 = arith.constant 0 : index
    %0 = vector.load %arg5[%c0, %c0_0] : memref<512x128xbf16, #tpu.memory_space<vmem>>, vector<512x128xbf16>
    %c0_1 = arith.constant 0 : index
    %c0_2 = arith.constant 0 : index
    %1 = vector.load %arg1[%c0_1, %c0_2] : memref<32x512xbf16, #tpu.memory_space<vmem>>, vector<32x512xbf16>
    %cst = arith.constant dense<0.000000e+00> : vector<32x128xf32>
    %2 = tpu.matmul %1, %0, %cst {dimension_numbers = #tpu.dot_dimension_numbers<[1], [0], [0], [1], [0, 0, 1, 1], [], []>} : vector<32x512xbf16>, vector<512x128xbf16>, vector<32x128xf32> -> vector<32x128xf32>
    %c0_3 = arith.constant 0 : index
    %c0_4 = arith.constant 0 : index
    %3 = vector.load %arg2[%c0_3, %c0_4] : memref<32x512xbf16, #tpu.memory_space<vmem>>, vector<32x512xbf16>
    %cst_5 = arith.constant dense<0.000000e+00> : vector<32x128xf32>
    %4 = tpu.matmul %3, %0, %cst_5 {dimension_numbers = #tpu.dot_dimension_numbers<[1], [0], [0], [1], [0, 0, 1, 1], [], []>} : vector<32x512xbf16>, vector<512x128xbf16>, vector<32x128xf32> -> vector<32x128xf32>
    %c0_6 = arith.constant 0 : index
    %c0_7 = arith.constant 0 : index
    %5 = vector.load %arg3[%c0_6, %c0_7] : memref<32x512xbf16, #tpu.memory_space<vmem>>, vector<32x512xbf16>
    %cst_8 = arith.constant dense<0.000000e+00> : vector<32x128xf32>
    %6 = tpu.matmul %5, %0, %cst_8 {dimension_numbers = #tpu.dot_dimension_numbers<[1], [0], [0], [1], [0, 0, 1, 1], [], []>} : vector<32x512xbf16>, vector<512x128xbf16>, vector<32x128xf32> -> vector<32x128xf32>
    %c0_9 = arith.constant 0 : index
    %c0_10 = arith.constant 0 : index
    %7 = vector.load %arg4[%c0_9, %c0_10] : memref<32x512xbf16, #tpu.memory_space<vmem>>, vector<32x512xbf16>
    %cst_11 = arith.constant dense<0.000000e+00> : vector<32x128xf32>
    %8 = tpu.matmul %7, %0, %cst_11 {dimension_numbers = #tpu.dot_dimension_numbers<[1], [0], [0], [1], [0, 0, 1, 1], [], []>} : vector<32x512xbf16>, vector<512x128xbf16>, vector<32x128xf32> -> vector<32x128xf32>
    %9 = arith.maximumf %2, %4 : vector<32x128xf32>
    %10 = arith.maximumf %6, %8 : vector<32x128xf32>
    %11 = arith.maximumf %9, %10 : vector<32x128xf32>
    %c0_12 = arith.constant 0 : index
    %c0_13 = arith.constant 0 : index
    %12 = vector.load %arg6[%c0_12, %c0_13] : memref<1x128xf32, #tpu.memory_space<vmem>>, vector<1x128xf32>
    %13 = vector.broadcast %12 : vector<1x128xf32> to vector<32x128xf32>
    %14 = arith.addf %11, %13 : vector<32x128xf32>
    %cst_14 = arith.constant 0.000000e+00 : f32
    %15 = vector.broadcast %cst_14 : f32 to vector<32x128xf32>
    %16 = arith.maximumf %14, %15 : vector<32x128xf32>
    %17 = arith.truncf %16 : vector<32x128xf32> to vector<32x128xbf16>
    %c0_15 = arith.constant 0 : index
    %c0_16 = arith.constant 0 : index
    %18 = vector.load %arg7[%c0_15, %c0_16] : memref<32x128xbf16, #tpu.memory_space<vmem>>, vector<32x128xbf16>
    tpu.vector_store %arg7[%c0_15, %c0_16], %17 {strides = array<i32>} : memref<32x128xbf16, #tpu.memory_space<vmem>>, vector<32x128xbf16>,
    return
  }
  func.func @transform_0(%arg0: i32) -> (i32, i32) {
    %c0_i32 = arith.constant 0 : i32
    %c0_i32_0 = arith.constant 0 : i32
    return %arg0, %c0_i32 : i32, i32
  }
  func.func @transform_1(%arg0: i32) -> (i32, i32) {
    %c0_i32 = arith.constant 0 : i32
    %c0_i32_0 = arith.constant 0 : i32
    return %arg0, %c0_i32 : i32, i32
  }
  func.func @transform_2(%arg0: i32) -> (i32, i32) {
    %c0_i32 = arith.constant 0 : i32
    %c0_i32_0 = arith.constant 0 : i32
    return %arg0, %c0_i32 : i32, i32
  }
  func.func @transform_3(%arg0: i32) -> (i32, i32) {
    %c0_i32 = arith.constant 0 : i32
    %c0_i32_0 = arith.constant 0 : i32
    return %arg0, %c0_i32 : i32, i32
  }
  func.func @transform_4(%arg0: i32) -> (i32, i32) {
    %c0_i32 = arith.constant 0 : i32
    %c0_i32_0 = arith.constant 0 : i32
    %c0_i32_1 = arith.constant 0 : i32
    return %c0_i32, %c0_i32_0 : i32, i32
  }
  func.func @transform_5(%arg0: i32) -> (i32, i32) {
    %c0_i32 = arith.constant 0 : i32
    %c0_i32_0 = arith.constant 0 : i32
    %c0_i32_1 = arith.constant 0 : i32
    return %c0_i32, %c0_i32_0 : i32, i32
  }
  func.func @transform_6(%arg0: i32) -> (i32, i32) {
    %c0_i32 = arith.constant 0 : i32
    %c0_i32_0 = arith.constant 0 : i32
    return %arg0, %c0_i32 : i32, i32
  }
}

module attributes {stable_mosaic.version = 11 : i64} {
  func.func @_mlp_kernel(%arg0: i32, %arg1: memref<16x2048xbf16, #tpu.memory_space<vmem>>, %arg2: memref<2048x512xbf16, #tpu.memory_space<vmem>>, %arg3: memref<1x512xf32, #tpu.memory_space<vmem>>, %arg4: memref<512x128xbf16, #tpu.memory_space<vmem>>, %arg5: memref<1x128xf32, #tpu.memory_space<vmem>>, %arg6: memref<16x128xf32, #tpu.memory_space<vmem>>) attributes {dimension_semantics = [#tpu.dimension_semantics<parallel>], iteration_bounds = array<i64: 1>, scalar_prefetch = 0 : i64, scratch_operands = 0 : i64, tpu.core_type = #tpu.core_type<tc>, window_params = [{transform_indices = @transform_0, window_bounds = array<i64: 16, 2048>}, {pipeline_mode = #tpu.pipeline_mode<synchronous>, transform_indices = @transform_1, window_bounds = array<i64: 2048, 512>}, {pipeline_mode = #tpu.pipeline_mode<synchronous>, transform_indices = @transform_2, window_bounds = array<i64: 1, 512>}, {pipeline_mode = #tpu.pipeline_mode<synchronous>, transform_indices = @transform_3, window_bounds = array<i64: 512, 128>}, {pipeline_mode = #tpu.pipeline_mode<synchronous>, transform_indices = @transform_4, window_bounds = array<i64: 1, 128>}, {transform_indices = @transform_5, window_bounds = array<i64: 16, 128>}]} {
    %c0 = arith.constant 0 : index
    %c0_0 = arith.constant 0 : index
    %0 = vector.load %arg1[%c0, %c0_0] : memref<16x2048xbf16, #tpu.memory_space<vmem>>, vector<16x2048xbf16>
    %c0_1 = arith.constant 0 : index
    %c0_2 = arith.constant 0 : index
    %1 = vector.load %arg2[%c0_1, %c0_2] : memref<2048x512xbf16, #tpu.memory_space<vmem>>, vector<2048x512xbf16>
    %cst = arith.constant dense<0.000000e+00> : vector<16x512xf32>
    %2 = tpu.matmul %0, %1, %cst {dimension_numbers = #tpu.dot_dimension_numbers<[1], [0], [0], [1], [0, 0, 1, 1], [], []>} : vector<16x2048xbf16>, vector<2048x512xbf16>, vector<16x512xf32> -> vector<16x512xf32>
    %c0_3 = arith.constant 0 : index
    %c0_4 = arith.constant 0 : index
    %3 = vector.load %arg3[%c0_3, %c0_4] : memref<1x512xf32, #tpu.memory_space<vmem>>, vector<1x512xf32>
    %4 = vector.broadcast %3 : vector<1x512xf32> to vector<16x512xf32>
    %5 = arith.addf %2, %4 : vector<16x512xf32>
    %cst_5 = arith.constant 0.000000e+00 : f32
    %6 = vector.broadcast %cst_5 : f32 to vector<16x512xf32>
    %7 = arith.maximumf %5, %6 : vector<16x512xf32>
    %8 = arith.truncf %7 : vector<16x512xf32> to vector<16x512xbf16>
    %c0_6 = arith.constant 0 : index
    %c0_7 = arith.constant 0 : index
    %9 = vector.load %arg4[%c0_6, %c0_7] : memref<512x128xbf16, #tpu.memory_space<vmem>>, vector<512x128xbf16>
    %cst_8 = arith.constant dense<0.000000e+00> : vector<16x128xf32>
    %10 = tpu.matmul %8, %9, %cst_8 {dimension_numbers = #tpu.dot_dimension_numbers<[1], [0], [0], [1], [0, 0, 1, 1], [], []>} : vector<16x512xbf16>, vector<512x128xbf16>, vector<16x128xf32> -> vector<16x128xf32>
    %c0_9 = arith.constant 0 : index
    %c0_10 = arith.constant 0 : index
    %11 = vector.load %arg5[%c0_9, %c0_10] : memref<1x128xf32, #tpu.memory_space<vmem>>, vector<1x128xf32>
    %12 = vector.broadcast %11 : vector<1x128xf32> to vector<16x128xf32>
    %13 = arith.addf %10, %12 : vector<16x128xf32>
    %c0_11 = arith.constant 0 : index
    %c0_12 = arith.constant 0 : index
    %14 = vector.load %arg6[%c0_11, %c0_12] : memref<16x128xf32, #tpu.memory_space<vmem>>, vector<16x128xf32>
    tpu.vector_store %arg6[%c0_11, %c0_12], %13 {strides = array<i32>} : memref<16x128xf32, #tpu.memory_space<vmem>>, vector<16x128xf32>,
    return
  }
  func.func @transform_0(%arg0: i32) -> (i32, i32) {
    %c0_i32 = arith.constant 0 : i32
    %c0_i32_0 = arith.constant 0 : i32
    return %arg0, %c0_i32 : i32, i32
  }
  func.func @transform_1(%arg0: i32) -> (i32, i32) {
    %c0_i32 = arith.constant 0 : i32
    %c0_i32_0 = arith.constant 0 : i32
    %c0_i32_1 = arith.constant 0 : i32
    return %c0_i32, %c0_i32_0 : i32, i32
  }
  func.func @transform_2(%arg0: i32) -> (i32, i32) {
    %c0_i32 = arith.constant 0 : i32
    %c0_i32_0 = arith.constant 0 : i32
    %c0_i32_1 = arith.constant 0 : i32
    return %c0_i32, %c0_i32_0 : i32, i32
  }
  func.func @transform_3(%arg0: i32) -> (i32, i32) {
    %c0_i32 = arith.constant 0 : i32
    %c0_i32_0 = arith.constant 0 : i32
    %c0_i32_1 = arith.constant 0 : i32
    return %c0_i32, %c0_i32_0 : i32, i32
  }
  func.func @transform_4(%arg0: i32) -> (i32, i32) {
    %c0_i32 = arith.constant 0 : i32
    %c0_i32_0 = arith.constant 0 : i32
    %c0_i32_1 = arith.constant 0 : i32
    return %c0_i32, %c0_i32_0 : i32, i32
  }
  func.func @transform_5(%arg0: i32) -> (i32, i32) {
    %c0_i32 = arith.constant 0 : i32
    %c0_i32_0 = arith.constant 0 : i32
    return %arg0, %c0_i32 : i32, i32
  }
}

</mosaic_0001>

<bundles_post_ra>
// kernel: lenet5_forward.3
= control target key start
LH: loop header
LB: loop body
LE: loop exit
PB: predicated region body
PF: predicated region fallthrough
CT: control target
= control target key end

     0   :  { %vm166_vm0 = vcmask 261120   ;;  %s2391_s4 = inlined_call_operand.vmem [shape: bf16[32,128], index: 4, kind: input, shape index: {}]   ;;  %s2392_s0 = inlined_call_operand.vmem [shape: bf16[288,32], index: 0, kind: input, shape index: {}]   ;;  %s2393_s1 = inlined_call_operand.vmem [shape: bf16[288,32], index: 1, kind: input, shape index: {}]   ;;  %s2394_s2 = inlined_call_operand.vmem [shape: bf16[288,32], index: 2, kind: input, shape index: {}]   ;;  %s2395_s3 = inlined_call_operand.vmem [shape: bf16[288,32], index: 3, kind: input, shape index: {}]   ;;  %s2396_s5 = inlined_call_operand.vmem [shape: f32[1,128], index: 5, kind: input, shape index: {}]   ;;  %s2397_s6 = inlined_call_operand.vmem [shape: bf16[288,128], index: 6, kind: output, shape index: {}]  }
   0x1   :  { %v1786_v0 = vld [vmem:[%s2391_s4 + $0x8] sm:$0xff]  ;;  %v1785_v1 = vld [vmem:[%s2391_s4] sm:$0xff]  ;;  %v1789_v10 = vld [vmem:[%s2392_s0 + $0x10] sm:$0xff] }
   0x2   :  { %227 = vmatpush.bf16.msra.mxu0 %v1786_v0  ;;  %506 = vmatpush.bf16.msra.mxu1 %v1786_v0  ;;  %v1787_v2 = vld [vmem:[%s2392_s0] sm:$0xff]  ;;  %v1788_v6 = vld [vmem:[%s2392_s0 + $0x8] sm:$0xff]  ;;  %v1807_v11 = vld [vmem:[%s2393_s1 + $0x10] sm:$0xff] }
   0x3   :  { %785 = vmatpush.bf16.msra.mxu2 %v1786_v0  ;;  %1064 = vmatpush.bf16.msra.mxu3 %v1786_v0  ;;  %v1805_v3 = vld [vmem:[%s2393_s1] sm:$0xff]  ;;  %v1806_v7 = vld [vmem:[%s2393_s1 + $0x8] sm:$0xff]  ;;  %v1825_v12 = vld [vmem:[%s2394_s2 + $0x10] sm:$0xff] }
   0x4   :  { %v1823_v4 = vld [vmem:[%s2394_s2] sm:$0xff]  ;;  %v1824_v8 = vld [vmem:[%s2394_s2 + $0x8] sm:$0xff]  ;;  %v1843_v13 = vld [vmem:[%s2395_s3 + $0x10] sm:$0xff] }
   0x5   :  { %v1841_v5 = vld [vmem:[%s2395_s3] sm:$0xff]  ;;  %v1842_v9 = vld [vmem:[%s2395_s3 + $0x8] sm:$0xff]  ;;  %v1790_v14 = vld [vmem:[%s2392_s0 + $0x18] sm:$0xff] }
   0x6   :  { %228 = vmatpush.bf16.msra.mxu0 %v1785_v1  ;;  %507 = vmatpush.bf16.msra.mxu1 %v1785_v1  ;;  %v1808_v15 = vld [vmem:[%s2393_s1 + $0x18] sm:$0xff]  ;;  %v1791_v18 = vld [vmem:[%s2392_s0 + $0x20] sm:$0xff]  ;;  %v1792_v22 = vld [vmem:[%s2392_s0 + $0x28] sm:$0xff] }
   0x7   :  { %786 = vmatpush.bf16.msra.mxu2 %v1785_v1  ;;  %1065 = vmatpush.bf16.msra.mxu3 %v1785_v1  ;;  %v1826_v16 = vld [vmem:[%s2394_s2 + $0x18] sm:$0xff]  ;;  %v1809_v19 = vld [vmem:[%s2393_s1 + $0x20] sm:$0xff]  ;;  %v1810_v23 = vld [vmem:[%s2393_s1 + $0x28] sm:$0xff] }
   0x8   :  { %v1844_v17 = vld [vmem:[%s2395_s3 + $0x18] sm:$0xff]  ;;  %v1827_v20 = vld [vmem:[%s2394_s2 + $0x20] sm:$0xff]  ;;  %v1828_v24 = vld [vmem:[%s2394_s2 + $0x28] sm:$0xff] }
   0x9   :  { %1497 = vmatmul.msk.bf16.vlgmr.msra.gmra.mxu0 %vm166_vm0, %v1787_v2  ;;  %1587 = vmatmul.msk.bf16.vlgmr.msra.gmra.mxu1 %vm166_vm0, %v1805_v3  ;;  %v1845_v21 = vld [vmem:[%s2395_s3 + $0x20] sm:$0xff]  ;;  %v1846_v25 = vld [vmem:[%s2395_s3 + $0x28] sm:$0xff]  ;;  %v1793_v26 = vld [vmem:[%s2392_s0 + $0x30] sm:$0xff] }
   0xa   :  { %1677 = vmatmul.msk.bf16.vlgmr.msra.gmra.mxu2 %vm166_vm0, %v1823_v4  ;;  %1767 = vmatmul.msk.bf16.vlgmr.msra.gmra.mxu3 %vm166_vm0, %v1841_v5  ;;  %v1811_v27 = vld [vmem:[%s2393_s1 + $0x30] sm:$0xff]  ;;  %v1794_v30 = vld [vmem:[%s2392_s0 + $0x38] sm:$0xff]  ;;  %v1795_v34 = vld [vmem:[%s2392_s0 + $0x40] sm:$0xff] }
   0xb   :  { %v1829_v28 = vld [vmem:[%s2394_s2 + $0x30] sm:$0xff]  ;;  %v1812_v31 = vld [vmem:[%s2393_s1 + $0x38] sm:$0xff]  ;;  %v1813_v35 = vld [vmem:[%s2393_s1 + $0x40] sm:$0xff] }
   0xc   :  { %v1847_v29 = vld [vmem:[%s2395_s3 + $0x30] sm:$0xff]  ;;  %v1830_v32 = vld [vmem:[%s2394_s2 + $0x38] sm:$0xff]  ;;  %v1831_v38 = vld [vmem:[%s2394_s2 + $0x40] sm:$0xff] }
   0xd   :  { %v1848_v33 = vld [vmem:[%s2395_s3 + $0x38] sm:$0xff]  ;;  %v1849_v39 = vld [vmem:[%s2395_s3 + $0x40] sm:$0xff]  ;;  %v1796_v50 = vld [vmem:[%s2392_s0 + $0x48] sm:$0xff] }
   0xe   :  { %v2155_v47 = vld [vmem:[%s2396_s5] ss:$0 sm:$0xff]  ;;  %v1814_v51 = vld [vmem:[%s2393_s1 + $0x48] sm:$0xff] }
   0xf   :  { %v1832_v56 = vld [vmem:[%s2394_s2 + $0x48] sm:$0xff] }
  0x10   :  { %v1850_v57 = vld [vmem:[%s2395_s3 + $0x48] sm:$0xff] }
  0x19   :  { %1498 = vmatmul.msk.bf16.gmra.mxu0 %vm166_vm0, %v1788_v6  ;;  %1588 = vmatmul.msk.bf16.gmra.mxu1 %vm166_vm0, %v1806_v7 }
  0x1a   :  { %1678 = vmatmul.msk.bf16.gmra.mxu2 %vm166_vm0, %v1824_v8  ;;  %1768 = vmatmul.msk.bf16.gmra.mxu3 %vm166_vm0, %v1842_v9  ;;  %v1797_v9 = vld [vmem:[%s2392_s0 + $0x50] sm:$0xff] }
  0x29   :  { %1499 = vmatmul.msk.bf16.gmra.mxu0 %vm166_vm0, %v1789_v10  ;;  %1589 = vmatmul.msk.bf16.gmra.mxu1 %vm166_vm0, %v1807_v11  ;;  %v1815_v10 = vld [vmem:[%s2393_s1 + $0x50] sm:$0xff] }
  0x2a   :  { %1679 = vmatmul.msk.bf16.gmra.mxu2 %vm166_vm0, %v1825_v12  ;;  %1769 = vmatmul.msk.bf16.gmra.mxu3 %vm166_vm0, %v1843_v13 }
  0x39   :  { %1500 = vmatmul.msk.bf16.gmra.mxu0 %vm166_vm0, %v1790_v14  ;;  %1590 = vmatmul.msk.bf16.gmra.mxu1 %vm166_vm0, %v1808_v15  ;;  %v1833_v15 = vld [vmem:[%s2394_s2 + $0x50] sm:$0xff] }
  0x3a   :  { %1680 = vmatmul.msk.bf16.gmra.mxu2 %vm166_vm0, %v1826_v16  ;;  %1770 = vmatmul.msk.bf16.gmra.mxu3 %vm166_vm0, %v1844_v17  ;;  %v1851_v16 = vld [vmem:[%s2395_s3 + $0x50] sm:$0xff] }
  0x49   :  { %1501 = vmatmul.msk.bf16.gmra.mxu0 %vm166_vm0, %v1791_v18  ;;  %1591 = vmatmul.msk.bf16.gmra.mxu1 %vm166_vm0, %v1809_v19 }
  0x4a   :  { %1681 = vmatmul.msk.bf16.gmra.mxu2 %vm166_vm0, %v1827_v20  ;;  %1771 = vmatmul.msk.bf16.gmra.mxu3 %vm166_vm0, %v1845_v21 }
  0x59   :  { %1502 = vmatmul.msk.bf16.gmra.mxu0 %vm166_vm0, %v1792_v22  ;;  %1592 = vmatmul.msk.bf16.gmra.mxu1 %vm166_vm0, %v1810_v23 }
  0x5a   :  { %1682 = vmatmul.msk.bf16.gmra.mxu2 %vm166_vm0, %v1828_v24  ;;  %1772 = vmatmul.msk.bf16.gmra.mxu3 %vm166_vm0, %v1846_v25 }
  0x69   :  { %1503 = vmatmul.msk.bf16.gmra.mxu0 %vm166_vm0, %v1793_v26  ;;  %1593 = vmatmul.msk.bf16.gmra.mxu1 %vm166_vm0, %v1811_v27 }
  0x6a   :  { %1683 = vmatmul.msk.bf16.gmra.mxu2 %vm166_vm0, %v1829_v28  ;;  %1773 = vmatmul.msk.bf16.gmra.mxu3 %vm166_vm0, %v1847_v29 }
  0x79   :  { %1504 = vmatmul.msk.bf16.gmra.mxu0 %vm166_vm0, %v1794_v30  ;;  %1594 = vmatmul.msk.bf16.gmra.mxu1 %vm166_vm0, %v1812_v31 }
  0x7a   :  { %1684 = vmatmul.msk.bf16.gmra.mxu2 %vm166_vm0, %v1830_v32  ;;  %1774 = vmatmul.msk.bf16.gmra.mxu3 %vm166_vm0, %v1848_v33  ;;  %v1798_v32 = vld [vmem:[%s2392_s0 + $0x58] sm:$0xff] }
  0x7b   :  { %v1816_v33 = vld [vmem:[%s2393_s1 + $0x58] sm:$0xff] }
  0x86   :  { %v230_v36 = vpop.f32.mrf.mxu0  ;;  %v509_v37 = vpop.f32.mrf.mxu1 }
  0x87   :  { %v1157_v44 = vmax.f32 %v230_v36, %v509_v37 }
  0x89   :  { %1505 = vmatmul.msk.bf16.gmra.mxu0 %vm166_vm0, %v1795_v34  ;;  %1595 = vmatmul.msk.bf16.gmra.mxu1 %vm166_vm0, %v1813_v35 }
  0x8a   :  { %1685 = vmatmul.msk.bf16.gmra.mxu2 %vm166_vm0, %v1831_v38  ;;  %1775 = vmatmul.msk.bf16.gmra.mxu3 %vm166_vm0, %v1849_v39  ;;  %v1834_v38 = vld [vmem:[%s2394_s2 + $0x58] sm:$0xff] }
  0x8b   :  { %v1852_v39 = vld [vmem:[%s2395_s3 + $0x58] sm:$0xff] }
  0x8d   :  { %v788_v40 = vpop.f32.mrf.mxu2  ;;  %v1067_v41 = vpop.f32.mrf.mxu3 }
  0x8e   :  { %v232_v42 = vpop.f32.mrf.mxu0  ;;  %v511_v43 = vpop.f32.mrf.mxu1  ;;  %v1193_v45 = vmax.f32 %v788_v40, %v1067_v41 }
  0x8f   :  { %v1158_v52 = vmax.f32 %v232_v42, %v511_v43 }
  0x90   :  { %v1229_v46 = vmax.f32 %v1157_v44, %v1193_v45 }
  0x92   :  { %v1269_v58 = vadd.f32 %v2155_v47, %v1229_v46 }
  0x94   :  { %v1305_v61 = vmax.f32 %v1269_v58, 0.0 }
  0x95   :  { %v790_v48 = vpop.f32.mrf.mxu2  ;;  %v1069_v49 = vpop.f32.mrf.mxu3 }
  0x96   :  { %v1194_v53 = vmax.f32 %v790_v48, %v1069_v49  ;;  %v235_v54 = vpop.f32.mrf.mxu0  ;;  %v514_v55 = vpop.f32.mrf.mxu1 }
  0x97   :  { %v1159_v4 = vmax.f32 %v235_v54, %v514_v55 }
  0x98   :  { %v1230_v59 = vmax.f32 %v1158_v52, %v1194_v53 }
  0x99   :  { %1506 = vmatmul.msk.bf16.gmra.mxu0 %vm166_vm0, %v1796_v50  ;;  %1596 = vmatmul.msk.bf16.gmra.mxu1 %vm166_vm0, %v1814_v51 }
  0x9a   :  { %v1270_v60 = vadd.f32 %v2155_v47, %v1230_v59  ;;  %1686 = vmatmul.msk.bf16.gmra.mxu2 %vm166_vm0, %v1832_v56  ;;  %1776 = vmatmul.msk.bf16.gmra.mxu3 %vm166_vm0, %v1850_v57  ;;  %v1799_v56 = vld [vmem:[%s2392_s0 + $0x60] sm:$0xff] }
  0x9b   :  { %v1817_v57 = vld [vmem:[%s2393_s1 + $0x60] sm:$0xff] }
  0x9c   :  { %v1306_v62 = vmax.f32 %v1270_v60, 0.0 }
  0x9d   :  { %v793_v63 = vpop.f32.mrf.mxu2  ;;  %v1072_v0 = vpop.f32.mrf.mxu3 }
  0x9e   :  { %v1862_v1 = vpack.c.bf16 %v1306_v62, %v1305_v61  ;;  %v237_v2 = vpop.f32.mrf.mxu0  ;;  %v516_v3 = vpop.f32.mrf.mxu1  ;;  %v1195_v5 = vmax.f32 %v793_v63, %v1072_v0  ;;  %v1835_v62 = vld [vmem:[%s2394_s2 + $0x60] sm:$0xff] }
  0x9f   :  { %v1160_v11 = vmax.f32 %v237_v2, %v516_v3  ;;  %v1853_v63 = vld [vmem:[%s2395_s3 + $0x60] sm:$0xff] }
  0xa0   :  { %1863 = vst [vmem:[%s2397_s6] sm:$0xff] %v1862_v1   ;;  %v1231_v6 = vmax.f32 %v1159_v4, %v1195_v5 }
  0xa2   :  { %v1271_v17 = vadd.f32 %v2155_v47, %v1231_v6 }
  0xa4   :  { %v1307_v20 = vmax.f32 %v1271_v17, 0.0 }
  0xa5   :  { %v795_v7 = vpop.f32.mrf.mxu2  ;;  %v1074_v8 = vpop.f32.mrf.mxu3 }
  0xa6   :  { %v1196_v12 = vmax.f32 %v795_v7, %v1074_v8  ;;  %v240_v13 = vpop.f32.mrf.mxu0  ;;  %v519_v14 = vpop.f32.mrf.mxu1 }
  0xa7   :  { %v1161_v27 = vmax.f32 %v240_v13, %v519_v14 }
  0xa8   :  { %v1232_v18 = vmax.f32 %v1160_v11, %v1196_v12 }
  0xa9   :  { %1507 = vmatmul.msk.bf16.gmra.mxu0 %vm166_vm0, %v1797_v9  ;;  %1597 = vmatmul.msk.bf16.gmra.mxu1 %vm166_vm0, %v1815_v10 }
  0xaa   :  { %v1272_v19 = vadd.f32 %v2155_v47, %v1232_v18  ;;  %1687 = vmatmul.msk.bf16.gmra.mxu2 %vm166_vm0, %v1833_v15  ;;  %1777 = vmatmul.msk.bf16.gmra.mxu3 %vm166_vm0, %v1851_v16  ;;  %v1800_v15 = vld [vmem:[%s2392_s0 + $0x68] sm:$0xff] }
  0xab   :  { %v1818_v16 = vld [vmem:[%s2393_s1 + $0x68] sm:$0xff] }
  0xac   :  { %v1308_v21 = vmax.f32 %v1272_v19, 0.0 }
  0xad   :  { %v798_v22 = vpop.f32.mrf.mxu2  ;;  %v1077_v23 = vpop.f32.mrf.mxu3 }
  0xae   :  { %v1867_v24 = vpack.c.bf16 %v1308_v21, %v1307_v20  ;;  %v242_v25 = vpop.f32.mrf.mxu0  ;;  %v521_v26 = vpop.f32.mrf.mxu1  ;;  %v1197_v28 = vmax.f32 %v798_v22, %v1077_v23  ;;  %v1836_v21 = vld [vmem:[%s2394_s2 + $0x68] sm:$0xff] }
  0xaf   :  { %v1162_v34 = vmax.f32 %v242_v25, %v521_v26  ;;  %v1854_v22 = vld [vmem:[%s2395_s3 + $0x68] sm:$0xff] }
  0xb0   :  { %1949 = vst [vmem:[%s2397_s6 + $0x8] sm:$0xff] %v1867_v24   ;;  %v1233_v29 = vmax.f32 %v1161_v27, %v1197_v28 }
  0xb2   :  { %v1273_v40 = vadd.f32 %v2155_v47, %v1233_v29 }
  0xb4   :  { %v1309_v43 = vmax.f32 %v1273_v40, 0.0 }
  0xb5   :  { %v800_v30 = vpop.f32.mrf.mxu2  ;;  %v1079_v31 = vpop.f32.mrf.mxu3 }
  0xb6   :  { %v1198_v35 = vmax.f32 %v800_v30, %v1079_v31  ;;  %v245_v36 = vpop.f32.mrf.mxu0  ;;  %v524_v37 = vpop.f32.mrf.mxu1 }
  0xb7   :  { %v1163_v51 = vmax.f32 %v245_v36, %v524_v37 }
  0xb8   :  { %v1234_v41 = vmax.f32 %v1162_v34, %v1198_v35 }
  0xb9   :  { %1508 = vmatmul.msk.bf16.gmra.mxu0 %vm166_vm0, %v1798_v32  ;;  %1598 = vmatmul.msk.bf16.gmra.mxu1 %vm166_vm0, %v1816_v33 }
  0xba   :  { %v1274_v42 = vadd.f32 %v2155_v47, %v1234_v41  ;;  %1688 = vmatmul.msk.bf16.gmra.mxu2 %vm166_vm0, %v1834_v38  ;;  %1778 = vmatmul.msk.bf16.gmra.mxu3 %vm166_vm0, %v1852_v39  ;;  %v1801_v38 = vld [vmem:[%s2392_s0 + $0x70] sm:$0xff] }
  0xbb   :  { %v1819_v39 = vld [vmem:[%s2393_s1 + $0x70] sm:$0xff] }
  0xbc   :  { %v1310_v44 = vmax.f32 %v1274_v42, 0.0 }
  0xbd   :  { %v803_v45 = vpop.f32.mrf.mxu2  ;;  %v1082_v46 = vpop.f32.mrf.mxu3 }
  0xbe   :  { %v1872_v48 = vpack.c.bf16 %v1310_v44, %v1309_v43  ;;  %v247_v49 = vpop.f32.mrf.mxu0  ;;  %v526_v50 = vpop.f32.mrf.mxu1  ;;  %v1199_v52 = vmax.f32 %v803_v45, %v1082_v46  ;;  %v1837_v44 = vld [vmem:[%s2394_s2 + $0x70] sm:$0xff] }
  0xbf   :  { %v1164_v58 = vmax.f32 %v247_v49, %v526_v50  ;;  %v1855_v45 = vld [vmem:[%s2395_s3 + $0x70] sm:$0xff] }
  0xc0   :  { %1950 = vst [vmem:[%s2397_s6 + $0x10] sm:$0xff] %v1872_v48   ;;  %v1235_v53 = vmax.f32 %v1163_v51, %v1199_v52 }
  0xc2   :  { %v1275_v0 = vadd.f32 %v2155_v47, %v1235_v53 }
  0xc4   :  { %v1311_v3 = vmax.f32 %v1275_v0, 0.0 }
  0xc5   :  { %v805_v54 = vpop.f32.mrf.mxu2  ;;  %v1084_v55 = vpop.f32.mrf.mxu3 }
  0xc6   :  { %v1200_v59 = vmax.f32 %v805_v54, %v1084_v55  ;;  %v250_v60 = vpop.f32.mrf.mxu0  ;;  %v529_v61 = vpop.f32.mrf.mxu1 }
  0xc7   :  { %v1165_v10 = vmax.f32 %v250_v60, %v529_v61 }
  0xc8   :  { %v1236_v1 = vmax.f32 %v1164_v58, %v1200_v59 }
  0xc9   :  { %1509 = vmatmul.msk.bf16.gmra.mxu0 %vm166_vm0, %v1799_v56  ;;  %1599 = vmatmul.msk.bf16.gmra.mxu1 %vm166_vm0, %v1817_v57 }
  0xca   :  { %v1276_v2 = vadd.f32 %v2155_v47, %v1236_v1  ;;  %1689 = vmatmul.msk.bf16.gmra.mxu2 %vm166_vm0, %v1835_v62  ;;  %1779 = vmatmul.msk.bf16.gmra.mxu3 %vm166_vm0, %v1853_v63  ;;  %v1802_v62 = vld [vmem:[%s2392_s0 + $0x78] sm:$0xff] }
  0xcb   :  { %v1820_v63 = vld [vmem:[%s2393_s1 + $0x78] sm:$0xff] }
  0xcc   :  { %v1312_v4 = vmax.f32 %v1276_v2, 0.0 }
  0xcd   :  { %v808_v5 = vpop.f32.mrf.mxu2  ;;  %v1087_v6 = vpop.f32.mrf.mxu3 }
  0xce   :  { %v1877_v7 = vpack.c.bf16 %v1312_v4, %v1311_v3  ;;  %v252_v8 = vpop.f32.mrf.mxu0  ;;  %v531_v9 = vpop.f32.mrf.mxu1  ;;  %v1201_v11 = vmax.f32 %v808_v5, %v1087_v6  ;;  %v1838_v4 = vld [vmem:[%s2394_s2 + $0x78] sm:$0xff] }
  0xcf   :  { %v1166_v17 = vmax.f32 %v252_v8, %v531_v9  ;;  %v1856_v5 = vld [vmem:[%s2395_s3 + $0x78] sm:$0xff] }
  0xd0   :  { %1951 = vst [vmem:[%s2397_s6 + $0x18] sm:$0xff] %v1877_v7   ;;  %v1237_v12 = vmax.f32 %v1165_v10, %v1201_v11 }
  0xd2   :  { %v1277_v23 = vadd.f32 %v2155_v47, %v1237_v12 }
  0xd4   :  { %v1313_v26 = vmax.f32 %v1277_v23, 0.0 }
  0xd5   :  { %v810_v13 = vpop.f32.mrf.mxu2  ;;  %v1089_v14 = vpop.f32.mrf.mxu3 }
  0xd6   :  { %v1202_v18 = vmax.f32 %v810_v13, %v1089_v14  ;;  %v255_v19 = vpop.f32.mrf.mxu0  ;;  %v534_v20 = vpop.f32.mrf.mxu1 }
  0xd7   :  { %v1167_v33 = vmax.f32 %v255_v19, %v534_v20 }
  0xd8   :  { %v1238_v24 = vmax.f32 %v1166_v17, %v1202_v18 }
  0xd9   :  { %1510 = vmatmul.msk.bf16.gmra.mxu0 %vm166_vm0, %v1800_v15  ;;  %1600 = vmatmul.msk.bf16.gmra.mxu1 %vm166_vm0, %v1818_v16 }
  0xda   :  { %v1278_v25 = vadd.f32 %v2155_v47, %v1238_v24  ;;  %1690 = vmatmul.msk.bf16.gmra.mxu2 %vm166_vm0, %v1836_v21  ;;  %1780 = vmatmul.msk.bf16.gmra.mxu3 %vm166_vm0, %v1854_v22  ;;  %v1803_v21 = vld [vmem:[%s2392_s0 + $0x80] sm:$0xff] }
  0xdb   :  { %v1821_v22 = vld [vmem:[%s2393_s1 + $0x80] sm:$0xff] }
  0xdc   :  { %v1314_v27 = vmax.f32 %v1278_v25, 0.0 }
  0xdd   :  { %v813_v28 = vpop.f32.mrf.mxu2  ;;  %v1092_v29 = vpop.f32.mrf.mxu3 }
  0xde   :  { %v1882_v30 = vpack.c.bf16 %v1314_v27, %v1313_v26  ;;  %v257_v31 = vpop.f32.mrf.mxu0  ;;  %v536_v32 = vpop.f32.mrf.mxu1  ;;  %v1203_v34 = vmax.f32 %v813_v28, %v1092_v29  ;;  %v1839_v27 = vld [vmem:[%s2394_s2 + $0x80] sm:$0xff] }
  0xdf   :  { %v1168_v40 = vmax.f32 %v257_v31, %v536_v32  ;;  %v1857_v28 = vld [vmem:[%s2395_s3 + $0x80] sm:$0xff] }
  0xe0   :  { %1952 = vst [vmem:[%s2397_s6 + $0x20] sm:$0xff] %v1882_v30   ;;  %v1239_v35 = vmax.f32 %v1167_v33, %v1203_v34 }
  0xe2   :  { %v1279_v46 = vadd.f32 %v2155_v47, %v1239_v35 }
  0xe4   :  { %v1315_v50 = vmax.f32 %v1279_v46, 0.0 }
  0xe5   :  { %v815_v36 = vpop.f32.mrf.mxu2  ;;  %v1094_v37 = vpop.f32.mrf.mxu3 }
  0xe6   :  { %v1204_v41 = vmax.f32 %v815_v36, %v1094_v37  ;;  %v260_v42 = vpop.f32.mrf.mxu0  ;;  %v539_v43 = vpop.f32.mrf.mxu1 }
  0xe7   :  { %v1169_v57 = vmax.f32 %v260_v42, %v539_v43 }
  0xe8   :  { %v1240_v48 = vmax.f32 %v1168_v40, %v1204_v41 }
  0xe9   :  { %1511 = vmatmul.msk.bf16.gmra.mxu0 %vm166_vm0, %v1801_v38  ;;  %1601 = vmatmul.msk.bf16.gmra.mxu1 %vm166_vm0, %v1819_v39 }
  0xea   :  { %v1280_v49 = vadd.f32 %v2155_v47, %v1240_v48  ;;  %1691 = vmatmul.msk.bf16.gmra.mxu2 %vm166_vm0, %v1837_v44  ;;  %1781 = vmatmul.msk.bf16.gmra.mxu3 %vm166_vm0, %v1855_v45  ;;  %v1804_v44 = vld [vmem:[%s2392_s0 + $0x88] sm:$0xff] }
  0xeb   :  { %v1822_v45 = vld [vmem:[%s2393_s1 + $0x88] sm:$0xff] }
  0xec   :  { %v1316_v51 = vmax.f32 %v1280_v49, 0.0 }
  0xed   :  { %v818_v52 = vpop.f32.mrf.mxu2  ;;  %v1097_v53 = vpop.f32.mrf.mxu3 }
  0xee   :  { %v1887_v54 = vpack.c.bf16 %v1316_v51, %v1315_v50  ;;  %v262_v55 = vpop.f32.mrf.mxu0  ;;  %v541_v56 = vpop.f32.mrf.mxu1  ;;  %v1205_v58 = vmax.f32 %v818_v52, %v1097_v53  ;;  %v1840_v51 = vld [vmem:[%s2394_s2 + $0x88] sm:$0xff] }
  0xef   :  { %v1170_v0 = vmax.f32 %v262_v55, %v541_v56  ;;  %v1858_v52 = vld [vmem:[%s2395_s3 + $0x88] sm:$0xff] }
  0xf0   :  { %1953 = vst [vmem:[%s2397_s6 + $0x28] sm:$0xff] %v1887_v54   ;;  %v1241_v59 = vmax.f32 %v1169_v57, %v1205_v58 }
  0xf2   :  { %v1281_v6 = vadd.f32 %v2155_v47, %v1241_v59 }
  0xf4   :  { %v1317_v9 = vmax.f32 %v1281_v6, 0.0 }
  0xf5   :  { %v820_v60 = vpop.f32.mrf.mxu2  ;;  %v1099_v61 = vpop.f32.mrf.mxu3 }
  0xf6   :  { %v1206_v1 = vmax.f32 %v820_v60, %v1099_v61  ;;  %v265_v2 = vpop.f32.mrf.mxu0  ;;  %v544_v3 = vpop.f32.mrf.mxu1 }
  0xf7   :  { %v1171_v16 = vmax.f32 %v265_v2, %v544_v3 }
  0xf8   :  { %v1242_v7 = vmax.f32 %v1170_v0, %v1206_v1 }
  0xf9   :  { %1512 = vmatmul.msk.bf16.gmra.mxu0 %vm166_vm0, %v1802_v62  ;;  %1602 = vmatmul.msk.bf16.gmra.mxu1 %vm166_vm0, %v1820_v63 }
  0xfa   :  { %v1282_v8 = vadd.f32 %v2155_v47, %v1242_v7  ;;  %1692 = vmatmul.msk.bf16.gmra.mxu2 %vm166_vm0, %v1838_v4  ;;  %1782 = vmatmul.msk.bf16.gmra.mxu3 %vm166_vm0, %v1856_v5 }
  0xfc   :  { %v1318_v10 = vmax.f32 %v1282_v8, 0.0 }
  0xfd   :  { %v823_v11 = vpop.f32.mrf.mxu2  ;;  %v1102_v12 = vpop.f32.mrf.mxu3 }
  0xfe   :  { %v1892_v13 = vpack.c.bf16 %v1318_v10, %v1317_v9  ;;  %v267_v14 = vpop.f32.mrf.mxu0  ;;  %v546_v15 = vpop.f32.mrf.mxu1  ;;  %v1207_v17 = vmax.f32 %v823_v11, %v1102_v12 }
  0xff   :  { %v1172_v23 = vmax.f32 %v267_v14, %v546_v15 }
 0x100   :  { %1954 = vst [vmem:[%s2397_s6 + $0x30] sm:$0xff] %v1892_v13   ;;  %v1243_v18 = vmax.f32 %v1171_v16, %v1207_v17 }
 0x102   :  { %v1283_v29 = vadd.f32 %v2155_v47, %v1243_v18 }
 0x104   :  { %v1319_v32 = vmax.f32 %v1283_v29, 0.0 }
 0x105   :  { %v825_v19 = vpop.f32.mrf.mxu2  ;;  %v1104_v20 = vpop.f32.mrf.mxu3 }
 0x106   :  { %v1208_v24 = vmax.f32 %v825_v19, %v1104_v20  ;;  %v270_v25 = vpop.f32.mrf.mxu0  ;;  %v549_v26 = vpop.f32.mrf.mxu1 }
 0x107   :  { %v1173_v39 = vmax.f32 %v270_v25, %v549_v26 }
 0x108   :  { %v1244_v30 = vmax.f32 %v1172_v23, %v1208_v24 }
 0x109   :  { %1513 = vmatmul.msk.bf16.gmra.mxu0 %vm166_vm0, %v1803_v21  ;;  %1603 = vmatmul.msk.bf16.gmra.mxu1 %vm166_vm0, %v1821_v22 }
 0x10a   :  { %v1284_v31 = vadd.f32 %v2155_v47, %v1244_v30  ;;  %1693 = vmatmul.msk.bf16.gmra.mxu2 %vm166_vm0, %v1839_v27  ;;  %1783 = vmatmul.msk.bf16.gmra.mxu3 %vm166_vm0, %v1857_v28 }
 0x10c   :  { %v1320_v33 = vmax.f32 %v1284_v31, 0.0 }
 0x10d   :  { %v828_v34 = vpop.f32.mrf.mxu2  ;;  %v1107_v35 = vpop.f32.mrf.mxu3 }
 0x10e   :  { %v1897_v36 = vpack.c.bf16 %v1320_v33, %v1319_v32  ;;  %v272_v37 = vpop.f32.mrf.mxu0  ;;  %v551_v38 = vpop.f32.mrf.mxu1  ;;  %v1209_v40 = vmax.f32 %v828_v34, %v1107_v35 }
 0x10f   :  { %v1174_v46 = vmax.f32 %v272_v37, %v551_v38 }
 0x110   :  { %1955 = vst [vmem:[%s2397_s6 + $0x38] sm:$0xff] %v1897_v36   ;;  %v1245_v41 = vmax.f32 %v1173_v39, %v1209_v40 }
 0x112   :  { %v1285_v53 = vadd.f32 %v2155_v47, %v1245_v41 }
 0x114   :  { %v1321_v56 = vmax.f32 %v1285_v53, 0.0 }
 0x115   :  { %v830_v42 = vpop.f32.mrf.mxu2  ;;  %v1109_v43 = vpop.f32.mrf.mxu3 }
 0x116   :  { %v1210_v48 = vmax.f32 %v830_v42, %v1109_v43  ;;  %v275_v49 = vpop.f32.mrf.mxu0  ;;  %v554_v50 = vpop.f32.mrf.mxu1 }
 0x117   :  { %v1175_v63 = vmax.f32 %v275_v49, %v554_v50 }
 0x118   :  { %v1246_v54 = vmax.f32 %v1174_v46, %v1210_v48 }
 0x119   :  { %1514 = vmatmul.msk.bf16.gmra.mxu0 %vm166_vm0, %v1804_v44  ;;  %1604 = vmatmul.msk.bf16.gmra.mxu1 %vm166_vm0, %v1822_v45 }
 0x11a   :  { %v1286_v55 = vadd.f32 %v2155_v47, %v1246_v54  ;;  %1694 = vmatmul.msk.bf16.gmra.mxu2 %vm166_vm0, %v1840_v51  ;;  %1784 = vmatmul.msk.bf16.gmra.mxu3 %vm166_vm0, %v1858_v52 }
 0x11c   :  { %v1322_v57 = vmax.f32 %v1286_v55, 0.0 }
 0x11d   :  { %v833_v58 = vpop.f32.mrf.mxu2  ;;  %v1112_v59 = vpop.f32.mrf.mxu3 }
 0x11e   :  { %v1902_v60 = vpack.c.bf16 %v1322_v57, %v1321_v56  ;;  %v277_v61 = vpop.f32.mrf.mxu0  ;;  %v556_v62 = vpop.f32.mrf.mxu1  ;;  %v1211_v0 = vmax.f32 %v833_v58, %v1112_v59 }
 0x11f   :  { %v1176_v4 = vmax.f32 %v277_v61, %v556_v62 }
 0x120   :  { %1956 = vst [vmem:[%s2397_s6 + $0x40] sm:$0xff] %v1902_v60   ;;  %v1247_v1 = vmax.f32 %v1175_v63, %v1211_v0 }
 0x122   :  { %v1287_v8 = vadd.f32 %v2155_v47, %v1247_v1 }
 0x124   :  { %v1323_v11 = vmax.f32 %v1287_v8, 0.0 }
 0x125   :  { %v835_v2 = vpop.f32.mrf.mxu2  ;;  %v1114_v3 = vpop.f32.mrf.mxu3 }
 0x126   :  { %v1212_v5 = vmax.f32 %v835_v2, %v1114_v3  ;;  %v280_v6 = vpop.f32.mrf.mxu0  ;;  %v559_v7 = vpop.f32.mrf.mxu1 }
 0x127   :  { %v1177_v18 = vmax.f32 %v280_v6, %v559_v7 }
 0x128   :  { %v1248_v9 = vmax.f32 %v1176_v4, %v1212_v5 }
 0x12a   :  { %v1288_v10 = vadd.f32 %v2155_v47, %v1248_v9 }
 0x12c   :  { %v1324_v12 = vmax.f32 %v1288_v10, 0.0 }
 0x12d   :  { %v838_v13 = vpop.f32.mrf.mxu2  ;;  %v1117_v14 = vpop.f32.mrf.mxu3 }
 0x12e   :  { %v1907_v15 = vpack.c.bf16 %v1324_v12, %v1323_v11  ;;  %v282_v16 = vpop.f32.mrf.mxu0  ;;  %v561_v17 = vpop.f32.mrf.mxu1  ;;  %v1213_v19 = vmax.f32 %v838_v13, %v1117_v14 }
 0x12f   :  { %v1178_v23 = vmax.f32 %v282_v16, %v561_v17 }
 0x130   :  { %1957 = vst [vmem:[%s2397_s6 + $0x48] sm:$0xff] %v1907_v15   ;;  %v1249_v20 = vmax.f32 %v1177_v18, %v1213_v19 }
 0x132   :  { %v1289_v27 = vadd.f32 %v2155_v47, %v1249_v20 }
 0x134   :  { %v1325_v30 = vmax.f32 %v1289_v27, 0.0 }
 0x135   :  { %v840_v21 = vpop.f32.mrf.mxu2  ;;  %v1119_v22 = vpop.f32.mrf.mxu3 }
 0x136   :  { %v1214_v24 = vmax.f32 %v840_v21, %v1119_v22  ;;  %v285_v25 = vpop.f32.mrf.mxu0  ;;  %v564_v26 = vpop.f32.mrf.mxu1 }
 0x137   :  { %v1179_v37 = vmax.f32 %v285_v25, %v564_v26 }
 0x138   :  { %v1250_v28 = vmax.f32 %v1178_v23, %v1214_v24 }
 0x13a   :  { %v1290_v29 = vadd.f32 %v2155_v47, %v1250_v28 }
 0x13c   :  { %v1326_v31 = vmax.f32 %v1290_v29, 0.0 }
 0x13d   :  { %v843_v32 = vpop.f32.mrf.mxu2  ;;  %v1122_v33 = vpop.f32.mrf.mxu3 }
 0x13e   :  { %v1912_v34 = vpack.c.bf16 %v1326_v31, %v1325_v30  ;;  %v287_v35 = vpop.f32.mrf.mxu0  ;;  %v566_v36 = vpop.f32.mrf.mxu1  ;;  %v1215_v38 = vmax.f32 %v843_v32, %v1122_v33 }
 0x13f   :  { %v1180_v42 = vmax.f32 %v287_v35, %v566_v36 }
 0x140   :  { %1958 = vst [vmem:[%s2397_s6 + $0x50] sm:$0xff] %v1912_v34   ;;  %v1251_v39 = vmax.f32 %v1179_v37, %v1215_v38 }
 0x142   :  { %v1291_v46 = vadd.f32 %v2155_v47, %v1251_v39 }
 0x144   :  { %v1327_v50 = vmax.f32 %v1291_v46, 0.0 }
 0x145   :  { %v845_v40 = vpop.f32.mrf.mxu2  ;;  %v1124_v41 = vpop.f32.mrf.mxu3 }
 0x146   :  { %v1216_v43 = vmax.f32 %v845_v40, %v1124_v41  ;;  %v290_v44 = vpop.f32.mrf.mxu0  ;;  %v569_v45 = vpop.f32.mrf.mxu1 }
 0x147   :  { %v1181_v57 = vmax.f32 %v290_v44, %v569_v45 }
 0x148   :  { %v1252_v48 = vmax.f32 %v1180_v42, %v1216_v43 }
 0x14a   :  { %v1292_v49 = vadd.f32 %v2155_v47, %v1252_v48 }
 0x14c   :  { %v1328_v51 = vmax.f32 %v1292_v49, 0.0 }
 0x14d   :  { %v848_v52 = vpop.f32.mrf.mxu2  ;;  %v1127_v53 = vpop.f32.mrf.mxu3 }
 0x14e   :  { %v1917_v54 = vpack.c.bf16 %v1328_v51, %v1327_v50  ;;  %v292_v55 = vpop.f32.mrf.mxu0  ;;  %v571_v56 = vpop.f32.mrf.mxu1  ;;  %v1217_v58 = vmax.f32 %v848_v52, %v1127_v53 }
 0x14f   :  { %v1182_v62 = vmax.f32 %v292_v55, %v571_v56 }
 0x150   :  { %1959 = vst [vmem:[%s2397_s6 + $0x58] sm:$0xff] %v1917_v54   ;;  %v1253_v59 = vmax.f32 %v1181_v57, %v1217_v58 }
 0x152   :  { %v1293_v2 = vadd.f32 %v2155_v47, %v1253_v59 }
 0x154   :  { %v1329_v5 = vmax.f32 %v1293_v2, 0.0 }
 0x155   :  { %v850_v60 = vpop.f32.mrf.mxu2  ;;  %v1129_v61 = vpop.f32.mrf.mxu3 }
 0x156   :  { %v1218_v63 = vmax.f32 %v850_v60, %v1129_v61  ;;  %v295_v0 = vpop.f32.mrf.mxu0  ;;  %v574_v1 = vpop.f32.mrf.mxu1 }
 0x157   :  { %v1183_v12 = vmax.f32 %v295_v0, %v574_v1 }
 0x158   :  { %v1254_v3 = vmax.f32 %v1182_v62, %v1218_v63 }
 0x15a   :  { %v1294_v4 = vadd.f32 %v2155_v47, %v1254_v3 }
 0x15c   :  { %v1330_v6 = vmax.f32 %v1294_v4, 0.0 }
 0x15d   :  { %v853_v7 = vpop.f32.mrf.mxu2  ;;  %v1132_v8 = vpop.f32.mrf.mxu3 }
 0x15e   :  { %v1922_v9 = vpack.c.bf16 %v1330_v6, %v1329_v5  ;;  %v297_v10 = vpop.f32.mrf.mxu0  ;;  %v576_v11 = vpop.f32.mrf.mxu1  ;;  %v1219_v13 = vmax.f32 %v853_v7, %v1132_v8 }
 0x15f   :  { %v1184_v17 = vmax.f32 %v297_v10, %v576_v11 }
 0x160   :  { %1960 = vst [vmem:[%s2397_s6 + $0x60] sm:$0xff] %v1922_v9   ;;  %v1255_v14 = vmax.f32 %v1183_v12, %v1219_v13 }
 0x162   :  { %v1295_v21 = vadd.f32 %v2155_v47, %v1255_v14 }
 0x164   :  { %v1331_v24 = vmax.f32 %v1295_v21, 0.0 }
 0x165   :  { %v855_v15 = vpop.f32.mrf.mxu2  ;;  %v1134_v16 = vpop.f32.mrf.mxu3 }
 0x166   :  { %v1220_v18 = vmax.f32 %v855_v15, %v1134_v16  ;;  %v300_v19 = vpop.f32.mrf.mxu0  ;;  %v579_v20 = vpop.f32.mrf.mxu1 }
 0x167   :  { %v1185_v31 = vmax.f32 %v300_v19, %v579_v20 }
 0x168   :  { %v1256_v22 = vmax.f32 %v1184_v17, %v1220_v18 }
 0x16a   :  { %v1296_v23 = vadd.f32 %v2155_v47, %v1256_v22 }
 0x16c   :  { %v1332_v25 = vmax.f32 %v1296_v23, 0.0 }
 0x16d   :  { %v858_v26 = vpop.f32.mrf.mxu2  ;;  %v1137_v27 = vpop.f32.mrf.mxu3 }
 0x16e   :  { %v1927_v28 = vpack.c.bf16 %v1332_v25, %v1331_v24  ;;  %v302_v29 = vpop.f32.mrf.mxu0  ;;  %v581_v30 = vpop.f32.mrf.mxu1  ;;  %v1221_v32 = vmax.f32 %v858_v26, %v1137_v27 }
 0x16f   :  { %v1186_v36 = vmax.f32 %v302_v29, %v581_v30 }
 0x170   :  { %1961 = vst [vmem:[%s2397_s6 + $0x68] sm:$0xff] %v1927_v28   ;;  %v1257_v33 = vmax.f32 %v1185_v31, %v1221_v32 }
 0x172   :  { %v1297_v40 = vadd.f32 %v2155_v47, %v1257_v33 }
 0x174   :  { %v1333_v43 = vmax.f32 %v1297_v40, 0.0 }
 0x175   :  { %v860_v34 = vpop.f32.mrf.mxu2  ;;  %v1139_v35 = vpop.f32.mrf.mxu3 }
 0x176   :  { %v1222_v37 = vmax.f32 %v860_v34, %v1139_v35  ;;  %v305_v38 = vpop.f32.mrf.mxu0  ;;  %v584_v39 = vpop.f32.mrf.mxu1 }
 0x177   :  { %v1187_v51 = vmax.f32 %v305_v38, %v584_v39 }
 0x178   :  { %v1258_v41 = vmax.f32 %v1186_v36, %v1222_v37 }
 0x17a   :  { %v1298_v42 = vadd.f32 %v2155_v47, %v1258_v41 }
 0x17c   :  { %v1334_v44 = vmax.f32 %v1298_v42, 0.0 }
 0x17d   :  { %v863_v45 = vpop.f32.mrf.mxu2  ;;  %v1142_v46 = vpop.f32.mrf.mxu3 }
 0x17e   :  { %v1932_v48 = vpack.c.bf16 %v1334_v44, %v1333_v43  ;;  %v307_v49 = vpop.f32.mrf.mxu0  ;;  %v586_v50 = vpop.f32.mrf.mxu1  ;;  %v1223_v52 = vmax.f32 %v863_v45, %v1142_v46 }
 0x17f   :  { %v1188_v56 = vmax.f32 %v307_v49, %v586_v50 }
 0x180   :  { %1962 = vst [vmem:[%s2397_s6 + $0x70] sm:$0xff] %v1932_v48   ;;  %v1259_v53 = vmax.f32 %v1187_v51, %v1223_v52 }
 0x182   :  { %v1299_v60 = vadd.f32 %v2155_v47, %v1259_v53 }
 0x184   :  { %v1335_v63 = vmax.f32 %v1299_v60, 0.0 }
 0x185   :  { %v865_v54 = vpop.f32.mrf.mxu2  ;;  %v1144_v55 = vpop.f32.mrf.mxu3 }
 0x186   :  { %v1224_v57 = vmax.f32 %v865_v54, %v1144_v55  ;;  %v310_v58 = vpop.f32.mrf.mxu0  ;;  %v589_v59 = vpop.f32.mrf.mxu1 }
 0x187   :  { %v1189_v6 = vmax.f32 %v310_v58, %v589_v59 }
 0x188   :  { %v1260_v61 = vmax.f32 %v1188_v56, %v1224_v57 }
 0x18a   :  { %v1300_v62 = vadd.f32 %v2155_v47, %v1260_v61 }
 0x18c   :  { %v1336_v0 = vmax.f32 %v1300_v62, 0.0 }
 0x18d   :  { %v868_v1 = vpop.f32.mrf.mxu2  ;;  %v1147_v2 = vpop.f32.mrf.mxu3 }
 0x18e   :  { %v1937_v3 = vpack.c.bf16 %v1336_v0, %v1335_v63  ;;  %v312_v4 = vpop.f32.mrf.mxu0  ;;  %v591_v5 = vpop.f32.mrf.mxu1  ;;  %v1225_v7 = vmax.f32 %v868_v1, %v1147_v2 }
 0x18f   :  { %v1190_v11 = vmax.f32 %v312_v4, %v591_v5 }
 0x190   :  { %1963 = vst [vmem:[%s2397_s6 + $0x78] sm:$0xff] %v1937_v3   ;;  %v1261_v8 = vmax.f32 %v1189_v6, %v1225_v7 }
 0x192   :  { %v1301_v13 = vadd.f32 %v2155_v47, %v1261_v8 }
 0x194   :  { %v1337_v18 = vmax.f32 %v1301_v13, 0.0 }
 0x195   :  { %v870_v9 = vpop.f32.mrf.mxu2  ;;  %v1149_v10 = vpop.f32.mrf.mxu3 }
 0x196   :  { %v1226_v12 = vmax.f32 %v870_v9, %v1149_v10  ;;  %v315_v15 = vpop.f32.mrf.mxu0  ;;  %v594_v16 = vpop.f32.mrf.mxu1 }
 0x197   :  { %v1191_v23 = vmax.f32 %v315_v15, %v594_v16 }
 0x198   :  { %v1262_v14 = vmax.f32 %v1190_v11, %v1226_v12 }
 0x19a   :  { %v1302_v17 = vadd.f32 %v2155_v47, %v1262_v14 }
 0x19c   :  { %v1338_v19 = vmax.f32 %v1302_v17, 0.0 }
 0x19d   :  { %v873_v20 = vpop.f32.mrf.mxu2  ;;  %v1152_v21 = vpop.f32.mrf.mxu3 }
 0x19e   :  { %v1942_v22 = vpack.c.bf16 %v1338_v19, %v1337_v18  ;;  %v1227_v24 = vmax.f32 %v873_v20, %v1152_v21  ;;  %v317_v25 = vpop.f32.mrf.mxu0  ;;  %v596_v26 = vpop.f32.mrf.mxu1 }
 0x19f   :  { %v1192_v30 = vmax.f32 %v317_v25, %v596_v26 }
 0x1a0   :  { %1964 = vst [vmem:[%s2397_s6 + $0x80] sm:$0xff] %v1942_v22   ;;  %v1263_v27 = vmax.f32 %v1191_v23, %v1227_v24 }
 0x1a2   :  { %v1303_v32 = vadd.f32 %v2155_v47, %v1263_v27 }
 0x1a4   :  { %v1339_v35 = vmax.f32 %v1303_v32, 0.0 }
 0x1a5   :  { %v875_v28 = vpop.f32.mrf.mxu2  ;;  %v1154_v29 = vpop.f32.mrf.mxu3 }
 0x1a6   :  { %v1228_v31 = vmax.f32 %v875_v28, %v1154_v29 }
 0x1a8   :  { %v1264_v33 = vmax.f32 %v1192_v30, %v1228_v31 }
 0x1aa   :  { %v1304_v34 = vadd.f32 %v2155_v47, %v1264_v33 }
 0x1ac   :  { %v1340_v36 = vmax.f32 %v1304_v34, 0.0 }
 0x1ae   :  { %v1947_v37 = vpack.c.bf16 %v1340_v36, %v1339_v35 }
 0x1b0   :  { %1965 = vst [vmem:[%s2397_s6 + $0x88] sm:$0xff] %v1947_v37  }

// kernel: lenet5_forward.4
= control target key start
LH: loop header
LB: loop body
LE: loop exit
PB: predicated region body
PF: predicated region fallthrough
CT: control target
= control target key end

     0   :  { %s1694_s4 = inlined_call_operand.vmem [shape: bf16[512,128], index: 4, kind: input, shape index: {}]   ;;  %s1695_s0 = inlined_call_operand.vmem [shape: bf16[32,512], index: 0, kind: input, shape index: {}]   ;;  %s1696_s1 = inlined_call_operand.vmem [shape: bf16[32,512], index: 1, kind: input, shape index: {}]   ;;  %s1697_s2 = inlined_call_operand.vmem [shape: bf16[32,512], index: 2, kind: input, shape index: {}]   ;;  %s1698_s3 = inlined_call_operand.vmem [shape: bf16[32,512], index: 3, kind: input, shape index: {}]   ;;  %s1699_s5 = inlined_call_operand.vmem [shape: f32[1,128], index: 5, kind: input, shape index: {}]   ;;  %s1700_s6 = inlined_call_operand.vmem [shape: bf16[32,128], index: 6, kind: output, shape index: {}]  }
   0x1   :  { %v1181_v0 = vld [vmem:[%s1694_s4 + $0x38] sm:$0xff]  ;;  %v1203_v4 = vld [vmem:[%s1694_s4 + $0x30] sm:$0xff]  ;;  %v1227_v8 = vld [vmem:[%s1694_s4 + $0x28] sm:$0xff] }
   0x2   :  { %v1186_v1 = vld [vmem:[%s1694_s4 + $0x78] sm:$0xff]  ;;  %327 = vmatpush.bf16.msra.mxu0 %v1181_v0  ;;  %v1208_v5 = vld [vmem:[%s1694_s4 + $0x70] sm:$0xff]  ;;  %v1232_v9 = vld [vmem:[%s1694_s4 + $0x68] sm:$0xff] }
   0x3   :  { %v1191_v2 = vld [vmem:[%s1694_s4 + $0xb8] sm:$0xff]  ;;  %346 = vmatpush.bf16.msra.mxu1 %v1186_v1  ;;  %v1215_v6 = vld [vmem:[%s1694_s4 + $0xb0] sm:$0xff]  ;;  %v1239_v10 = vld [vmem:[%s1694_s4 + $0xa8] sm:$0xff] }
   0x4   :  { %v1196_v3 = vld [vmem:[%s1694_s4 + $0xf8] sm:$0xff]  ;;  %365 = vmatpush.bf16.msra.mxu2 %v1191_v2  ;;  %v1220_v7 = vld [vmem:[%s1694_s4 + $0xf0] sm:$0xff]  ;;  %v1244_v11 = vld [vmem:[%s1694_s4 + $0xe8] sm:$0xff] }
   0x5   :  { %384 = vmatpush.bf16.msra.mxu3 %v1196_v3  ;;  %v1251_v12 = vld [vmem:[%s1694_s4 + $0x20] sm:$0xff]  ;;  %v1275_v16 = vld [vmem:[%s1694_s4 + $0x18] sm:$0xff]  ;;  %v1299_v20 = vld [vmem:[%s1694_s4 + $0x10] sm:$0xff] }
   0x6   :  { %328 = vmatpush.bf16.msra.mxu0 %v1203_v4  ;;  %v1256_v13 = vld [vmem:[%s1694_s4 + $0x60] sm:$0xff]  ;;  %v1280_v17 = vld [vmem:[%s1694_s4 + $0x58] sm:$0xff]  ;;  %v1304_v21 = vld [vmem:[%s1694_s4 + $0x50] sm:$0xff] }
   0x7   :  { %347 = vmatpush.bf16.msra.mxu1 %v1208_v5  ;;  %v1263_v14 = vld [vmem:[%s1694_s4 + $0xa0] sm:$0xff]  ;;  %v1287_v18 = vld [vmem:[%s1694_s4 + $0x98] sm:$0xff]  ;;  %v1311_v22 = vld [vmem:[%s1694_s4 + $0x90] sm:$0xff] }
   0x8   :  { %366 = vmatpush.bf16.msra.mxu2 %v1215_v6  ;;  %v1268_v15 = vld [vmem:[%s1694_s4 + $0xe0] sm:$0xff]  ;;  %v1292_v19 = vld [vmem:[%s1694_s4 + $0xd8] sm:$0xff]  ;;  %v1316_v23 = vld [vmem:[%s1694_s4 + $0xd0] sm:$0xff] }
   0x9   :  { %385 = vmatpush.bf16.msra.mxu3 %v1220_v7  ;;  %v1323_v24 = vld [vmem:[%s1694_s4 + $0x8] sm:$0xff]  ;;  %v1345_v28 = vld [vmem:[%s1694_s4] sm:$0xff]  ;;  %v1101_v33 = vld [vmem:[%s1695_s0 + $0xc] sm:$0xf0] }
   0xa   :  { %329 = vmatpush.bf16.msra.mxu0 %v1227_v8  ;;  %v1328_v25 = vld [vmem:[%s1694_s4 + $0x48] sm:$0xff]  ;;  %v1350_v29 = vld [vmem:[%s1694_s4 + $0x40] sm:$0xff]  ;;  %v815_v35 = vld [vmem:[%s1695_s0 + $0x10] sm:$0xf0] }
   0xb   :  { %348 = vmatpush.bf16.msra.mxu1 %v1232_v9  ;;  %v1335_v26 = vld [vmem:[%s1694_s4 + $0x88] sm:$0xff]  ;;  %v1355_v30 = vld [vmem:[%s1694_s4 + $0x80] sm:$0xff]  ;;  %v1102_v37 = vld [vmem:[%s1695_s0 + $0x14] sm:$0xf0] }
   0xc   :  { %367 = vmatpush.bf16.msra.mxu2 %v1239_v10  ;;  %v1340_v27 = vld [vmem:[%s1694_s4 + $0xc8] sm:$0xff]  ;;  %v1360_v31 = vld [vmem:[%s1694_s4 + $0xc0] sm:$0xff]  ;;  %v823_v39 = vld [vmem:[%s1695_s0 + $0x18] sm:$0xf0] }
   0xd   :  { %386 = vmatpush.bf16.msra.mxu3 %v1244_v11  ;;  %v813_v32 = vld [vmem:[%s1695_s0] sm:$0xf]  ;;  %v1099_v34 = vld [vmem:[%s1695_s0 + $0x4] sm:$0xf]  ;;  %v821_v36 = vld [vmem:[%s1695_s0 + $0x8] sm:$0xf] }
   0xe   :  { %330 = vmatpush.bf16.msra.mxu0 %v1251_v12  ;;  %v1100_v38 = vld [vmem:[%s1695_s0 + $0xc] sm:$0xf]  ;;  %v814_v40 = vor.u32 %v1101_v33, %v813_v32  ;;  %v818_v41 = vor.u32 %v1099_v34, %v815_v35  ;;  %v822_v42 = vor.u32 %v1102_v37, %v821_v36  ;;  %v829_v44 = vld [vmem:[%s1695_s0 + $0x20] sm:$0xf]  ;;  %v1105_v45 = vld [vmem:[%s1695_s0 + $0x2c] sm:$0xf0] }
   0xf   :  { %349 = vmatpush.bf16.msra.mxu1 %v1256_v13  ;;  %v826_v43 = vor.u32 %v1100_v38, %v823_v39  ;;  %v1103_v46 = vld [vmem:[%s1695_s0 + $0x24] sm:$0xf]  ;;  %v831_v47 = vld [vmem:[%s1695_s0 + $0x30] sm:$0xf0]  ;;  %v837_v48 = vld [vmem:[%s1695_s0 + $0x28] sm:$0xf]  ;;  %v830_v52 = vor.u32 %v1105_v45, %v829_v44 }
  0x10   :  { %368 = vmatpush.bf16.msra.mxu2 %v1263_v14  ;;  %v1106_v49 = vld [vmem:[%s1695_s0 + $0x34] sm:$0xf0]  ;;  %v1104_v50 = vld [vmem:[%s1695_s0 + $0x2c] sm:$0xf]  ;;  %v839_v51 = vld [vmem:[%s1695_s0 + $0x38] sm:$0xf0]  ;;  %v834_v53 = vor.u32 %v1103_v46, %v831_v47 }
  0x11   :  { %387 = vmatpush.bf16.msra.mxu3 %v1268_v15  ;;  %v838_v54 = vor.u32 %v1106_v49, %v837_v48  ;;  %v842_v55 = vor.u32 %v1104_v50, %v839_v51  ;;  %v973_v56 = vld [vmem:[%s1696_s1] sm:$0xf]  ;;  %v1109_v57 = vld [vmem:[%s1696_s1 + $0xc] sm:$0xf0]  ;;  %v1107_v58 = vld [vmem:[%s1696_s1 + $0x4] sm:$0xf] }
  0x12   :  { %331 = vmatpush.bf16.msra.mxu0 %v1275_v16  ;;  %v975_v59 = vld [vmem:[%s1696_s1 + $0x10] sm:$0xf0]  ;;  %v981_v60 = vld [vmem:[%s1696_s1 + $0x8] sm:$0xf]  ;;  %v1110_v61 = vld [vmem:[%s1696_s1 + $0x14] sm:$0xf0]  ;;  %v974_v32 = vor.u32 %v1109_v57, %v973_v56 }
  0x13   :  { %350 = vmatpush.bf16.msra.mxu1 %v1280_v17  ;;  %v1108_v62 = vld [vmem:[%s1696_s1 + $0xc] sm:$0xf]  ;;  %v983_v63 = vld [vmem:[%s1696_s1 + $0x18] sm:$0xf0]  ;;  %v978_v33 = vor.u32 %v1107_v58, %v975_v59  ;;  %v982_v34 = vor.u32 %v1110_v61, %v981_v60  ;;  %v989_v36 = vld [vmem:[%s1696_s1 + $0x20] sm:$0xf] }
  0x14   :  { %369 = vmatpush.bf16.msra.mxu2 %v1287_v18  ;;  %v986_v35 = vor.u32 %v1108_v62, %v983_v63  ;;  %v1113_v37 = vld [vmem:[%s1696_s1 + $0x2c] sm:$0xf0]  ;;  %v1111_v38 = vld [vmem:[%s1696_s1 + $0x24] sm:$0xf]  ;;  %v991_v39 = vld [vmem:[%s1696_s1 + $0x30] sm:$0xf0] }
  0x15   :  { %388 = vmatpush.bf16.msra.mxu3 %v1292_v19  ;;  %v990_v44 = vor.u32 %v1113_v37, %v989_v36  ;;  %v994_v45 = vor.u32 %v1111_v38, %v991_v39  ;;  %v1005_v48 = vld [vmem:[%s1697_s2] sm:$0xf]  ;;  %v1117_v49 = vld [vmem:[%s1697_s2 + $0xc] sm:$0xf0]  ;;  %v1115_v50 = vld [vmem:[%s1697_s2 + $0x4] sm:$0xf] }
  0x16   :  { %332 = vmatpush.bf16.msra.mxu0 %v1299_v20  ;;  %v1007_v51 = vld [vmem:[%s1697_s2 + $0x10] sm:$0xf0]  ;;  %v1063_v59 = vld [vmem:[%s1698_s3 + $0x38] sm:$0xf0] }
  0x17   :  { %351 = vmatpush.bf16.msra.mxu1 %v1304_v21  ;;  %v1010_v56 = vor.u32 %v1115_v50, %v1007_v51 }
  0x18   :  { %370 = vmatpush.bf16.msra.mxu2 %v1311_v22 }
  0x19   :  { %389 = vmatpush.bf16.msra.mxu3 %v1316_v23 }
  0x1a   :  { %333 = vmatpush.bf16.msra.mxu0 %v1323_v24 }
  0x1b   :  { %352 = vmatpush.bf16.msra.mxu1 %v1328_v25 }
  0x1c   :  { %371 = vmatpush.bf16.msra.mxu2 %v1335_v26 }
  0x1d   :  { %390 = vmatpush.bf16.msra.mxu3 %v1340_v27 }
  0x1e   :  { %334 = vmatpush.bf16.msra.mxu0 %v1345_v28 }
  0x1f   :  { %353 = vmatpush.bf16.msra.mxu1 %v1350_v29 }
  0x20   :  { %372 = vmatpush.bf16.msra.mxu2 %v1355_v30 }
  0x21   :  { %391 = vmatpush.bf16.msra.mxu3 %v1360_v31  ;;  %335 = vmatmul.bf16.vlgmr.msra.gmra.mxu0 %v814_v40  ;;  %v997_v40 = vld [vmem:[%s1696_s1 + $0x28] sm:$0xf] }
  0x22   :  { %451 = vmatpush.bf16.msrb.mxu0 %v1181_v0  ;;  %354 = vmatmul.bf16.vlgmr.msra.gmra.mxu1 %v818_v41  ;;  %v1114_v41 = vld [vmem:[%s1696_s1 + $0x34] sm:$0xf0] }
  0x23   :  { %373 = vmatmul.bf16.vlgmr.msra.gmra.mxu2 %v822_v42  ;;  %470 = vmatpush.bf16.msrb.mxu1 %v1186_v1  ;;  %v1112_v42 = vld [vmem:[%s1696_s1 + $0x2c] sm:$0xf]  ;;  %v998_v46 = vor.u32 %v1114_v41, %v997_v40 }
  0x24   :  { %489 = vmatpush.bf16.msrb.mxu2 %v1191_v2  ;;  %392 = vmatmul.bf16.vlgmr.msra.gmra.mxu3 %v826_v43  ;;  %v999_v43 = vld [vmem:[%s1696_s1 + $0x38] sm:$0xf0] }
  0x25   :  { %508 = vmatpush.bf16.msrb.mxu3 %v1196_v3  ;;  %v1002_v47 = vor.u32 %v1112_v42, %v999_v43 }
  0x26   :  { %452 = vmatpush.bf16.msrb.mxu0 %v1203_v4 }
  0x27   :  { %471 = vmatpush.bf16.msrb.mxu1 %v1208_v5 }
  0x28   :  { %490 = vmatpush.bf16.msrb.mxu2 %v1215_v6 }
  0x29   :  { %509 = vmatpush.bf16.msrb.mxu3 %v1220_v7 }
  0x2a   :  { %453 = vmatpush.bf16.msrb.mxu0 %v1227_v8 }
  0x2b   :  { %472 = vmatpush.bf16.msrb.mxu1 %v1232_v9 }
  0x2c   :  { %491 = vmatpush.bf16.msrb.mxu2 %v1239_v10 }
  0x2d   :  { %510 = vmatpush.bf16.msrb.mxu3 %v1244_v11 }
  0x2e   :  { %454 = vmatpush.bf16.msrb.mxu0 %v1251_v12 }
  0x2f   :  { %473 = vmatpush.bf16.msrb.mxu1 %v1256_v13 }
  0x30   :  { %492 = vmatpush.bf16.msrb.mxu2 %v1263_v14 }
  0x31   :  { %511 = vmatpush.bf16.msrb.mxu3 %v1268_v15  ;;  %340 = vmatmul.bf16.gmra.mxu0 %v830_v52  ;;  %v1013_v52 = vld [vmem:[%s1697_s2 + $0x8] sm:$0xf] }
  0x32   :  { %455 = vmatpush.bf16.msrb.mxu0 %v1275_v16  ;;  %359 = vmatmul.bf16.gmra.mxu1 %v834_v53  ;;  %v1118_v53 = vld [vmem:[%s1697_s2 + $0x14] sm:$0xf0] }
  0x33   :  { %378 = vmatmul.bf16.gmra.mxu2 %v838_v54  ;;  %474 = vmatpush.bf16.msrb.mxu1 %v1280_v17  ;;  %v1015_v54 = vld [vmem:[%s1697_s2 + $0x18] sm:$0xf0]  ;;  %v1014_v57 = vor.u32 %v1118_v53, %v1013_v52 }
  0x34   :  { %493 = vmatpush.bf16.msrb.mxu2 %v1287_v18  ;;  %397 = vmatmul.bf16.gmra.mxu3 %v842_v55  ;;  %v1006_v55 = vor.u32 %v1117_v49, %v1005_v48 }
  0x35   :  { %512 = vmatpush.bf16.msrb.mxu3 %v1292_v19 }
  0x36   :  { %456 = vmatpush.bf16.msrb.mxu0 %v1299_v20 }
  0x37   :  { %475 = vmatpush.bf16.msrb.mxu1 %v1304_v21 }
  0x38   :  { %494 = vmatpush.bf16.msrb.mxu2 %v1311_v22 }
  0x39   :  { %513 = vmatpush.bf16.msrb.mxu3 %v1316_v23 }
  0x3a   :  { %457 = vmatpush.bf16.msrb.mxu0 %v1323_v24 }
  0x3b   :  { %476 = vmatpush.bf16.msrb.mxu1 %v1328_v25 }
  0x3c   :  { %495 = vmatpush.bf16.msrb.mxu2 %v1335_v26 }
  0x3d   :  { %514 = vmatpush.bf16.msrb.mxu3 %v1340_v27 }
  0x3e   :  { %458 = vmatpush.bf16.msrb.mxu0 %v1345_v28 }
  0x3f   :  { %477 = vmatpush.bf16.msrb.mxu1 %v1350_v29 }
  0x40   :  { %496 = vmatpush.bf16.msrb.mxu2 %v1355_v30 }
  0x41   :  { %515 = vmatpush.bf16.msrb.mxu3 %v1360_v31  ;;  %459 = vmatmul.bf16.vlgmr.msrb.gmra.mxu0 %v974_v32 }
  0x42   :  { %575 = vmatpush.bf16.msra.mxu0 %v1181_v0  ;;  %478 = vmatmul.bf16.vlgmr.msrb.gmra.mxu1 %v978_v33 }
  0x43   :  { %594 = vmatpush.bf16.msra.mxu1 %v1186_v1  ;;  %497 = vmatmul.bf16.vlgmr.msrb.gmra.mxu2 %v982_v34 }
  0x44   :  { %613 = vmatpush.bf16.msra.mxu2 %v1191_v2  ;;  %516 = vmatmul.bf16.vlgmr.msrb.gmra.mxu3 %v986_v35 }
  0x45   :  { %632 = vmatpush.bf16.msra.mxu3 %v1196_v3 }
  0x46   :  { %576 = vmatpush.bf16.msra.mxu0 %v1203_v4 }
  0x47   :  { %595 = vmatpush.bf16.msra.mxu1 %v1208_v5 }
  0x48   :  { %614 = vmatpush.bf16.msra.mxu2 %v1215_v6 }
  0x49   :  { %633 = vmatpush.bf16.msra.mxu3 %v1220_v7 }
  0x4a   :  { %577 = vmatpush.bf16.msra.mxu0 %v1227_v8 }
  0x4b   :  { %596 = vmatpush.bf16.msra.mxu1 %v1232_v9 }
  0x4c   :  { %615 = vmatpush.bf16.msra.mxu2 %v1239_v10 }
  0x4d   :  { %634 = vmatpush.bf16.msra.mxu3 %v1244_v11 }
  0x4e   :  { %578 = vmatpush.bf16.msra.mxu0 %v1251_v12 }
  0x4f   :  { %597 = vmatpush.bf16.msra.mxu1 %v1256_v13 }
  0x50   :  { %616 = vmatpush.bf16.msra.mxu2 %v1263_v14 }
  0x51   :  { %635 = vmatpush.bf16.msra.mxu3 %v1268_v15  ;;  %464 = vmatmul.bf16.gmra.mxu0 %v990_v44 }
  0x52   :  { %579 = vmatpush.bf16.msra.mxu0 %v1275_v16  ;;  %483 = vmatmul.bf16.gmra.mxu1 %v994_v45 }
  0x53   :  { %598 = vmatpush.bf16.msra.mxu1 %v1280_v17  ;;  %502 = vmatmul.bf16.gmra.mxu2 %v998_v46 }
  0x54   :  { %617 = vmatpush.bf16.msra.mxu2 %v1287_v18  ;;  %521 = vmatmul.bf16.gmra.mxu3 %v1002_v47 }
  0x55   :  { %636 = vmatpush.bf16.msra.mxu3 %v1292_v19 }
  0x56   :  { %580 = vmatpush.bf16.msra.mxu0 %v1299_v20 }
  0x57   :  { %599 = vmatpush.bf16.msra.mxu1 %v1304_v21 }
  0x58   :  { %618 = vmatpush.bf16.msra.mxu2 %v1311_v22 }
  0x59   :  { %637 = vmatpush.bf16.msra.mxu3 %v1316_v23 }
  0x5a   :  { %581 = vmatpush.bf16.msra.mxu0 %v1323_v24 }
  0x5b   :  { %600 = vmatpush.bf16.msra.mxu1 %v1328_v25 }
  0x5c   :  { %619 = vmatpush.bf16.msra.mxu2 %v1335_v26 }
  0x5d   :  { %638 = vmatpush.bf16.msra.mxu3 %v1340_v27 }
  0x5e   :  { %582 = vmatpush.bf16.msra.mxu0 %v1345_v28 }
  0x5f   :  { %601 = vmatpush.bf16.msra.mxu1 %v1350_v29 }
  0x60   :  { %620 = vmatpush.bf16.msra.mxu2 %v1355_v30 }
  0x61   :  { %639 = vmatpush.bf16.msra.mxu3 %v1360_v31  ;;  %583 = vmatmul.bf16.vlgmr.msra.gmra.mxu0 %v1006_v55 }
  0x62   :  { %699 = vmatpush.bf16.msrb.mxu0 %v1181_v0  ;;  %602 = vmatmul.bf16.vlgmr.msra.gmra.mxu1 %v1010_v56  ;;  %v1021_v0 = vld [vmem:[%s1697_s2 + $0x20] sm:$0xf] }
  0x63   :  { %718 = vmatpush.bf16.msrb.mxu1 %v1186_v1  ;;  %621 = vmatmul.bf16.vlgmr.msra.gmra.mxu2 %v1014_v57  ;;  %v1121_v1 = vld [vmem:[%s1697_s2 + $0x2c] sm:$0xf0] }
  0x64   :  { %737 = vmatpush.bf16.msrb.mxu2 %v1191_v2  ;;  %v1116_v2 = vld [vmem:[%s1697_s2 + $0xc] sm:$0xf] }
  0x65   :  { %756 = vmatpush.bf16.msrb.mxu3 %v1196_v3  ;;  %v1018_v58 = vor.u32 %v1116_v2, %v1015_v54  ;;  %v1119_v3 = vld [vmem:[%s1697_s2 + $0x24] sm:$0xf] }
  0x66   :  { %700 = vmatpush.bf16.msrb.mxu0 %v1203_v4  ;;  %v1023_v4 = vld [vmem:[%s1697_s2 + $0x30] sm:$0xf0] }
  0x67   :  { %719 = vmatpush.bf16.msrb.mxu1 %v1208_v5  ;;  %640 = vmatmul.bf16.vlgmr.msra.gmra.mxu3 %v1018_v58  ;;  %v1029_v5 = vld [vmem:[%s1697_s2 + $0x28] sm:$0xf] }
  0x68   :  { %738 = vmatpush.bf16.msrb.mxu2 %v1215_v6  ;;  %v1122_v6 = vld [vmem:[%s1697_s2 + $0x34] sm:$0xf0] }
  0x69   :  { %757 = vmatpush.bf16.msrb.mxu3 %v1220_v7  ;;  %v1120_v7 = vld [vmem:[%s1697_s2 + $0x2c] sm:$0xf] }
  0x6a   :  { %701 = vmatpush.bf16.msrb.mxu0 %v1227_v8  ;;  %v1031_v8 = vld [vmem:[%s1697_s2 + $0x38] sm:$0xf0] }
  0x6b   :  { %720 = vmatpush.bf16.msrb.mxu1 %v1232_v9  ;;  %v1022_v9 = vor.u32 %v1121_v1, %v1021_v0 }
  0x6c   :  { %739 = vmatpush.bf16.msrb.mxu2 %v1239_v10  ;;  %v1026_v10 = vor.u32 %v1119_v3, %v1023_v4 }
  0x6d   :  { %758 = vmatpush.bf16.msrb.mxu3 %v1244_v11  ;;  %v1030_v11 = vor.u32 %v1122_v6, %v1029_v5 }
  0x6e   :  { %702 = vmatpush.bf16.msrb.mxu0 %v1251_v12  ;;  %v1034_v12 = vor.u32 %v1120_v7, %v1031_v8 }
  0x6f   :  { %721 = vmatpush.bf16.msrb.mxu1 %v1256_v13  ;;  %v1037_v13 = vld [vmem:[%s1698_s3] sm:$0xf] }
  0x70   :  { %740 = vmatpush.bf16.msrb.mxu2 %v1263_v14  ;;  %v1125_v14 = vld [vmem:[%s1698_s3 + $0xc] sm:$0xf0] }
  0x71   :  { %759 = vmatpush.bf16.msrb.mxu3 %v1268_v15  ;;  %588 = vmatmul.bf16.gmra.mxu0 %v1022_v9  ;;  %v1123_v15 = vld [vmem:[%s1698_s3 + $0x4] sm:$0xf] }
  0x72   :  { %703 = vmatpush.bf16.msrb.mxu0 %v1275_v16  ;;  %607 = vmatmul.bf16.gmra.mxu1 %v1026_v10  ;;  %v1039_v16 = vld [vmem:[%s1698_s3 + $0x10] sm:$0xf0] }
  0x73   :  { %722 = vmatpush.bf16.msrb.mxu1 %v1280_v17  ;;  %626 = vmatmul.bf16.gmra.mxu2 %v1030_v11  ;;  %v1045_v17 = vld [vmem:[%s1698_s3 + $0x8] sm:$0xf] }
  0x74   :  { %741 = vmatpush.bf16.msrb.mxu2 %v1287_v18  ;;  %v1126_v18 = vld [vmem:[%s1698_s3 + $0x14] sm:$0xf0] }
  0x75   :  { %760 = vmatpush.bf16.msrb.mxu3 %v1292_v19  ;;  %v1124_v19 = vld [vmem:[%s1698_s3 + $0xc] sm:$0xf] }
  0x76   :  { %704 = vmatpush.bf16.msrb.mxu0 %v1299_v20  ;;  %v1047_v20 = vld [vmem:[%s1698_s3 + $0x18] sm:$0xf0] }
  0x77   :  { %723 = vmatpush.bf16.msrb.mxu1 %v1304_v21  ;;  %645 = vmatmul.bf16.gmra.mxu3 %v1034_v12  ;;  %v1038_v21 = vor.u32 %v1125_v14, %v1037_v13 }
  0x78   :  { %742 = vmatpush.bf16.msrb.mxu2 %v1311_v22  ;;  %v1042_v22 = vor.u32 %v1123_v15, %v1039_v16 }
  0x79   :  { %761 = vmatpush.bf16.msrb.mxu3 %v1316_v23  ;;  %v1046_v23 = vor.u32 %v1126_v18, %v1045_v17 }
  0x7a   :  { %705 = vmatpush.bf16.msrb.mxu0 %v1323_v24  ;;  %v1050_v24 = vor.u32 %v1124_v19, %v1047_v20 }
  0x7b   :  { %724 = vmatpush.bf16.msrb.mxu1 %v1328_v25  ;;  %v1053_v25 = vld [vmem:[%s1698_s3 + $0x20] sm:$0xf] }
  0x7c   :  { %743 = vmatpush.bf16.msrb.mxu2 %v1335_v26  ;;  %v1129_v26 = vld [vmem:[%s1698_s3 + $0x2c] sm:$0xf0] }
  0x7d   :  { %762 = vmatpush.bf16.msrb.mxu3 %v1340_v27  ;;  %v1127_v27 = vld [vmem:[%s1698_s3 + $0x24] sm:$0xf]  ;;  %v1054_v60 = vor.u32 %v1129_v26, %v1053_v25 }
  0x7e   :  { %706 = vmatpush.bf16.msrb.mxu0 %v1345_v28  ;;  %v1055_v28 = vld [vmem:[%s1698_s3 + $0x30] sm:$0xf0] }
  0x7f   :  { %725 = vmatpush.bf16.msrb.mxu1 %v1350_v29  ;;  %v1061_v29 = vld [vmem:[%s1698_s3 + $0x28] sm:$0xf]  ;;  %v1058_v61 = vor.u32 %v1127_v27, %v1055_v28 }
  0x80   :  { %744 = vmatpush.bf16.msrb.mxu2 %v1355_v30  ;;  %v1130_v30 = vld [vmem:[%s1698_s3 + $0x34] sm:$0xf0] }
  0x81   :  { %763 = vmatpush.bf16.msrb.mxu3 %v1360_v31  ;;  %707 = vmatmul.bf16.vlgmr.msrb.gmra.mxu0 %v1038_v21  ;;  %v1128_v31 = vld [vmem:[%s1698_s3 + $0x2c] sm:$0xf]  ;;  %v1062_v62 = vor.u32 %v1130_v30, %v1061_v29 }
  0x82   :  { %726 = vmatmul.bf16.vlgmr.msrb.gmra.mxu1 %v1042_v22  ;;  %v1066_v63 = vor.u32 %v1128_v31, %v1063_v59 }
  0x83   :  { %745 = vmatmul.bf16.vlgmr.msrb.gmra.mxu2 %v1046_v23 }
  0x87   :  { %764 = vmatmul.bf16.vlgmr.msrb.gmra.mxu3 %v1050_v24 }
  0x91   :  { %712 = vmatmul.bf16.gmra.mxu0 %v1054_v60 }
  0x92   :  { %731 = vmatmul.bf16.gmra.mxu1 %v1058_v61 }
  0x93   :  { %750 = vmatmul.bf16.gmra.mxu2 %v1062_v62 }
  0x97   :  { %769 = vmatmul.bf16.gmra.mxu3 %v1066_v63 }
  0x9e   :  { %v336_v32 = vpop.f32.mrf.mxu0 }
  0x9f   :  { %v355_v33 = vpop.f32.mrf.mxu1 }
  0xa0   :  { %v356_v34 = vadd.f32 %v355_v33, %v336_v32 }
  0xa6   :  { %v374_v35 = vpop.f32.mrf.mxu2  ;;  %v338_v38 = vpop.f32.mrf.mxu0 }
  0xa7   :  { %v393_v36 = vpop.f32.mrf.mxu3  ;;  %v375_v37 = vadd.f32 %v374_v35, %v356_v34  ;;  %v357_v39 = vpop.f32.mrf.mxu1 }
  0xa8   :  { %v358_v40 = vadd.f32 %v357_v39, %v338_v38 }
  0xa9   :  { %v1658_v41 = vadd.f32 %v393_v36, %v375_v37 }
  0xae   :  { %v376_v42 = vpop.f32.mrf.mxu2  ;;  %v341_v45 = vpop.f32.mrf.mxu0 }
  0xaf   :  { %v395_v43 = vpop.f32.mrf.mxu3  ;;  %v377_v44 = vadd.f32 %v376_v42, %v358_v40  ;;  %v360_v46 = vpop.f32.mrf.mxu1 }
  0xb0   :  { %v361_v47 = vadd.f32 %v360_v46, %v341_v45 }
  0xb1   :  { %v1660_v48 = vadd.f32 %v395_v43, %v377_v44 }
  0xb6   :  { %v379_v49 = vpop.f32.mrf.mxu2  ;;  %v343_v52 = vpop.f32.mrf.mxu0 }
  0xb7   :  { %v398_v50 = vpop.f32.mrf.mxu3  ;;  %v380_v51 = vadd.f32 %v379_v49, %v361_v47  ;;  %v362_v53 = vpop.f32.mrf.mxu1 }
  0xb8   :  { %v363_v2 = vadd.f32 %v362_v53, %v343_v52 }
  0xb9   :  { %v1662_v54 = vadd.f32 %v398_v50, %v380_v51 }
  0xbe   :  { %v381_v55 = vpop.f32.mrf.mxu2  ;;  %v460_v58 = vpop.f32.mrf.mxu0 }
  0xbf   :  { %v400_v56 = vpop.f32.mrf.mxu3  ;;  %v382_v57 = vadd.f32 %v381_v55, %v363_v2  ;;  %v479_v0 = vpop.f32.mrf.mxu1 }
  0xc0   :  { %v480_v3 = vadd.f32 %v479_v0, %v460_v58 }
  0xc1   :  { %v1664_v1 = vadd.f32 %v400_v56, %v382_v57 }
  0xc6   :  { %v498_v4 = vpop.f32.mrf.mxu2  ;;  %v462_v7 = vpop.f32.mrf.mxu0 }
  0xc7   :  { %v499_v5 = vadd.f32 %v498_v4, %v480_v3  ;;  %v517_v6 = vpop.f32.mrf.mxu3  ;;  %v481_v8 = vpop.f32.mrf.mxu1 }
  0xc8   :  { %v482_v10 = vadd.f32 %v481_v8, %v462_v7 }
  0xc9   :  { %v1666_v9 = vadd.f32 %v517_v6, %v499_v5 }
  0xcb   :  { %v775_v11 = vmax.f32 %v1658_v41, %v1666_v9 }
  0xce   :  { %v500_v12 = vpop.f32.mrf.mxu2  ;;  %v465_v15 = vpop.f32.mrf.mxu0 }
  0xcf   :  { %v501_v13 = vadd.f32 %v500_v12, %v482_v10  ;;  %v519_v14 = vpop.f32.mrf.mxu3  ;;  %v484_v16 = vpop.f32.mrf.mxu1  ;;  %v1142_v10 = vld [vmem:[%s1699_s5] ss:$0 sm:$0xff] }
  0xd0   :  { %v485_v18 = vadd.f32 %v484_v16, %v465_v15 }
  0xd1   :  { %v520_v17 = vadd.f32 %v519_v14, %v501_v13 }
  0xd3   :  { %v776_v19 = vmax.f32 %v1660_v48, %v520_v17 }
  0xd6   :  { %v503_v20 = vpop.f32.mrf.mxu2  ;;  %v467_v23 = vpop.f32.mrf.mxu0 }
  0xd7   :  { %v504_v21 = vadd.f32 %v503_v20, %v485_v18  ;;  %v522_v22 = vpop.f32.mrf.mxu3  ;;  %v486_v24 = vpop.f32.mrf.mxu1 }
  0xd8   :  { %v487_v26 = vadd.f32 %v486_v24, %v467_v23 }
  0xd9   :  { %v1671_v25 = vadd.f32 %v522_v22, %v504_v21 }
  0xdb   :  { %v777_v27 = vmax.f32 %v1662_v54, %v1671_v25 }
  0xde   :  { %v505_v28 = vpop.f32.mrf.mxu2  ;;  %v584_v31 = vpop.f32.mrf.mxu0 }
  0xdf   :  { %v506_v29 = vadd.f32 %v505_v28, %v487_v26  ;;  %v524_v30 = vpop.f32.mrf.mxu3  ;;  %v603_v59 = vpop.f32.mrf.mxu1 }
  0xe0   :  { %v604_v46 = vadd.f32 %v603_v59, %v584_v31 }
  0xe1   :  { %v1675_v60 = vadd.f32 %v524_v30, %v506_v29 }
  0xe3   :  { %v778_v61 = vmax.f32 %v1664_v1, %v1675_v60 }
  0xe6   :  { %v622_v62 = vpop.f32.mrf.mxu2  ;;  %v586_v32 = vpop.f32.mrf.mxu0 }
  0xe7   :  { %v605_v33 = vpop.f32.mrf.mxu1  ;;  %v623_v49 = vadd.f32 %v622_v62, %v604_v46 }
  0xe8   :  { %v606_v56 = vadd.f32 %v605_v33, %v586_v32 }
  0xea   :  { %v641_v63 = vpop.f32.mrf.mxu3 }
  0xeb   :  { %v642_v55 = vadd.f32 %v641_v63, %v623_v49 }
  0xee   :  { %v624_v34 = vpop.f32.mrf.mxu2  ;;  %v589_v36 = vpop.f32.mrf.mxu0 }
  0xef   :  { %v608_v37 = vpop.f32.mrf.mxu1  ;;  %v625_v57 = vadd.f32 %v624_v34, %v606_v56 }
  0xf0   :  { %v609_v13 = vadd.f32 %v608_v37, %v589_v36 }
  0xf2   :  { %v643_v35 = vpop.f32.mrf.mxu3 }
  0xf3   :  { %v644_v8 = vadd.f32 %v643_v35, %v625_v57 }
  0xf6   :  { %v627_v38 = vpop.f32.mrf.mxu2  ;;  %v591_v40 = vpop.f32.mrf.mxu0 }
  0xf7   :  { %v610_v41 = vpop.f32.mrf.mxu1  ;;  %v628_v20 = vadd.f32 %v627_v38, %v609_v13 }
  0xf8   :  { %v611_v31 = vadd.f32 %v610_v41, %v591_v40 }
  0xfa   :  { %v646_v39 = vpop.f32.mrf.mxu3 }
  0xfb   :  { %v647_v30 = vadd.f32 %v646_v39, %v628_v20 }
  0xfe   :  { %v629_v42 = vpop.f32.mrf.mxu2  ;;  %v708_v44 = vpop.f32.mrf.mxu0 }
  0xff   :  { %v727_v45 = vpop.f32.mrf.mxu1  ;;  %v630_v62 = vadd.f32 %v629_v42, %v611_v31 }
 0x100   :  { %v728_v47 = vadd.f32 %v727_v45, %v708_v44 }
 0x102   :  { %v648_v43 = vpop.f32.mrf.mxu3 }
 0x103   :  { %v649_v35 = vadd.f32 %v648_v43, %v630_v62 }
 0x106   :  { %v746_v48 = vpop.f32.mrf.mxu2  ;;  %v710_v52 = vpop.f32.mrf.mxu0 }
 0x107   :  { %v747_v50 = vadd.f32 %v746_v48, %v728_v47  ;;  %v729_v53 = vpop.f32.mrf.mxu1 }
 0x108   :  { %v730_v0 = vadd.f32 %v729_v53, %v710_v52 }
 0x10a   :  { %v765_v51 = vpop.f32.mrf.mxu3 }
 0x10b   :  { %v766_v2 = vadd.f32 %v765_v51, %v747_v50 }
 0x10d   :  { %v779_v58 = vmax.f32 %v642_v55, %v766_v2 }
 0x10e   :  { %v748_v3 = vpop.f32.mrf.mxu2  ;;  %v713_v6 = vpop.f32.mrf.mxu0 }
 0x10f   :  { %v749_v4 = vadd.f32 %v748_v3, %v730_v0  ;;  %v732_v7 = vpop.f32.mrf.mxu1  ;;  %v783_v9 = vmax.f32 %v775_v11, %v779_v58 }
 0x110   :  { %v733_v15 = vadd.f32 %v732_v7, %v713_v6 }
 0x111   :  { %v791_v16 = vadd.f32 %v1142_v10, %v783_v9 }
 0x112   :  { %v767_v5 = vpop.f32.mrf.mxu3 }
 0x113   :  { %v768_v12 = vadd.f32 %v767_v5, %v749_v4  ;;  %v795_v24 = vmax.f32 %v791_v16, 0.0 }
 0x115   :  { %v780_v14 = vmax.f32 %v644_v8, %v768_v12 }
 0x116   :  { %v751_v18 = vpop.f32.mrf.mxu2  ;;  %v715_v29 = vpop.f32.mrf.mxu0 }
 0x117   :  { %v784_v17 = vmax.f32 %v776_v19, %v780_v14  ;;  %v752_v22 = vadd.f32 %v751_v18, %v733_v15  ;;  %v734_v11 = vpop.f32.mrf.mxu1 }
 0x118   :  { %v735_v19 = vadd.f32 %v734_v11, %v715_v29 }
 0x119   :  { %v792_v21 = vadd.f32 %v1142_v10, %v784_v17 }
 0x11a   :  { %v770_v23 = vpop.f32.mrf.mxu3 }
 0x11b   :  { %v796_v26 = vmax.f32 %v792_v21, 0.0  ;;  %v771_v28 = vadd.f32 %v770_v23, %v752_v22 }
 0x11d   :  { %v1134_v59 = vpack.c.bf16 %v796_v26, %v795_v24  ;;  %v781_v63 = vmax.f32 %v647_v30, %v771_v28 }
 0x11e   :  { %v753_v32 = vpop.f32.mrf.mxu2 }
 0x11f   :  { %1135 = vst [vmem:[%s1700_s6] sm:$0xff] %v1134_v59   ;;  %v754_v33 = vadd.f32 %v753_v32, %v735_v19  ;;  %v785_v36 = vmax.f32 %v777_v27, %v781_v63 }
 0x121   :  { %v793_v39 = vadd.f32 %v1142_v10, %v785_v36 }
 0x122   :  { %v772_v34 = vpop.f32.mrf.mxu3 }
 0x123   :  { %v773_v37 = vadd.f32 %v772_v34, %v754_v33  ;;  %v797_v42 = vmax.f32 %v793_v39, 0.0 }
 0x125   :  { %v782_v38 = vmax.f32 %v649_v35, %v773_v37 }
 0x127   :  { %v786_v40 = vmax.f32 %v778_v61, %v782_v38 }
 0x129   :  { %v794_v41 = vadd.f32 %v1142_v10, %v786_v40 }
 0x12b   :  { %v798_v44 = vmax.f32 %v794_v41, 0.0 }
 0x12d   :  { %v1139_v45 = vpack.c.bf16 %v798_v44, %v797_v42 }
 0x12f   :  { %1141 = vst [vmem:[%s1700_s6 + $0x8] sm:$0xff] %v1139_v45  }

// kernel: lenet5_forward.5
= control target key start
LH: loop header
LB: loop body
LE: loop exit
PB: predicated region body
PF: predicated region fallthrough
CT: control target
= control target key end

     0   :  { %s10783_s1 = inlined_call_operand.vmem [shape: bf16[2048,512], index: 1, kind: input, shape index: {}]   ;;  %s10784_s0 = inlined_call_operand.vmem [shape: bf16[16,2048], index: 0, kind: input, shape index: {}]   ;;  %s10785_s2 = inlined_call_operand.vmem [shape: f32[1,512], index: 2, kind: input, shape index: {}]   ;;  %s10786_s3 = inlined_call_operand.vmem [shape: bf16[512,128], index: 3, kind: input, shape index: {}]   ;;  %s10787_s4 = inlined_call_operand.vmem [shape: f32[1,128], index: 4, kind: input, shape index: {}]   ;;  %s10788_s5 = inlined_call_operand.vmem [shape: f32[16,128], index: 5, kind: output, shape index: {}]  }
   0x1   :  { %v4606_v0 = vld [vmem:[%s10783_s1 + $0xe0] sm:$0xf]  ;;  %v6714_v1 = vld [vmem:[%s10783_s1 + $0xec] sm:$0xf0] }
   0x2   :  { %v4734_v2 = vld [vmem:[%s10783_s1 + $0x1e0] sm:$0xf]  ;;  %v4607_v3 = vor.u32 %v6714_v1, %v4606_v0  ;;  %v6746_v4 = vld [vmem:[%s10783_s1 + $0x1ec] sm:$0xf0] }
   0x3   :  { %v4862_v5 = vld [vmem:[%s10783_s1 + $0x2e0] sm:$0xf]  ;;  %v6778_v6 = vld [vmem:[%s10783_s1 + $0x2ec] sm:$0xf0]  ;;  %v4735_v7 = vor.u32 %v6746_v4, %v4734_v2 }
   0x4   :  { %v4863_v8 = vor.u32 %v6778_v6, %v4862_v5  ;;  %v4990_v9 = vld [vmem:[%s10783_s1 + $0x3e0] sm:$0xf]  ;;  %v6810_v10 = vld [vmem:[%s10783_s1 + $0x3ec] sm:$0xf0]  ;;  %3198 = vmatpush.bf16.msra.mxu0 %v4607_v3 }
   0x5   :  { %v4590_v11 = vld [vmem:[%s10783_s1 + $0xc0] sm:$0xf]  ;;  %v4991_v12 = vor.u32 %v6810_v10, %v4990_v9  ;;  %v6710_v13 = vld [vmem:[%s10783_s1 + $0xcc] sm:$0xf0]  ;;  %3212 = vmatpush.bf16.msra.mxu1 %v4735_v7 }
   0x6   :  { %v4718_v14 = vld [vmem:[%s10783_s1 + $0x1c0] sm:$0xf]  ;;  %v6742_v15 = vld [vmem:[%s10783_s1 + $0x1cc] sm:$0xf0]  ;;  %3226 = vmatpush.bf16.msra.mxu2 %v4863_v8  ;;  %v4591_v16 = vor.u32 %v6710_v13, %v4590_v11 }
   0x7   :  { %v4719_v17 = vor.u32 %v6742_v15, %v4718_v14  ;;  %v4846_v18 = vld [vmem:[%s10783_s1 + $0x2c0] sm:$0xf]  ;;  %v6774_v19 = vld [vmem:[%s10783_s1 + $0x2cc] sm:$0xf0]  ;;  %3240 = vmatpush.bf16.msra.mxu3 %v4991_v12 }
   0x8   :  { %v4974_v20 = vld [vmem:[%s10783_s1 + $0x3c0] sm:$0xf]  ;;  %v4847_v21 = vor.u32 %v6774_v19, %v4846_v18  ;;  %v6806_v22 = vld [vmem:[%s10783_s1 + $0x3cc] sm:$0xf0]  ;;  %3199 = vmatpush.bf16.msra.mxu0 %v4591_v16 }
   0x9   :  { %v4574_v23 = vld [vmem:[%s10783_s1 + $0xa0] sm:$0xf]  ;;  %v6706_v24 = vld [vmem:[%s10783_s1 + $0xac] sm:$0xf0]  ;;  %v4975_v25 = vor.u32 %v6806_v22, %v4974_v20  ;;  %3213 = vmatpush.bf16.msra.mxu1 %v4719_v17 }
   0xa   :  { %v4702_v26 = vld [vmem:[%s10783_s1 + $0x1a0] sm:$0xf]  ;;  %v6738_v27 = vld [vmem:[%s10783_s1 + $0x1ac] sm:$0xf0]  ;;  %v4575_v29 = vor.u32 %v6706_v24, %v4574_v23  ;;  %3227 = vmatpush.bf16.msra.mxu2 %v4847_v21 }
   0xb   :  { %v4830_v28 = vld [vmem:[%s10783_s1 + $0x2a0] sm:$0xf]  ;;  %v6770_v30 = vld [vmem:[%s10783_s1 + $0x2ac] sm:$0xf0]  ;;  %v4703_v33 = vor.u32 %v6738_v27, %v4702_v26  ;;  %3241 = vmatpush.bf16.msra.mxu3 %v4975_v25 }
   0xc   :  { %v4958_v31 = vld [vmem:[%s10783_s1 + $0x3a0] sm:$0xf]  ;;  %v6802_v32 = vld [vmem:[%s10783_s1 + $0x3ac] sm:$0xf0]  ;;  %v4831_v34 = vor.u32 %v6770_v30, %v4830_v28  ;;  %3200 = vmatpush.bf16.msra.mxu0 %v4575_v29 }
   0xd   :  { %v4558_v35 = vld [vmem:[%s10783_s1 + $0x80] sm:$0xf]  ;;  %v6702_v36 = vld [vmem:[%s10783_s1 + $0x8c] sm:$0xf0]  ;;  %v4959_v38 = vor.u32 %v6802_v32, %v4958_v31  ;;  %3214 = vmatpush.bf16.msra.mxu1 %v4703_v33 }
   0xe   :  { %v4686_v37 = vld [vmem:[%s10783_s1 + $0x180] sm:$0xf]  ;;  %v6734_v39 = vld [vmem:[%s10783_s1 + $0x18c] sm:$0xf0]  ;;  %v4559_v44 = vor.u32 %v6702_v36, %v4558_v35  ;;  %3228 = vmatpush.bf16.msra.mxu2 %v4831_v34 }
   0xf   :  { %v4814_v40 = vld [vmem:[%s10783_s1 + $0x280] sm:$0xf]  ;;  %v6766_v41 = vld [vmem:[%s10783_s1 + $0x28c] sm:$0xf0]  ;;  %v4687_v45 = vor.u32 %v6734_v39, %v4686_v37  ;;  %3242 = vmatpush.bf16.msra.mxu3 %v4959_v38 }
  0x10   :  { %v4942_v42 = vld [vmem:[%s10783_s1 + $0x380] sm:$0xf]  ;;  %v6798_v43 = vld [vmem:[%s10783_s1 + $0x38c] sm:$0xf0]  ;;  %v4815_v46 = vor.u32 %v6766_v41, %v4814_v40  ;;  %3201 = vmatpush.bf16.msra.mxu0 %v4559_v44 }
  0x11   :  { %v4542_v47 = vld [vmem:[%s10783_s1 + $0x60] sm:$0xf]  ;;  %v6698_v48 = vld [vmem:[%s10783_s1 + $0x6c] sm:$0xf0]  ;;  %v4943_v50 = vor.u32 %v6798_v43, %v4942_v42  ;;  %3215 = vmatpush.bf16.msra.mxu1 %v4687_v45 }
  0x12   :  { %v4670_v49 = vld [vmem:[%s10783_s1 + $0x160] sm:$0xf]  ;;  %v6730_v51 = vld [vmem:[%s10783_s1 + $0x16c] sm:$0xf0]  ;;  %v4543_v56 = vor.u32 %v6698_v48, %v4542_v47  ;;  %3229 = vmatpush.bf16.msra.mxu2 %v4815_v46 }
  0x13   :  { %v4798_v52 = vld [vmem:[%s10783_s1 + $0x260] sm:$0xf]  ;;  %v6762_v53 = vld [vmem:[%s10783_s1 + $0x26c] sm:$0xf0]  ;;  %v4671_v57 = vor.u32 %v6730_v51, %v4670_v49  ;;  %3243 = vmatpush.bf16.msra.mxu3 %v4943_v50 }
  0x14   :  { %v4926_v54 = vld [vmem:[%s10783_s1 + $0x360] sm:$0xf]  ;;  %v6794_v55 = vld [vmem:[%s10783_s1 + $0x36c] sm:$0xf0]  ;;  %v4799_v58 = vor.u32 %v6762_v53, %v4798_v52  ;;  %3202 = vmatpush.bf16.msra.mxu0 %v4543_v56 }
  0x15   :  { %v4526_v59 = vld [vmem:[%s10783_s1 + $0x40] sm:$0xf]  ;;  %v6694_v60 = vld [vmem:[%s10783_s1 + $0x4c] sm:$0xf0]  ;;  %v4927_v62 = vor.u32 %v6794_v55, %v4926_v54  ;;  %3216 = vmatpush.bf16.msra.mxu1 %v4671_v57  ;;  %v4438_v54 = vld [vmem:[%s10784_s0 + $0x8] sm:$0xf] }
  0x16   :  { %v4654_v61 = vld [vmem:[%s10783_s1 + $0x140] sm:$0xf]  ;;  %v6726_v63 = vld [vmem:[%s10783_s1 + $0x14c] sm:$0xf0]  ;;  %v4527_v4 = vor.u32 %v6694_v60, %v4526_v59  ;;  %3230 = vmatpush.bf16.msra.mxu2 %v4799_v58  ;;  %v6677_v59 = vld [vmem:[%s10784_s0 + $0x44] sm:$0xf0] }
  0x17   :  { %v4782_v0 = vld [vmem:[%s10783_s1 + $0x240] sm:$0xf]  ;;  %v6758_v1 = vld [vmem:[%s10783_s1 + $0x24c] sm:$0xf0]  ;;  %v4655_v5 = vor.u32 %v6726_v63, %v4654_v61  ;;  %3244 = vmatpush.bf16.msra.mxu3 %v4927_v62 }
  0x18   :  { %v4910_v2 = vld [vmem:[%s10783_s1 + $0x340] sm:$0xf]  ;;  %v6790_v3 = vld [vmem:[%s10783_s1 + $0x34c] sm:$0xf0]  ;;  %v4783_v6 = vor.u32 %v6758_v1, %v4782_v0  ;;  %3203 = vmatpush.bf16.msra.mxu0 %v4527_v4  ;;  %v7530_v1 = vor.u32 %v6677_v59, %v4438_v54 }
  0x19   :  { %v4510_v7 = vld [vmem:[%s10783_s1 + $0x20] sm:$0xf]  ;;  %v6690_v8 = vld [vmem:[%s10783_s1 + $0x2c] sm:$0xf0]  ;;  %v4911_v10 = vor.u32 %v6790_v3, %v4910_v2  ;;  %3217 = vmatpush.bf16.msra.mxu1 %v4655_v5 }
  0x1a   :  { %v4638_v9 = vld [vmem:[%s10783_s1 + $0x120] sm:$0xf]  ;;  %v6722_v11 = vld [vmem:[%s10783_s1 + $0x12c] sm:$0xf0]  ;;  %v4511_v16 = vor.u32 %v6690_v8, %v4510_v7  ;;  %3231 = vmatpush.bf16.msra.mxu2 %v4783_v6  ;;  %v6668_v6 = vld [vmem:[%s10784_s0 + $0x4] sm:$0xf] }
  0x1b   :  { %v4766_v12 = vld [vmem:[%s10783_s1 + $0x220] sm:$0xf]  ;;  %v6754_v13 = vld [vmem:[%s10783_s1 + $0x22c] sm:$0xf0]  ;;  %v4639_v19 = vor.u32 %v6722_v11, %v4638_v9  ;;  %3245 = vmatpush.bf16.msra.mxu3 %v4911_v10  ;;  %v4432_v7 = vld [vmem:[%s10784_s0 + $0x40] sm:$0xf0] }
  0x1c   :  { %v4894_v14 = vld [vmem:[%s10783_s1 + $0x320] sm:$0xf]  ;;  %v6786_v15 = vld [vmem:[%s10783_s1 + $0x32c] sm:$0xf0]  ;;  %v4767_v20 = vor.u32 %v6754_v13, %v4766_v12  ;;  %3204 = vmatpush.bf16.msra.mxu0 %v4511_v16  ;;  %v6669_v8 = vld [vmem:[%s10784_s0 + $0xc] sm:$0xf]  ;;  %v7552_v10 = vor.u32 %v6668_v6, %v4432_v7 }
  0x1d   :  { %v4494_v17 = vld [vmem:[%s10783_s1] sm:$0xf]  ;;  %v6686_v18 = vld [vmem:[%s10783_s1 + $0xc] sm:$0xf0]  ;;  %v4895_v24 = vor.u32 %v6786_v15, %v4894_v14  ;;  %3218 = vmatpush.bf16.msra.mxu1 %v4639_v19  ;;  %v4440_v11 = vld [vmem:[%s10784_s0 + $0x48] sm:$0xf0] }
  0x1e   :  { %v4622_v21 = vld [vmem:[%s10783_s1 + $0x100] sm:$0xf]  ;;  %v6718_v22 = vld [vmem:[%s10783_s1 + $0x10c] sm:$0xf0]  ;;  %v4495_v31 = vor.u32 %v6686_v18, %v4494_v17  ;;  %3232 = vmatpush.bf16.msra.mxu2 %v4767_v20  ;;  %v7566_v17 = vor.u32 %v6669_v8, %v4440_v11 }
  0x1f   :  { %v4750_v23 = vld [vmem:[%s10783_s1 + $0x200] sm:$0xf]  ;;  %v6750_v25 = vld [vmem:[%s10783_s1 + $0x20c] sm:$0xf0]  ;;  %v4623_v35 = vor.u32 %v6718_v22, %v4622_v21  ;;  %3246 = vmatpush.bf16.msra.mxu3 %v4895_v24 }
  0x20   :  { %v4878_v26 = vld [vmem:[%s10783_s1 + $0x300] sm:$0xf]  ;;  %v6782_v27 = vld [vmem:[%s10783_s1 + $0x30c] sm:$0xf0]  ;;  %v4751_v36 = vor.u32 %v6750_v25, %v4750_v23  ;;  %3205 = vmatpush.bf16.msra.mxu0 %v4495_v31 }
  0x21   :  { %v5118_v28 = vld [vmem:[%s10783_s1 + $0x4e0] sm:$0xf]  ;;  %v6842_v29 = vld [vmem:[%s10783_s1 + $0x4ec] sm:$0xf0]  ;;  %v4879_v39 = vor.u32 %v6782_v27, %v4878_v26  ;;  %3219 = vmatpush.bf16.msra.mxu1 %v4623_v35 }
  0x22   :  { %v5246_v30 = vld [vmem:[%s10783_s1 + $0x5e0] sm:$0xf]  ;;  %v6874_v32 = vld [vmem:[%s10783_s1 + $0x5ec] sm:$0xf0]  ;;  %v5119_v40 = vor.u32 %v6842_v29, %v5118_v28  ;;  %3233 = vmatpush.bf16.msra.mxu2 %v4751_v36 }
  0x23   :  { %v5374_v33 = vld [vmem:[%s10783_s1 + $0x6e0] sm:$0xf]  ;;  %v6906_v34 = vld [vmem:[%s10783_s1 + $0x6ec] sm:$0xf0]  ;;  %v5247_v43 = vor.u32 %v6874_v32, %v5246_v30  ;;  %3247 = vmatpush.bf16.msra.mxu3 %v4879_v39 }
  0x24   :  { %v5502_v37 = vld [vmem:[%s10783_s1 + $0x7e0] sm:$0xf]  ;;  %v6938_v38 = vld [vmem:[%s10783_s1 + $0x7ec] sm:$0xf0]  ;;  %v5375_v44 = vor.u32 %v6906_v34, %v5374_v33  ;;  %3254 = vmatpush.bf16.msrb.mxu0 %v5119_v40  ;;  %3220 = vmatmul.bf16.vlgmr.msra.gmra.mxu1 %v7552_v10 }
  0x25   :  { %v5102_v41 = vld [vmem:[%s10783_s1 + $0x4c0] sm:$0xf]  ;;  %v6838_v42 = vld [vmem:[%s10783_s1 + $0x4cc] sm:$0xf0]  ;;  %v5503_v48 = vor.u32 %v6938_v38, %v5502_v37  ;;  %3268 = vmatpush.bf16.msrb.mxu1 %v5247_v43  ;;  %3234 = vmatmul.bf16.vlgmr.msra.gmra.mxu2 %v7530_v1 }
  0x26   :  { %v5230_v45 = vld [vmem:[%s10783_s1 + $0x5c0] sm:$0xf]  ;;  %v6870_v46 = vld [vmem:[%s10783_s1 + $0x5cc] sm:$0xf0]  ;;  %v5103_v55 = vor.u32 %v6838_v42, %v5102_v41  ;;  %3282 = vmatpush.bf16.msrb.mxu2 %v5375_v44  ;;  %3248 = vmatmul.bf16.vlgmr.msra.gmra.mxu3 %v7566_v17 }
  0x27   :  { %v5358_v47 = vld [vmem:[%s10783_s1 + $0x6c0] sm:$0xf]  ;;  %v6902_v49 = vld [vmem:[%s10783_s1 + $0x6cc] sm:$0xf0]  ;;  %v5231_v60 = vor.u32 %v6870_v46, %v5230_v45  ;;  %3296 = vmatpush.bf16.msrb.mxu3 %v5503_v48 }
  0x28   :  { %v5486_v50 = vld [vmem:[%s10783_s1 + $0x7c0] sm:$0xf]  ;;  %v6934_v51 = vld [vmem:[%s10783_s1 + $0x7cc] sm:$0xf0]  ;;  %v5359_v61 = vor.u32 %v6902_v49, %v5358_v47  ;;  %3255 = vmatpush.bf16.msrb.mxu0 %v5103_v55 }
  0x29   :  { %v4430_v52 = vld [vmem:[%s10784_s0] sm:$0xf]  ;;  %v6834_v57 = vld [vmem:[%s10783_s1 + $0x4ac] sm:$0xf0]  ;;  %v5487_v2 = vor.u32 %v6934_v51, %v5486_v50  ;;  %3269 = vmatpush.bf16.msrb.mxu1 %v5231_v60 }
  0x2a   :  { %v6676_v53 = vld [vmem:[%s10784_s0 + $0x3c] sm:$0xf0]  ;;  %v6866_v63 = vld [vmem:[%s10783_s1 + $0x5ac] sm:$0xf0]  ;;  %3283 = vmatpush.bf16.msrb.mxu2 %v5359_v61 }
  0x2b   :  { %v5086_v56 = vld [vmem:[%s10783_s1 + $0x4a0] sm:$0xf]  ;;  %v7516_v58 = vor.u32 %v6676_v53, %v4430_v52  ;;  %v6898_v3 = vld [vmem:[%s10783_s1 + $0x6ac] sm:$0xf0]  ;;  %3297 = vmatpush.bf16.msrb.mxu3 %v5487_v2 }
  0x2c   :  { %v5214_v62 = vld [vmem:[%s10783_s1 + $0x5a0] sm:$0xf]  ;;  %v6930_v5 = vld [vmem:[%s10783_s1 + $0x7ac] sm:$0xf0]  ;;  %v5087_v9 = vor.u32 %v6834_v57, %v5086_v56 }
  0x2d   :  { %v5342_v0 = vld [vmem:[%s10783_s1 + $0x6a0] sm:$0xf]  ;;  %3206 = vmatmul.bf16.vlgmr.msra.gmra.mxu0 %v7516_v58  ;;  %v5215_v12 = vor.u32 %v6866_v63, %v5214_v62  ;;  %v6830_v15 = vld [vmem:[%s10783_s1 + $0x48c] sm:$0xf0] }
  0x2e   :  { %v5470_v4 = vld [vmem:[%s10783_s1 + $0x7a0] sm:$0xf]  ;;  %v5343_v13 = vor.u32 %v6898_v3, %v5342_v0  ;;  %v6862_v19 = vld [vmem:[%s10783_s1 + $0x58c] sm:$0xf0]  ;;  %3256 = vmatpush.bf16.msrb.mxu0 %v5087_v9 }
  0x2f   :  { %v5070_v14 = vld [vmem:[%s10783_s1 + $0x480] sm:$0xf]  ;;  %v5471_v18 = vor.u32 %v6930_v5, %v5470_v4  ;;  %v6894_v21 = vld [vmem:[%s10783_s1 + $0x68c] sm:$0xf0]  ;;  %3270 = vmatpush.bf16.msrb.mxu1 %v5215_v12 }
  0x30   :  { %v5198_v16 = vld [vmem:[%s10783_s1 + $0x580] sm:$0xf]  ;;  %v6926_v23 = vld [vmem:[%s10783_s1 + $0x78c] sm:$0xf0]  ;;  %v5071_v24 = vor.u32 %v6830_v15, %v5070_v14  ;;  %3284 = vmatpush.bf16.msrb.mxu2 %v5343_v13 }
  0x31   :  { %v5326_v20 = vld [vmem:[%s10783_s1 + $0x680] sm:$0xf]  ;;  %v5199_v25 = vor.u32 %v6862_v19, %v5198_v16  ;;  %v6826_v28 = vld [vmem:[%s10783_s1 + $0x46c] sm:$0xf0]  ;;  %3298 = vmatpush.bf16.msrb.mxu3 %v5471_v18 }
  0x32   :  { %v5454_v22 = vld [vmem:[%s10783_s1 + $0x780] sm:$0xf]  ;;  %v5327_v26 = vor.u32 %v6894_v21, %v5326_v20  ;;  %v6858_v31 = vld [vmem:[%s10783_s1 + $0x56c] sm:$0xf0]  ;;  %3257 = vmatpush.bf16.msrb.mxu0 %v5071_v24 }
  0x33   :  { %v5054_v27 = vld [vmem:[%s10783_s1 + $0x460] sm:$0xf]  ;;  %v5455_v30 = vor.u32 %v6926_v23, %v5454_v22  ;;  %v6890_v33 = vld [vmem:[%s10783_s1 + $0x66c] sm:$0xf0]  ;;  %3271 = vmatpush.bf16.msrb.mxu1 %v5199_v25  ;;  %v4454_v25 = vld [vmem:[%s10784_s0 + $0x18] sm:$0xf] }
  0x34   :  { %v5182_v29 = vld [vmem:[%s10783_s1 + $0x560] sm:$0xf]  ;;  %v6922_v35 = vld [vmem:[%s10783_s1 + $0x76c] sm:$0xf0]  ;;  %v5055_v36 = vor.u32 %v6826_v28, %v5054_v27  ;;  %3285 = vmatpush.bf16.msrb.mxu2 %v5327_v26  ;;  %v6679_v26 = vld [vmem:[%s10784_s0 + $0x54] sm:$0xf0] }
  0x35   :  { %v5310_v32 = vld [vmem:[%s10783_s1 + $0x660] sm:$0xf]  ;;  %v5183_v37 = vor.u32 %v6858_v31, %v5182_v29  ;;  %v6822_v40 = vld [vmem:[%s10783_s1 + $0x44c] sm:$0xf0]  ;;  %3299 = vmatpush.bf16.msrb.mxu3 %v5455_v30  ;;  %v6670_v27 = vld [vmem:[%s10784_s0 + $0x14] sm:$0xf] }
  0x36   :  { %v5438_v34 = vld [vmem:[%s10783_s1 + $0x760] sm:$0xf]  ;;  %v5311_v38 = vor.u32 %v6890_v33, %v5310_v32  ;;  %v6854_v43 = vld [vmem:[%s10783_s1 + $0x54c] sm:$0xf0]  ;;  %3258 = vmatpush.bf16.msrb.mxu0 %v5055_v36  ;;  %v4448_v30 = vld [vmem:[%s10784_s0 + $0x50] sm:$0xf0] }
  0x37   :  { %v5038_v39 = vld [vmem:[%s10783_s1 + $0x440] sm:$0xf]  ;;  %v5439_v42 = vor.u32 %v6922_v35, %v5438_v34  ;;  %v6886_v45 = vld [vmem:[%s10783_s1 + $0x64c] sm:$0xf0]  ;;  %3272 = vmatpush.bf16.msrb.mxu1 %v5183_v37  ;;  %v6671_v31 = vld [vmem:[%s10784_s0 + $0x1c] sm:$0xf] }
  0x38   :  { %v5166_v41 = vld [vmem:[%s10783_s1 + $0x540] sm:$0xf]  ;;  %v6918_v47 = vld [vmem:[%s10783_s1 + $0x74c] sm:$0xf0]  ;;  %v5039_v48 = vor.u32 %v6822_v40, %v5038_v39  ;;  %3286 = vmatpush.bf16.msrb.mxu2 %v5311_v38  ;;  %v4456_v32 = vld [vmem:[%s10784_s0 + $0x58] sm:$0xf0] }
  0x39   :  { %v5294_v44 = vld [vmem:[%s10783_s1 + $0x640] sm:$0xf]  ;;  %v5167_v50 = vor.u32 %v6854_v43, %v5166_v41  ;;  %v6818_v52 = vld [vmem:[%s10783_s1 + $0x42c] sm:$0xf0]  ;;  %3300 = vmatpush.bf16.msrb.mxu3 %v5439_v42  ;;  %v7749_v43 = vor.u32 %v6679_v26, %v4454_v25 }
  0x3a   :  { %v5422_v46 = vld [vmem:[%s10783_s1 + $0x740] sm:$0xf]  ;;  %v5295_v51 = vor.u32 %v6886_v45, %v5294_v44  ;;  %v6850_v54 = vld [vmem:[%s10783_s1 + $0x52c] sm:$0xf0]  ;;  %3259 = vmatpush.bf16.msrb.mxu0 %v5039_v48  ;;  %v7751_v44 = vor.u32 %v6670_v27, %v4448_v30 }
  0x3b   :  { %v5022_v49 = vld [vmem:[%s10783_s1 + $0x420] sm:$0xf]  ;;  %v5423_v55 = vor.u32 %v6918_v47, %v5422_v46  ;;  %v6882_v57 = vld [vmem:[%s10783_s1 + $0x62c] sm:$0xf0]  ;;  %3273 = vmatpush.bf16.msrb.mxu1 %v5167_v50  ;;  %v7759_v47 = vor.u32 %v6671_v31, %v4456_v32 }
  0x3c   :  { %v5150_v53 = vld [vmem:[%s10783_s1 + $0x520] sm:$0xf]  ;;  %v6914_v60 = vld [vmem:[%s10783_s1 + $0x72c] sm:$0xf0]  ;;  %v5023_v63 = vor.u32 %v6818_v52, %v5022_v49  ;;  %3287 = vmatpush.bf16.msrb.mxu2 %v5295_v51 }
  0x3d   :  { %v5278_v56 = vld [vmem:[%s10783_s1 + $0x620] sm:$0xf]  ;;  %v6814_v62 = vld [vmem:[%s10783_s1 + $0x40c] sm:$0xf0]  ;;  %v5151_v5 = vor.u32 %v6850_v54, %v5150_v53  ;;  %3301 = vmatpush.bf16.msrb.mxu3 %v5423_v55 }
  0x3e   :  { %v5406_v59 = vld [vmem:[%s10783_s1 + $0x720] sm:$0xf]  ;;  %v6846_v2 = vld [vmem:[%s10783_s1 + $0x50c] sm:$0xf0]  ;;  %v5279_v6 = vor.u32 %v6882_v57, %v5278_v56  ;;  %3260 = vmatpush.bf16.msrb.mxu0 %v5023_v63 }
  0x3f   :  { %v5006_v61 = vld [vmem:[%s10783_s1 + $0x400] sm:$0xf]  ;;  %v6878_v4 = vld [vmem:[%s10783_s1 + $0x60c] sm:$0xf0]  ;;  %v5407_v11 = vor.u32 %v6914_v60, %v5406_v59  ;;  %3274 = vmatpush.bf16.msrb.mxu1 %v5151_v5 }
  0x40   :  { %v5134_v0 = vld [vmem:[%s10783_s1 + $0x500] sm:$0xf]  ;;  %v6910_v8 = vld [vmem:[%s10783_s1 + $0x70c] sm:$0xf0]  ;;  %v5007_v19 = vor.u32 %v6814_v62, %v5006_v61  ;;  %3288 = vmatpush.bf16.msrb.mxu2 %v5279_v6 }
  0x41   :  { %v5262_v3 = vld [vmem:[%s10783_s1 + $0x600] sm:$0xf]  ;;  %v6970_v12 = vld [vmem:[%s10783_s1 + $0x8ec] sm:$0xf0]  ;;  %v5135_v23 = vor.u32 %v6846_v2, %v5134_v0  ;;  %3302 = vmatpush.bf16.msrb.mxu3 %v5407_v11 }
  0x42   :  { %v5390_v7 = vld [vmem:[%s10783_s1 + $0x700] sm:$0xf]  ;;  %v7002_v14 = vld [vmem:[%s10783_s1 + $0x9ec] sm:$0xf0]  ;;  %v5263_v24 = vor.u32 %v6878_v4, %v5262_v3  ;;  %3261 = vmatpush.bf16.msrb.mxu0 %v5007_v19 }
  0x43   :  { %v5630_v9 = vld [vmem:[%s10783_s1 + $0x8e0] sm:$0xf]  ;;  %v7034_v16 = vld [vmem:[%s10783_s1 + $0xaec] sm:$0xf0]  ;;  %v5391_v28 = vor.u32 %v6910_v8, %v5390_v7  ;;  %3275 = vmatpush.bf16.msrb.mxu1 %v5135_v23 }
  0x44   :  { %v5758_v13 = vld [vmem:[%s10783_s1 + $0x9e0] sm:$0xf]  ;;  %v7066_v20 = vld [vmem:[%s10783_s1 + $0xbec] sm:$0xf0]  ;;  %v5631_v29 = vor.u32 %v6970_v12, %v5630_v9  ;;  %3289 = vmatpush.bf16.msrb.mxu2 %v5263_v24 }
  0x45   :  { %v5886_v15 = vld [vmem:[%s10783_s1 + $0xae0] sm:$0xf]  ;;  %v4446_v21 = vld [vmem:[%s10784_s0 + $0x10] sm:$0xf]  ;;  %v5759_v33 = vor.u32 %v7002_v14, %v5758_v13  ;;  %3303 = vmatpush.bf16.msrb.mxu3 %v5391_v28 }
  0x46   :  { %v6014_v18 = vld [vmem:[%s10783_s1 + $0xbe0] sm:$0xf]  ;;  %v6678_v22 = vld [vmem:[%s10784_s0 + $0x4c] sm:$0xf0]  ;;  %v5887_v34 = vor.u32 %v7034_v16, %v5886_v15  ;;  %3310 = vmatpush.bf16.msra.mxu0 %v5631_v29  ;;  %3276 = vmatmul.bf16.vlgmr.msrb.gmra.mxu1 %v7751_v44 }
  0x47   :  { %v5614_v35 = vld [vmem:[%s10783_s1 + $0x8c0] sm:$0xf]  ;;  %v6966_v36 = vld [vmem:[%s10783_s1 + $0x8cc] sm:$0xf0]  ;;  %v6015_v38 = vor.u32 %v7066_v20, %v6014_v18  ;;  %v7738_v39 = vor.u32 %v6678_v22, %v4446_v21  ;;  %3324 = vmatpush.bf16.msra.mxu1 %v5759_v33  ;;  %3290 = vmatmul.bf16.vlgmr.msrb.gmra.mxu2 %v7749_v43 }
  0x48   :  { %v5742_v37 = vld [vmem:[%s10783_s1 + $0x9c0] sm:$0xf]  ;;  %v6998_v40 = vld [vmem:[%s10783_s1 + $0x9cc] sm:$0xf0]  ;;  %v5615_v48 = vor.u32 %v6966_v36, %v5614_v35  ;;  %3338 = vmatpush.bf16.msra.mxu2 %v5887_v34  ;;  %3304 = vmatmul.bf16.vlgmr.msrb.gmra.mxu3 %v7759_v47 }
  0x49   :  { %v5870_v41 = vld [vmem:[%s10783_s1 + $0xac0] sm:$0xf]  ;;  %v7030_v42 = vld [vmem:[%s10783_s1 + $0xacc] sm:$0xf0]  ;;  %v5743_v49 = vor.u32 %v6998_v40, %v5742_v37  ;;  %3352 = vmatpush.bf16.msra.mxu3 %v6015_v38  ;;  %3262 = vmatmul.bf16.vlgmr.msrb.gmra.mxu0 %v7738_v39 }
  0x4a   :  { %v5998_v45 = vld [vmem:[%s10783_s1 + $0xbc0] sm:$0xf]  ;;  %v7062_v46 = vld [vmem:[%s10783_s1 + $0xbcc] sm:$0xf0]  ;;  %v5871_v50 = vor.u32 %v7030_v42, %v5870_v41  ;;  %3311 = vmatpush.bf16.msra.mxu0 %v5615_v48 }
  0x4b   :  { %v5598_v51 = vld [vmem:[%s10783_s1 + $0x8a0] sm:$0xf]  ;;  %v6962_v52 = vld [vmem:[%s10783_s1 + $0x8ac] sm:$0xf0]  ;;  %v5999_v54 = vor.u32 %v7062_v46, %v5998_v45  ;;  %3325 = vmatpush.bf16.msra.mxu1 %v5743_v49 }
  0x4c   :  { %v5726_v53 = vld [vmem:[%s10783_s1 + $0x9a0] sm:$0xf]  ;;  %v6994_v55 = vld [vmem:[%s10783_s1 + $0x9ac] sm:$0xf0]  ;;  %v5599_v61 = vor.u32 %v6962_v52, %v5598_v51  ;;  %3339 = vmatpush.bf16.msra.mxu2 %v5871_v50 }
  0x4d   :  { %v5854_v56 = vld [vmem:[%s10783_s1 + $0xaa0] sm:$0xf]  ;;  %v7026_v57 = vld [vmem:[%s10783_s1 + $0xaac] sm:$0xf0]  ;;  %v5727_v62 = vor.u32 %v6994_v55, %v5726_v53  ;;  %3353 = vmatpush.bf16.msra.mxu3 %v5999_v54 }
  0x4e   :  { %v5982_v59 = vld [vmem:[%s10783_s1 + $0xba0] sm:$0xf]  ;;  %v7058_v60 = vld [vmem:[%s10783_s1 + $0xbac] sm:$0xf0]  ;;  %v5855_v63 = vor.u32 %v7026_v57, %v5854_v56  ;;  %3312 = vmatpush.bf16.msra.mxu0 %v5599_v61 }
  0x4f   :  { %v5582_v0 = vld [vmem:[%s10783_s1 + $0x880] sm:$0xf]  ;;  %v6958_v2 = vld [vmem:[%s10783_s1 + $0x88c] sm:$0xf0]  ;;  %v5983_v4 = vor.u32 %v7058_v60, %v5982_v59  ;;  %3326 = vmatpush.bf16.msra.mxu1 %v5727_v62 }
  0x50   :  { %v5710_v3 = vld [vmem:[%s10783_s1 + $0x980] sm:$0xf]  ;;  %v6990_v5 = vld [vmem:[%s10783_s1 + $0x98c] sm:$0xf0]  ;;  %v5583_v11 = vor.u32 %v6958_v2, %v5582_v0  ;;  %3340 = vmatpush.bf16.msra.mxu2 %v5855_v63 }
  0x51   :  { %v5838_v6 = vld [vmem:[%s10783_s1 + $0xa80] sm:$0xf]  ;;  %v7022_v7 = vld [vmem:[%s10783_s1 + $0xa8c] sm:$0xf0]  ;;  %v5711_v12 = vor.u32 %v6990_v5, %v5710_v3  ;;  %3354 = vmatpush.bf16.msra.mxu3 %v5983_v4 }
  0x52   :  { %v5966_v8 = vld [vmem:[%s10783_s1 + $0xb80] sm:$0xf]  ;;  %v7054_v9 = vld [vmem:[%s10783_s1 + $0xb8c] sm:$0xf0]  ;;  %v5839_v13 = vor.u32 %v7022_v7, %v5838_v6  ;;  %3313 = vmatpush.bf16.msra.mxu0 %v5583_v11 }
  0x53   :  { %v5566_v14 = vld [vmem:[%s10783_s1 + $0x860] sm:$0xf]  ;;  %v6954_v15 = vld [vmem:[%s10783_s1 + $0x86c] sm:$0xf0]  ;;  %v5967_v18 = vor.u32 %v7054_v9, %v5966_v8  ;;  %3327 = vmatpush.bf16.msra.mxu1 %v5711_v12 }
  0x54   :  { %v5694_v16 = vld [vmem:[%s10783_s1 + $0x960] sm:$0xf]  ;;  %v6986_v19 = vld [vmem:[%s10783_s1 + $0x96c] sm:$0xf0]  ;;  %v5567_v24 = vor.u32 %v6954_v15, %v5566_v14  ;;  %3341 = vmatpush.bf16.msra.mxu2 %v5839_v13 }
  0x55   :  { %v5822_v20 = vld [vmem:[%s10783_s1 + $0xa60] sm:$0xf]  ;;  %v7018_v21 = vld [vmem:[%s10783_s1 + $0xa6c] sm:$0xf0]  ;;  %v5695_v25 = vor.u32 %v6986_v19, %v5694_v16  ;;  %3355 = vmatpush.bf16.msra.mxu3 %v5967_v18  ;;  %v4470_v16 = vld [vmem:[%s10784_s0 + $0x28] sm:$0xf] }
  0x56   :  { %v5950_v22 = vld [vmem:[%s10783_s1 + $0xb60] sm:$0xf]  ;;  %v7050_v23 = vld [vmem:[%s10783_s1 + $0xb6c] sm:$0xf0]  ;;  %v5823_v26 = vor.u32 %v7018_v21, %v5822_v20  ;;  %3314 = vmatpush.bf16.msra.mxu0 %v5567_v24  ;;  %v6681_v18 = vld [vmem:[%s10784_s0 + $0x64] sm:$0xf0] }
  0x57   :  { %v5550_v27 = vld [vmem:[%s10783_s1 + $0x840] sm:$0xf]  ;;  %v6950_v28 = vld [vmem:[%s10783_s1 + $0x84c] sm:$0xf0]  ;;  %v5951_v30 = vor.u32 %v7050_v23, %v5950_v22  ;;  %3328 = vmatpush.bf16.msra.mxu1 %v5695_v25  ;;  %v6672_v19 = vld [vmem:[%s10784_s0 + $0x24] sm:$0xf] }
  0x58   :  { %v5678_v29 = vld [vmem:[%s10783_s1 + $0x940] sm:$0xf]  ;;  %v6982_v31 = vld [vmem:[%s10783_s1 + $0x94c] sm:$0xf0]  ;;  %v5551_v36 = vor.u32 %v6950_v28, %v5550_v27  ;;  %3342 = vmatpush.bf16.msra.mxu2 %v5823_v26  ;;  %v4464_v22 = vld [vmem:[%s10784_s0 + $0x60] sm:$0xf0] }
  0x59   :  { %v5806_v32 = vld [vmem:[%s10783_s1 + $0xa40] sm:$0xf]  ;;  %v7014_v33 = vld [vmem:[%s10783_s1 + $0xa4c] sm:$0xf0]  ;;  %v5679_v38 = vor.u32 %v6982_v31, %v5678_v29  ;;  %3356 = vmatpush.bf16.msra.mxu3 %v5951_v30  ;;  %v6673_v23 = vld [vmem:[%s10784_s0 + $0x2c] sm:$0xf] }
  0x5a   :  { %v5934_v34 = vld [vmem:[%s10783_s1 + $0xb40] sm:$0xf]  ;;  %v7046_v35 = vld [vmem:[%s10783_s1 + $0xb4c] sm:$0xf0]  ;;  %v5807_v40 = vor.u32 %v7014_v33, %v5806_v32  ;;  %3315 = vmatpush.bf16.msra.mxu0 %v5551_v36  ;;  %v4472_v24 = vld [vmem:[%s10784_s0 + $0x68] sm:$0xf0]  ;;  %v7979_v36 = vor.u32 %v6672_v19, %v4464_v22 }
  0x5b   :  { %v5534_v37 = vld [vmem:[%s10783_s1 + $0x820] sm:$0xf]  ;;  %v6946_v41 = vld [vmem:[%s10783_s1 + $0x82c] sm:$0xf0]  ;;  %v5935_v46 = vor.u32 %v7046_v35, %v5934_v34  ;;  %3329 = vmatpush.bf16.msra.mxu1 %v5679_v38  ;;  %v7977_v35 = vor.u32 %v6681_v18, %v4470_v16 }
  0x5c   :  { %v5662_v42 = vld [vmem:[%s10783_s1 + $0x920] sm:$0xf]  ;;  %v6978_v45 = vld [vmem:[%s10783_s1 + $0x92c] sm:$0xf0]  ;;  %v5535_v54 = vor.u32 %v6946_v41, %v5534_v37  ;;  %3343 = vmatpush.bf16.msra.mxu2 %v5807_v40  ;;  %v7987_v40 = vor.u32 %v6673_v23, %v4472_v24 }
  0x5d   :  { %v5790_v48 = vld [vmem:[%s10783_s1 + $0xa20] sm:$0xf]  ;;  %v7010_v49 = vld [vmem:[%s10783_s1 + $0xa2c] sm:$0xf0]  ;;  %v5663_v60 = vor.u32 %v6978_v45, %v5662_v42  ;;  %3357 = vmatpush.bf16.msra.mxu3 %v5935_v46 }
  0x5e   :  { %v5918_v50 = vld [vmem:[%s10783_s1 + $0xb20] sm:$0xf]  ;;  %v7042_v51 = vld [vmem:[%s10783_s1 + $0xb2c] sm:$0xf0]  ;;  %v5791_v61 = vor.u32 %v7010_v49, %v5790_v48  ;;  %3316 = vmatpush.bf16.msra.mxu0 %v5535_v54 }
  0x5f   :  { %v5518_v52 = vld [vmem:[%s10783_s1 + $0x800] sm:$0xf]  ;;  %v6942_v53 = vld [vmem:[%s10783_s1 + $0x80c] sm:$0xf0]  ;;  %v5919_v2 = vor.u32 %v7042_v51, %v5918_v50  ;;  %3330 = vmatpush.bf16.msra.mxu1 %v5663_v60 }
  0x60   :  { %v5646_v55 = vld [vmem:[%s10783_s1 + $0x900] sm:$0xf]  ;;  %v6974_v56 = vld [vmem:[%s10783_s1 + $0x90c] sm:$0xf0]  ;;  %v5519_v9 = vor.u32 %v6942_v53, %v5518_v52  ;;  %3344 = vmatpush.bf16.msra.mxu2 %v5791_v61 }
  0x61   :  { %v5774_v57 = vld [vmem:[%s10783_s1 + $0xa00] sm:$0xf]  ;;  %v7006_v59 = vld [vmem:[%s10783_s1 + $0xa0c] sm:$0xf0]  ;;  %v5647_v14 = vor.u32 %v6974_v56, %v5646_v55  ;;  %3358 = vmatpush.bf16.msra.mxu3 %v5919_v2 }
  0x62   :  { %v5902_v62 = vld [vmem:[%s10783_s1 + $0xb00] sm:$0xf]  ;;  %v7038_v63 = vld [vmem:[%s10783_s1 + $0xb0c] sm:$0xf0]  ;;  %v5775_v15 = vor.u32 %v7006_v59, %v5774_v57  ;;  %3317 = vmatpush.bf16.msra.mxu0 %v5519_v9 }
  0x63   :  { %v6142_v0 = vld [vmem:[%s10783_s1 + $0xce0] sm:$0xf]  ;;  %v7098_v3 = vld [vmem:[%s10783_s1 + $0xcec] sm:$0xf0]  ;;  %v5903_v20 = vor.u32 %v7038_v63, %v5902_v62  ;;  %3331 = vmatpush.bf16.msra.mxu1 %v5647_v14 }
  0x64   :  { %v6270_v4 = vld [vmem:[%s10783_s1 + $0xde0] sm:$0xf]  ;;  %v7130_v5 = vld [vmem:[%s10783_s1 + $0xdec] sm:$0xf0]  ;;  %v6143_v21 = vor.u32 %v7098_v3, %v6142_v0  ;;  %3345 = vmatpush.bf16.msra.mxu2 %v5775_v15 }
  0x65   :  { %v6398_v6 = vld [vmem:[%s10783_s1 + $0xee0] sm:$0xf]  ;;  %v7162_v7 = vld [vmem:[%s10783_s1 + $0xeec] sm:$0xf0]  ;;  %v6271_v25 = vor.u32 %v7130_v5, %v6270_v4  ;;  %3359 = vmatpush.bf16.msra.mxu3 %v5903_v20 }
  0x66   :  { %v6526_v8 = vld [vmem:[%s10783_s1 + $0xfe0] sm:$0xf]  ;;  %v7194_v11 = vld [vmem:[%s10783_s1 + $0xfec] sm:$0xf0]  ;;  %v6399_v26 = vor.u32 %v7162_v7, %v6398_v6  ;;  %3366 = vmatpush.bf16.msrb.mxu0 %v6143_v21  ;;  %3332 = vmatmul.bf16.vlgmr.msra.gmra.mxu1 %v7979_v36 }
  0x67   :  { %v4462_v12 = vld [vmem:[%s10784_s0 + $0x20] sm:$0xf]  ;;  %v7094_v28 = vld [vmem:[%s10783_s1 + $0xccc] sm:$0xf0]  ;;  %v6527_v30 = vor.u32 %v7194_v11, %v6526_v8  ;;  %3380 = vmatpush.bf16.msrb.mxu1 %v6271_v25  ;;  %3346 = vmatmul.bf16.vlgmr.msra.gmra.mxu2 %v7977_v35 }
  0x68   :  { %v6680_v13 = vld [vmem:[%s10784_s0 + $0x5c] sm:$0xf0]  ;;  %v7126_v32 = vld [vmem:[%s10783_s1 + $0xdcc] sm:$0xf0]  ;;  %3394 = vmatpush.bf16.msrb.mxu2 %v6399_v26  ;;  %3360 = vmatmul.bf16.vlgmr.msra.gmra.mxu3 %v7987_v40 }
  0x69   :  { %v6126_v27 = vld [vmem:[%s10783_s1 + $0xcc0] sm:$0xf]  ;;  %v7966_v31 = vor.u32 %v6680_v13, %v4462_v12  ;;  %v7158_v34 = vld [vmem:[%s10783_s1 + $0xecc] sm:$0xf0]  ;;  %3408 = vmatpush.bf16.msrb.mxu3 %v6527_v30 }
  0x6a   :  { %v6254_v29 = vld [vmem:[%s10783_s1 + $0xdc0] sm:$0xf]  ;;  %v7190_v38 = vld [vmem:[%s10783_s1 + $0xfcc] sm:$0xf0]  ;;  %v6127_v41 = vor.u32 %v7094_v28, %v6126_v27 }
  0x6b   :  { %v6382_v33 = vld [vmem:[%s10783_s1 + $0xec0] sm:$0xf]  ;;  %v6255_v42 = vor.u32 %v7126_v32, %v6254_v29  ;;  %v7090_v48 = vld [vmem:[%s10783_s1 + $0xcac] sm:$0xf0]  ;;  %3318 = vmatmul.bf16.vlgmr.msra.gmra.mxu0 %v7966_v31 }
  0x6c   :  { %v6510_v37 = vld [vmem:[%s10783_s1 + $0xfc0] sm:$0xf]  ;;  %v6383_v45 = vor.u32 %v7158_v34, %v6382_v33  ;;  %v7122_v51 = vld [vmem:[%s10783_s1 + $0xdac] sm:$0xf0]  ;;  %3367 = vmatpush.bf16.msrb.mxu0 %v6127_v41 }
  0x6d   :  { %v6110_v46 = vld [vmem:[%s10783_s1 + $0xca0] sm:$0xf]  ;;  %v6511_v50 = vor.u32 %v7190_v38, %v6510_v37  ;;  %v7154_v53 = vld [vmem:[%s10783_s1 + $0xeac] sm:$0xf0]  ;;  %3381 = vmatpush.bf16.msrb.mxu1 %v6255_v42 }
  0x6e   :  { %v6238_v49 = vld [vmem:[%s10783_s1 + $0xda0] sm:$0xf]  ;;  %v7186_v55 = vld [vmem:[%s10783_s1 + $0xfac] sm:$0xf0]  ;;  %v6111_v56 = vor.u32 %v7090_v48, %v6110_v46  ;;  %3395 = vmatpush.bf16.msrb.mxu2 %v6383_v45 }
  0x6f   :  { %v6366_v52 = vld [vmem:[%s10783_s1 + $0xea0] sm:$0xf]  ;;  %v6239_v57 = vor.u32 %v7122_v51, %v6238_v49  ;;  %v7086_v61 = vld [vmem:[%s10783_s1 + $0xc8c] sm:$0xf0]  ;;  %3409 = vmatpush.bf16.msrb.mxu3 %v6511_v50 }
  0x70   :  { %v6494_v54 = vld [vmem:[%s10783_s1 + $0xfa0] sm:$0xf]  ;;  %v6367_v59 = vor.u32 %v7154_v53, %v6366_v52  ;;  %v7118_v0 = vld [vmem:[%s10783_s1 + $0xd8c] sm:$0xf0]  ;;  %3368 = vmatpush.bf16.msrb.mxu0 %v6111_v56 }
  0x71   :  { %v6094_v60 = vld [vmem:[%s10783_s1 + $0xc80] sm:$0xf]  ;;  %v6495_v63 = vor.u32 %v7186_v55, %v6494_v54  ;;  %v7150_v3 = vld [vmem:[%s10783_s1 + $0xe8c] sm:$0xf0]  ;;  %3382 = vmatpush.bf16.msrb.mxu1 %v6239_v57 }
  0x72   :  { %v6222_v62 = vld [vmem:[%s10783_s1 + $0xd80] sm:$0xf]  ;;  %v7182_v5 = vld [vmem:[%s10783_s1 + $0xf8c] sm:$0xf0]  ;;  %v6095_v6 = vor.u32 %v7086_v61, %v6094_v60  ;;  %3396 = vmatpush.bf16.msrb.mxu2 %v6367_v59 }
  0x73   :  { %v6350_v2 = vld [vmem:[%s10783_s1 + $0xe80] sm:$0xf]  ;;  %v6223_v7 = vor.u32 %v7118_v0, %v6222_v62  ;;  %v7082_v11 = vld [vmem:[%s10783_s1 + $0xc6c] sm:$0xf0]  ;;  %3410 = vmatpush.bf16.msrb.mxu3 %v6495_v63  ;;  %v6712_v0 = vld [vmem:[%s10783_s1 + $0xe4] sm:$0xf] }
  0x74   :  { %v6478_v4 = vld [vmem:[%s10783_s1 + $0xf80] sm:$0xf]  ;;  %v6351_v8 = vor.u32 %v7150_v3, %v6350_v2  ;;  %v7114_v14 = vld [vmem:[%s10783_s1 + $0xd6c] sm:$0xf0]  ;;  %3369 = vmatpush.bf16.msrb.mxu0 %v6095_v6  ;;  %v4608_v3 = vld [vmem:[%s10783_s1 + $0xf0] sm:$0xf0] }
  0x75   :  { %v6078_v9 = vld [vmem:[%s10783_s1 + $0xc60] sm:$0xf]  ;;  %v6479_v13 = vor.u32 %v7182_v5, %v6478_v4  ;;  %v7146_v16 = vld [vmem:[%s10783_s1 + $0xe6c] sm:$0xf0]  ;;  %3383 = vmatpush.bf16.msrb.mxu1 %v6223_v7  ;;  %v6744_v4 = vld [vmem:[%s10783_s1 + $0x1e4] sm:$0xf] }
  0x76   :  { %v6206_v12 = vld [vmem:[%s10783_s1 + $0xd60] sm:$0xf]  ;;  %v7178_v19 = vld [vmem:[%s10783_s1 + $0xf6c] sm:$0xf0]  ;;  %v6079_v20 = vor.u32 %v7082_v11, %v6078_v9  ;;  %3397 = vmatpush.bf16.msrb.mxu2 %v6351_v8  ;;  %v4736_v5 = vld [vmem:[%s10783_s1 + $0x1f0] sm:$0xf0] }
  0x77   :  { %v6334_v15 = vld [vmem:[%s10783_s1 + $0xe60] sm:$0xf]  ;;  %v6207_v21 = vor.u32 %v7114_v14, %v6206_v12  ;;  %v7078_v24 = vld [vmem:[%s10783_s1 + $0xc4c] sm:$0xf0]  ;;  %3411 = vmatpush.bf16.msrb.mxu3 %v6479_v13  ;;  %v6776_v6 = vld [vmem:[%s10783_s1 + $0x2e4] sm:$0xf] }
  0x78   :  { %v6462_v18 = vld [vmem:[%s10783_s1 + $0xf60] sm:$0xf]  ;;  %v6335_v22 = vor.u32 %v7146_v16, %v6334_v15  ;;  %v7110_v27 = vld [vmem:[%s10783_s1 + $0xd4c] sm:$0xf0]  ;;  %3370 = vmatpush.bf16.msrb.mxu0 %v6079_v20  ;;  %v4864_v7 = vld [vmem:[%s10783_s1 + $0x2f0] sm:$0xf0] }
  0x79   :  { %v6062_v23 = vld [vmem:[%s10783_s1 + $0xc40] sm:$0xf]  ;;  %v6463_v26 = vor.u32 %v7178_v19, %v6462_v18  ;;  %v7142_v29 = vld [vmem:[%s10783_s1 + $0xe4c] sm:$0xf0]  ;;  %3384 = vmatpush.bf16.msrb.mxu1 %v6207_v21  ;;  %v6808_v8 = vld [vmem:[%s10783_s1 + $0x3e4] sm:$0xf]  ;;  %v4611_v21 = vor.u32 %v6712_v0, %v4608_v3 }
  0x7a   :  { %v6190_v25 = vld [vmem:[%s10783_s1 + $0xd40] sm:$0xf]  ;;  %v7174_v32 = vld [vmem:[%s10783_s1 + $0xf4c] sm:$0xf0]  ;;  %v6063_v33 = vor.u32 %v7078_v24, %v6062_v23  ;;  %3398 = vmatpush.bf16.msrb.mxu2 %v6335_v22  ;;  %v4992_v11 = vld [vmem:[%s10783_s1 + $0x3f0] sm:$0xf0] }
  0x7b   :  { %v6318_v28 = vld [vmem:[%s10783_s1 + $0xe40] sm:$0xf]  ;;  %v6191_v37 = vor.u32 %v7110_v27, %v6190_v25  ;;  %v7074_v41 = vld [vmem:[%s10783_s1 + $0xc2c] sm:$0xf0]  ;;  %3412 = vmatpush.bf16.msrb.mxu3 %v6463_v26  ;;  %v4486_v16 = vld [vmem:[%s10784_s0 + $0x38] sm:$0xf]  ;;  %v4739_v25 = vor.u32 %v6744_v4, %v4736_v5  ;;  %v4867_v26 = vor.u32 %v6776_v6, %v4864_v7 }
  0x7c   :  { %v6446_v30 = vld [vmem:[%s10783_s1 + $0xf40] sm:$0xf]  ;;  %v6319_v38 = vor.u32 %v7142_v29, %v6318_v28  ;;  %v7106_v45 = vld [vmem:[%s10783_s1 + $0xd2c] sm:$0xf0]  ;;  %3371 = vmatpush.bf16.msrb.mxu0 %v6063_v33  ;;  %v6683_v18 = vld [vmem:[%s10784_s0 + $0x74] sm:$0xf0] }
  0x7d   :  { %v6046_v34 = vld [vmem:[%s10783_s1 + $0xc20] sm:$0xf]  ;;  %v6447_v46 = vor.u32 %v7174_v32, %v6446_v30  ;;  %v7138_v49 = vld [vmem:[%s10783_s1 + $0xe2c] sm:$0xf0]  ;;  %3385 = vmatpush.bf16.msrb.mxu1 %v6191_v37  ;;  %v6674_v19 = vld [vmem:[%s10784_s0 + $0x34] sm:$0xf]  ;;  %v4995_v30 = vor.u32 %v6808_v8, %v4992_v11 }
  0x7e   :  { %v6174_v42 = vld [vmem:[%s10783_s1 + $0xd20] sm:$0xf]  ;;  %v7170_v51 = vld [vmem:[%s10783_s1 + $0xf2c] sm:$0xf0]  ;;  %v6047_v54 = vor.u32 %v7074_v41, %v6046_v34  ;;  %3399 = vmatpush.bf16.msrb.mxu2 %v6319_v38  ;;  %v4480_v22 = vld [vmem:[%s10784_s0 + $0x70] sm:$0xf0]  ;;  %v8205_v38 = vor.u32 %v6683_v18, %v4486_v16 }
  0x7f   :  { %v6302_v48 = vld [vmem:[%s10783_s1 + $0xe20] sm:$0xf]  ;;  %v7070_v53 = vld [vmem:[%s10783_s1 + $0xc0c] sm:$0xf0]  ;;  %v6175_v60 = vor.u32 %v7106_v45, %v6174_v42  ;;  %3413 = vmatpush.bf16.msrb.mxu3 %v6447_v46  ;;  %v6675_v23 = vld [vmem:[%s10784_s0 + $0x3c] sm:$0xf]  ;;  %v8207_v41 = vor.u32 %v6674_v19, %v4480_v22 }
  0x80   :  { %v6430_v50 = vld [vmem:[%s10783_s1 + $0xf20] sm:$0xf]  ;;  %v7102_v56 = vld [vmem:[%s10783_s1 + $0xd0c] sm:$0xf0]  ;;  %v6303_v61 = vor.u32 %v7138_v49, %v6302_v48  ;;  %3372 = vmatpush.bf16.msrb.mxu0 %v6047_v54  ;;  %v4488_v24 = vld [vmem:[%s10784_s0 + $0x78] sm:$0xf0] }
  0x81   :  { %v6030_v52 = vld [vmem:[%s10783_s1 + $0xc00] sm:$0xf]  ;;  %v7134_v59 = vld [vmem:[%s10783_s1 + $0xe0c] sm:$0xf0]  ;;  %v6431_v2 = vor.u32 %v7170_v51, %v6430_v50  ;;  %3386 = vmatpush.bf16.msrb.mxu1 %v6175_v60  ;;  %v6708_v27 = vld [vmem:[%s10783_s1 + $0xc4] sm:$0xf]  ;;  %v8215_v46 = vor.u32 %v6675_v23, %v4488_v24 }
  0x82   :  { %v6158_v55 = vld [vmem:[%s10783_s1 + $0xd00] sm:$0xf]  ;;  %v7166_v63 = vld [vmem:[%s10783_s1 + $0xf0c] sm:$0xf0]  ;;  %v6031_v9 = vor.u32 %v7070_v53, %v6030_v52  ;;  %3400 = vmatpush.bf16.msrb.mxu2 %v6303_v61  ;;  %v4592_v28 = vld [vmem:[%s10783_s1 + $0xd0] sm:$0xf0] }
  0x83   :  { %v6286_v57 = vld [vmem:[%s10783_s1 + $0xe00] sm:$0xf]  ;;  %v4478_v12 = vld [vmem:[%s10784_s0 + $0x30] sm:$0xf]  ;;  %v6159_v14 = vor.u32 %v7102_v56, %v6158_v55  ;;  %3414 = vmatpush.bf16.msrb.mxu3 %v6431_v2  ;;  %v6740_v29 = vld [vmem:[%s10783_s1 + $0x1c4] sm:$0xf]  ;;  %v4595_v48 = vor.u32 %v6708_v27, %v4592_v28 }
  0x84   :  { %v6414_v62 = vld [vmem:[%s10783_s1 + $0xf00] sm:$0xf]  ;;  %v6682_v13 = vld [vmem:[%s10784_s0 + $0x6c] sm:$0xf0]  ;;  %v6287_v15 = vor.u32 %v7134_v59, %v6286_v57  ;;  %3373 = vmatpush.bf16.msrb.mxu0 %v6031_v9  ;;  %v4720_v33 = vld [vmem:[%s10783_s1 + $0x1d0] sm:$0xf0] }
  0x85   :  { %v6415_v20 = vor.u32 %v7166_v63, %v6414_v62  ;;  %v8194_v32 = vor.u32 %v6682_v13, %v4478_v12  ;;  %v6772_v34 = vld [vmem:[%s10783_s1 + $0x2c4] sm:$0xf]  ;;  %v4848_v37 = vld [vmem:[%s10783_s1 + $0x2d0] sm:$0xf0]  ;;  %3387 = vmatpush.bf16.msrb.mxu1 %v6159_v14  ;;  %v4723_v49 = vor.u32 %v6740_v29, %v4720_v33 }
  0x86   :  { %3401 = vmatpush.bf16.msrb.mxu2 %v6287_v15  ;;  %v6804_v42 = vld [vmem:[%s10783_s1 + $0x3c4] sm:$0xf]  ;;  %v4976_v45 = vld [vmem:[%s10783_s1 + $0x3d0] sm:$0xf0]  ;;  %v4851_v50 = vor.u32 %v6772_v34, %v4848_v37 }
  0x87   :  { %3415 = vmatpush.bf16.msrb.mxu3 %v6415_v20  ;;  %v6704_v51 = vld [vmem:[%s10783_s1 + $0xa4] sm:$0xf]  ;;  %v4576_v52 = vld [vmem:[%s10783_s1 + $0xb0] sm:$0xf0]  ;;  %3374 = vmatmul.bf16.vlgmr.msrb.gmra.mxu0 %v8194_v32  ;;  %v4979_v54 = vor.u32 %v6804_v42, %v4976_v45 }
  0x88   :  { %3422 = vmatpush.bf16.msra.mxu0 %v4611_v21  ;;  %v6736_v53 = vld [vmem:[%s10783_s1 + $0x1a4] sm:$0xf]  ;;  %v4704_v55 = vld [vmem:[%s10783_s1 + $0x1b0] sm:$0xf0]  ;;  %3388 = vmatmul.bf16.vlgmr.msrb.gmra.mxu1 %v8207_v41  ;;  %v4579_v61 = vor.u32 %v6704_v51, %v4576_v52 }
  0x89   :  { %3436 = vmatpush.bf16.msra.mxu1 %v4739_v25  ;;  %v6768_v56 = vld [vmem:[%s10783_s1 + $0x2a4] sm:$0xf]  ;;  %v4832_v57 = vld [vmem:[%s10783_s1 + $0x2b0] sm:$0xf0]  ;;  %3402 = vmatmul.bf16.vlgmr.msrb.gmra.mxu2 %v8205_v38  ;;  %v4707_v62 = vor.u32 %v6736_v53, %v4704_v55 }
  0x8a   :  { %3450 = vmatpush.bf16.msra.mxu2 %v4867_v26  ;;  %v6800_v59 = vld [vmem:[%s10783_s1 + $0x3a4] sm:$0xf]  ;;  %v4960_v60 = vld [vmem:[%s10783_s1 + $0x3b0] sm:$0xf0]  ;;  %3416 = vmatmul.bf16.vlgmr.msrb.gmra.mxu3 %v8215_v46  ;;  %v4835_v63 = vor.u32 %v6768_v56, %v4832_v57 }
  0x8b   :  { %3464 = vmatpush.bf16.msra.mxu3 %v4995_v30  ;;  %v6700_v0 = vld [vmem:[%s10783_s1 + $0x84] sm:$0xf]  ;;  %v4560_v2 = vld [vmem:[%s10783_s1 + $0x90] sm:$0xf0]  ;;  %v4963_v4 = vor.u32 %v6800_v59, %v4960_v60 }
  0x8c   :  { %3423 = vmatpush.bf16.msra.mxu0 %v4595_v48  ;;  %v6732_v3 = vld [vmem:[%s10783_s1 + $0x184] sm:$0xf]  ;;  %v4688_v5 = vld [vmem:[%s10783_s1 + $0x190] sm:$0xf0]  ;;  %v4563_v11 = vor.u32 %v6700_v0, %v4560_v2 }
  0x8d   :  { %3437 = vmatpush.bf16.msra.mxu1 %v4723_v49  ;;  %v6764_v6 = vld [vmem:[%s10783_s1 + $0x284] sm:$0xf]  ;;  %v4816_v7 = vld [vmem:[%s10783_s1 + $0x290] sm:$0xf0]  ;;  %v4691_v12 = vor.u32 %v6732_v3, %v4688_v5 }
  0x8e   :  { %3451 = vmatpush.bf16.msra.mxu2 %v4851_v50  ;;  %v6796_v8 = vld [vmem:[%s10783_s1 + $0x384] sm:$0xf]  ;;  %v4944_v9 = vld [vmem:[%s10783_s1 + $0x390] sm:$0xf0]  ;;  %v4819_v13 = vor.u32 %v6764_v6, %v4816_v7 }
  0x8f   :  { %3465 = vmatpush.bf16.msra.mxu3 %v4979_v54  ;;  %v6696_v14 = vld [vmem:[%s10783_s1 + $0x64] sm:$0xf]  ;;  %v4544_v15 = vld [vmem:[%s10783_s1 + $0x70] sm:$0xf0]  ;;  %v4947_v18 = vor.u32 %v6796_v8, %v4944_v9 }
  0x90   :  { %3424 = vmatpush.bf16.msra.mxu0 %v4579_v61  ;;  %v6728_v16 = vld [vmem:[%s10783_s1 + $0x164] sm:$0xf]  ;;  %v4672_v19 = vld [vmem:[%s10783_s1 + $0x170] sm:$0xf0]  ;;  %v4547_v24 = vor.u32 %v6696_v14, %v4544_v15 }
  0x91   :  { %3438 = vmatpush.bf16.msra.mxu1 %v4707_v62  ;;  %v6760_v20 = vld [vmem:[%s10783_s1 + $0x264] sm:$0xf]  ;;  %v4800_v21 = vld [vmem:[%s10783_s1 + $0x270] sm:$0xf0]  ;;  %v4675_v25 = vor.u32 %v6728_v16, %v4672_v19 }
  0x92   :  { %3452 = vmatpush.bf16.msra.mxu2 %v4835_v63  ;;  %v6792_v22 = vld [vmem:[%s10783_s1 + $0x364] sm:$0xf]  ;;  %v4928_v23 = vld [vmem:[%s10783_s1 + $0x370] sm:$0xf0]  ;;  %v4803_v26 = vor.u32 %v6760_v20, %v4800_v21 }
  0x93   :  { %3466 = vmatpush.bf16.msra.mxu3 %v4963_v4  ;;  %v6692_v27 = vld [vmem:[%s10783_s1 + $0x44] sm:$0xf]  ;;  %v4528_v28 = vld [vmem:[%s10783_s1 + $0x50] sm:$0xf0]  ;;  %v4931_v30 = vor.u32 %v6792_v22, %v4928_v23 }
  0x94   :  { %3425 = vmatpush.bf16.msra.mxu0 %v4563_v11  ;;  %v6724_v29 = vld [vmem:[%s10783_s1 + $0x144] sm:$0xf]  ;;  %v4656_v33 = vld [vmem:[%s10783_s1 + $0x150] sm:$0xf0]  ;;  %v4531_v48 = vor.u32 %v6692_v27, %v4528_v28 }
  0x95   :  { %3439 = vmatpush.bf16.msra.mxu1 %v4691_v12  ;;  %v6756_v34 = vld [vmem:[%s10783_s1 + $0x244] sm:$0xf]  ;;  %v4784_v37 = vld [vmem:[%s10783_s1 + $0x250] sm:$0xf0]  ;;  %v4659_v49 = vor.u32 %v6724_v29, %v4656_v33 }
  0x96   :  { %3453 = vmatpush.bf16.msra.mxu2 %v4819_v13  ;;  %v6788_v42 = vld [vmem:[%s10783_s1 + $0x344] sm:$0xf]  ;;  %v4912_v45 = vld [vmem:[%s10783_s1 + $0x350] sm:$0xf0]  ;;  %v4787_v50 = vor.u32 %v6756_v34, %v4784_v37 }
  0x97   :  { %3467 = vmatpush.bf16.msra.mxu3 %v4947_v18  ;;  %v6688_v51 = vld [vmem:[%s10783_s1 + $0x24] sm:$0xf]  ;;  %v4512_v52 = vld [vmem:[%s10783_s1 + $0x30] sm:$0xf0]  ;;  %v4915_v54 = vor.u32 %v6788_v42, %v4912_v45 }
  0x98   :  { %3426 = vmatpush.bf16.msra.mxu0 %v4547_v24  ;;  %v6720_v53 = vld [vmem:[%s10783_s1 + $0x124] sm:$0xf]  ;;  %v4640_v55 = vld [vmem:[%s10783_s1 + $0x130] sm:$0xf0]  ;;  %v4515_v61 = vor.u32 %v6688_v51, %v4512_v52 }
  0x99   :  { %3440 = vmatpush.bf16.msra.mxu1 %v4675_v25  ;;  %v6752_v56 = vld [vmem:[%s10783_s1 + $0x224] sm:$0xf]  ;;  %v4768_v57 = vld [vmem:[%s10783_s1 + $0x230] sm:$0xf0]  ;;  %v4643_v0 = vor.u32 %v6720_v53, %v4640_v55 }
  0x9a   :  { %3454 = vmatpush.bf16.msra.mxu2 %v4803_v26  ;;  %v6784_v59 = vld [vmem:[%s10783_s1 + $0x324] sm:$0xf]  ;;  %v4896_v60 = vld [vmem:[%s10783_s1 + $0x330] sm:$0xf0]  ;;  %v4771_v2 = vor.u32 %v6752_v56, %v4768_v57 }
  0x9b   :  { %3468 = vmatpush.bf16.msra.mxu3 %v4931_v30  ;;  %v6684_v62 = vld [vmem:[%s10783_s1 + $0x4] sm:$0xf]  ;;  %v4496_v63 = vld [vmem:[%s10783_s1 + $0x10] sm:$0xf0]  ;;  %v4899_v6 = vor.u32 %v6784_v59, %v4896_v60 }
  0x9c   :  { %3427 = vmatpush.bf16.msra.mxu0 %v4531_v48  ;;  %v6716_v3 = vld [vmem:[%s10783_s1 + $0x104] sm:$0xf]  ;;  %v4624_v4 = vld [vmem:[%s10783_s1 + $0x110] sm:$0xf0]  ;;  %v4499_v14 = vor.u32 %v6684_v62, %v4496_v63 }
  0x9d   :  { %3441 = vmatpush.bf16.msra.mxu1 %v4659_v49  ;;  %v6748_v5 = vld [vmem:[%s10783_s1 + $0x204] sm:$0xf]  ;;  %v4752_v7 = vld [vmem:[%s10783_s1 + $0x210] sm:$0xf0]  ;;  %v4627_v19 = vor.u32 %v6716_v3, %v4624_v4 }
  0x9e   :  { %3455 = vmatpush.bf16.msra.mxu2 %v4787_v50  ;;  %v6780_v8 = vld [vmem:[%s10783_s1 + $0x304] sm:$0xf]  ;;  %v4880_v9 = vld [vmem:[%s10783_s1 + $0x310] sm:$0xf0]  ;;  %v4755_v20 = vor.u32 %v6748_v5, %v4752_v7 }
  0x9f   :  { %3469 = vmatpush.bf16.msra.mxu3 %v4915_v54  ;;  %v6840_v11 = vld [vmem:[%s10783_s1 + $0x4e4] sm:$0xf]  ;;  %v5120_v12 = vld [vmem:[%s10783_s1 + $0x4f0] sm:$0xf0]  ;;  %v4883_v23 = vor.u32 %v6780_v8, %v4880_v9  ;;  %v8425_v54 = vld [vmem:[%s10785_s2] sm:$0xf] }
  0xa0   :  { %v6872_v13 = vld [vmem:[%s10783_s1 + $0x5e4] sm:$0xf]  ;;  %3428 = vmatpush.bf16.msra.mxu0 %v4515_v61  ;;  %v5248_v15 = vld [vmem:[%s10783_s1 + $0x5f0] sm:$0xf0]  ;;  %v5123_v24 = vor.u32 %v6840_v11, %v5120_v12  ;;  %v550_v63 = vperm.slane %v8425_v54, 0 }
  0xa1   :  { %v6904_v16 = vld [vmem:[%s10783_s1 + $0x6e4] sm:$0xf]  ;;  %v5376_v18 = vld [vmem:[%s10783_s1 + $0x6f0] sm:$0xf0]  ;;  %3442 = vmatpush.bf16.msra.mxu1 %v4643_v0  ;;  %v5251_v25 = vor.u32 %v6872_v13, %v5248_v15  ;;  %v7121_v54 = vld [vmem:[%s10783_s1 + $0xdac] sm:$0xf] }
  0xa2   :  { %3456 = vmatpush.bf16.msra.mxu2 %v4771_v2  ;;  %v6936_v21 = vld [vmem:[%s10783_s1 + $0x7e4] sm:$0xf]  ;;  %v5504_v22 = vld [vmem:[%s10783_s1 + $0x7f0] sm:$0xf0]  ;;  %v5379_v26 = vor.u32 %v6904_v16, %v5376_v18 }
  0xa3   :  { %3470 = vmatpush.bf16.msra.mxu3 %v4899_v6  ;;  %v6836_v27 = vld [vmem:[%s10783_s1 + $0x4c4] sm:$0xf]  ;;  %v5104_v28 = vld [vmem:[%s10783_s1 + $0x4d0] sm:$0xf0]  ;;  %v5507_v30 = vor.u32 %v6936_v21, %v5504_v22 }
  0xa4   :  { %v6868_v29 = vld [vmem:[%s10783_s1 + $0x5c4] sm:$0xf]  ;;  %3429 = vmatpush.bf16.msra.mxu0 %v4499_v14  ;;  %v5232_v33 = vld [vmem:[%s10783_s1 + $0x5d0] sm:$0xf0]  ;;  %v5107_v48 = vor.u32 %v6836_v27, %v5104_v28  ;;  %v3221_v28 = vpop.f32.mrf.mxu1 }
  0xa5   :  { %v6900_v34 = vld [vmem:[%s10783_s1 + $0x6c4] sm:$0xf]  ;;  %v5360_v37 = vld [vmem:[%s10783_s1 + $0x6d0] sm:$0xf0]  ;;  %3443 = vmatpush.bf16.msra.mxu1 %v4627_v19  ;;  %v5235_v50 = vor.u32 %v6868_v29, %v5232_v33 }
  0xa6   :  { %3457 = vmatpush.bf16.msra.mxu2 %v4755_v20  ;;  %v6932_v42 = vld [vmem:[%s10783_s1 + $0x7c4] sm:$0xf]  ;;  %v5488_v45 = vld [vmem:[%s10783_s1 + $0x7d0] sm:$0xf0]  ;;  %v5363_v51 = vor.u32 %v6900_v34, %v5360_v37 }
  0xa7   :  { %3471 = vmatpush.bf16.msra.mxu3 %v4883_v23  ;;  %v6832_v49 = vld [vmem:[%s10783_s1 + $0x4a4] sm:$0xf]  ;;  %v5088_v52 = vld [vmem:[%s10783_s1 + $0x4b0] sm:$0xf0]  ;;  %v5491_v55 = vor.u32 %v6932_v42, %v5488_v45  ;;  %3430 = vmatmul.bf16.vlgmr.msra.gmra.mxu0 %v7516_v58 }
  0xa8   :  { %3478 = vmatpush.bf16.msrb.mxu0 %v5123_v24  ;;  %v6864_v53 = vld [vmem:[%s10783_s1 + $0x5a4] sm:$0xf]  ;;  %v5216_v56 = vld [vmem:[%s10783_s1 + $0x5b0] sm:$0xf0]  ;;  %3444 = vmatmul.bf16.vlgmr.msra.gmra.mxu1 %v7552_v10  ;;  %v5091_v62 = vor.u32 %v6832_v49, %v5088_v52  ;;  %v3235_v52 = vpop.f32.mrf.mxu2 }
  0xa9   :  { %3492 = vmatpush.bf16.msrb.mxu1 %v5251_v25  ;;  %v6896_v57 = vld [vmem:[%s10783_s1 + $0x6a4] sm:$0xf]  ;;  %v5344_v59 = vld [vmem:[%s10783_s1 + $0x6b0] sm:$0xf0]  ;;  %3458 = vmatmul.bf16.vlgmr.msra.gmra.mxu2 %v7530_v1  ;;  %v5219_v0 = vor.u32 %v6864_v53, %v5216_v56 }
  0xaa   :  { %3506 = vmatpush.bf16.msrb.mxu2 %v5379_v26  ;;  %v6928_v60 = vld [vmem:[%s10783_s1 + $0x7a4] sm:$0xf]  ;;  %v5472_v61 = vld [vmem:[%s10783_s1 + $0x7b0] sm:$0xf0]  ;;  %3472 = vmatmul.bf16.vlgmr.msra.gmra.mxu3 %v7566_v17  ;;  %v5347_v2 = vor.u32 %v6896_v57, %v5344_v59  ;;  %v3207_v13 = vpop.f32.mrf.mxu0 }
  0xab   :  { %3520 = vmatpush.bf16.msrb.mxu3 %v5507_v30  ;;  %v6828_v3 = vld [vmem:[%s10783_s1 + $0x484] sm:$0xf]  ;;  %v5072_v4 = vld [vmem:[%s10783_s1 + $0x490] sm:$0xf0]  ;;  %v5475_v6 = vor.u32 %v6928_v60, %v5472_v61  ;;  %v3208_v15 = vadd.f32 %v3207_v13, %v550_v63 }
  0xac   :  { %3479 = vmatpush.bf16.msrb.mxu0 %v5107_v48  ;;  %v6860_v5 = vld [vmem:[%s10783_s1 + $0x584] sm:$0xf]  ;;  %v5200_v7 = vld [vmem:[%s10783_s1 + $0x590] sm:$0xf0]  ;;  %v5075_v14 = vor.u32 %v6828_v3, %v5072_v4 }
  0xad   :  { %3493 = vmatpush.bf16.msrb.mxu1 %v5235_v50  ;;  %v6892_v8 = vld [vmem:[%s10783_s1 + $0x684] sm:$0xf]  ;;  %v5328_v9 = vld [vmem:[%s10783_s1 + $0x690] sm:$0xf0]  ;;  %v5203_v16 = vor.u32 %v6860_v5, %v5200_v7  ;;  %v3222_v30 = vadd.f32 %v3221_v28, %v3208_v15 }
  0xae   :  { %3507 = vmatpush.bf16.msrb.mxu2 %v5363_v51  ;;  %v6924_v11 = vld [vmem:[%s10783_s1 + $0x784] sm:$0xf]  ;;  %v5456_v12 = vld [vmem:[%s10783_s1 + $0x790] sm:$0xf0]  ;;  %v5331_v18 = vor.u32 %v6892_v8, %v5328_v9 }
  0xaf   :  { %3521 = vmatpush.bf16.msrb.mxu3 %v5491_v55  ;;  %v6824_v19 = vld [vmem:[%s10783_s1 + $0x464] sm:$0xf]  ;;  %v5056_v20 = vld [vmem:[%s10783_s1 + $0x470] sm:$0xf0]  ;;  %v5459_v22 = vor.u32 %v6924_v11, %v5456_v12  ;;  %v3236_v56 = vadd.f32 %v3235_v52, %v3222_v30 }
  0xb0   :  { %3480 = vmatpush.bf16.msrb.mxu0 %v5091_v62  ;;  %v6856_v21 = vld [vmem:[%s10783_s1 + $0x564] sm:$0xf]  ;;  %v5184_v23 = vld [vmem:[%s10783_s1 + $0x570] sm:$0xf0]  ;;  %v5059_v29 = vor.u32 %v6824_v19, %v5056_v20 }
  0xb1   :  { %3494 = vmatpush.bf16.msrb.mxu1 %v5219_v0  ;;  %v6888_v24 = vld [vmem:[%s10783_s1 + $0x664] sm:$0xf]  ;;  %v5312_v25 = vld [vmem:[%s10783_s1 + $0x670] sm:$0xf0]  ;;  %v5187_v33 = vor.u32 %v6856_v21, %v5184_v23 }
  0xb2   :  { %3508 = vmatpush.bf16.msrb.mxu2 %v5347_v2  ;;  %v6920_v26 = vld [vmem:[%s10783_s1 + $0x764] sm:$0xf]  ;;  %v5440_v27 = vld [vmem:[%s10783_s1 + $0x770] sm:$0xf0]  ;;  %v5315_v34 = vor.u32 %v6888_v24, %v5312_v25 }
  0xb3   :  { %3522 = vmatpush.bf16.msrb.mxu3 %v5475_v6  ;;  %v6820_v37 = vld [vmem:[%s10783_s1 + $0x444] sm:$0xf]  ;;  %v5040_v42 = vld [vmem:[%s10783_s1 + $0x450] sm:$0xf0]  ;;  %v5443_v48 = vor.u32 %v6920_v26, %v5440_v27  ;;  %v3249_v6 = vpop.f32.mrf.mxu3 }
  0xb4   :  { %3481 = vmatpush.bf16.msrb.mxu0 %v5075_v14  ;;  %v6852_v45 = vld [vmem:[%s10783_s1 + $0x544] sm:$0xf]  ;;  %v5168_v49 = vld [vmem:[%s10783_s1 + $0x550] sm:$0xf0]  ;;  %v5043_v57 = vor.u32 %v6820_v37, %v5040_v42  ;;  %v8545_v9 = vadd.f32 %v3249_v6, %v3236_v56 }
  0xb5   :  { %3495 = vmatpush.bf16.msrb.mxu1 %v5203_v16  ;;  %v6884_v50 = vld [vmem:[%s10783_s1 + $0x644] sm:$0xf]  ;;  %v5296_v51 = vld [vmem:[%s10783_s1 + $0x650] sm:$0xf0]  ;;  %v5171_v59 = vor.u32 %v6852_v45, %v5168_v49 }
  0xb6   :  { %3509 = vmatpush.bf16.msrb.mxu2 %v5331_v18  ;;  %v6916_v53 = vld [vmem:[%s10783_s1 + $0x744] sm:$0xf]  ;;  %v5424_v55 = vld [vmem:[%s10783_s1 + $0x750] sm:$0xf0]  ;;  %v5299_v60 = vor.u32 %v6884_v50, %v5296_v51  ;;  %v8595_v51 = vpop.f32.mrf.mxu0 }
  0xb7   :  { %3523 = vmatpush.bf16.msrb.mxu3 %v5459_v22  ;;  %v6816_v61 = vld [vmem:[%s10783_s1 + $0x424] sm:$0xf]  ;;  %v5024_v62 = vld [vmem:[%s10783_s1 + $0x430] sm:$0xf0]  ;;  %v5427_v2 = vor.u32 %v6916_v53, %v5424_v55 }
  0xb8   :  { %3482 = vmatpush.bf16.msrb.mxu0 %v5059_v29  ;;  %v6848_v0 = vld [vmem:[%s10783_s1 + $0x524] sm:$0xf]  ;;  %v5152_v3 = vld [vmem:[%s10783_s1 + $0x530] sm:$0xf0]  ;;  %v5027_v11 = vor.u32 %v6816_v61, %v5024_v62 }
  0xb9   :  { %3496 = vmatpush.bf16.msrb.mxu1 %v5187_v33  ;;  %v6880_v4 = vld [vmem:[%s10783_s1 + $0x624] sm:$0xf]  ;;  %v5280_v5 = vld [vmem:[%s10783_s1 + $0x630] sm:$0xf0]  ;;  %v5155_v14 = vor.u32 %v6848_v0, %v5152_v3  ;;  %v8621_v0 = vpop.f32.mrf.mxu1 }
  0xba   :  { %3510 = vmatpush.bf16.msrb.mxu2 %v5315_v34  ;;  %v6912_v7 = vld [vmem:[%s10783_s1 + $0x724] sm:$0xf]  ;;  %v5408_v8 = vld [vmem:[%s10783_s1 + $0x730] sm:$0xf0]  ;;  %v5283_v15 = vor.u32 %v6880_v4, %v5280_v5 }
  0xbb   :  { %3524 = vmatpush.bf16.msrb.mxu3 %v5443_v48  ;;  %v6812_v12 = vld [vmem:[%s10783_s1 + $0x404] sm:$0xf]  ;;  %v5008_v13 = vld [vmem:[%s10783_s1 + $0x410] sm:$0xf0]  ;;  %v5411_v20 = vor.u32 %v6912_v7, %v5408_v8 }
  0xbc   :  { %3483 = vmatpush.bf16.msrb.mxu0 %v5043_v57  ;;  %v6844_v16 = vld [vmem:[%s10783_s1 + $0x504] sm:$0xf]  ;;  %v5136_v18 = vld [vmem:[%s10783_s1 + $0x510] sm:$0xf0]  ;;  %v5011_v27 = vor.u32 %v6812_v12, %v5008_v13 }
  0xbd   :  { %3497 = vmatpush.bf16.msrb.mxu1 %v5171_v59  ;;  %v6876_v19 = vld [vmem:[%s10783_s1 + $0x604] sm:$0xf]  ;;  %v5264_v21 = vld [vmem:[%s10783_s1 + $0x610] sm:$0xf0]  ;;  %v5139_v33 = vor.u32 %v6844_v16, %v5136_v18  ;;  %v8651_v18 = vpop.f32.mrf.mxu2 }
  0xbe   :  { %3511 = vmatpush.bf16.msrb.mxu2 %v5299_v60  ;;  %v6908_v22 = vld [vmem:[%s10783_s1 + $0x704] sm:$0xf]  ;;  %v5392_v23 = vld [vmem:[%s10783_s1 + $0x710] sm:$0xf0]  ;;  %v5267_v34 = vor.u32 %v6876_v19, %v5264_v21 }
  0xbf   :  { %3525 = vmatpush.bf16.msrb.mxu3 %v5427_v2  ;;  %v6968_v24 = vld [vmem:[%s10783_s1 + $0x8e4] sm:$0xf]  ;;  %v5632_v25 = vld [vmem:[%s10783_s1 + $0x8f0] sm:$0xf0]  ;;  %v5395_v45 = vor.u32 %v6908_v22, %v5392_v23 }
  0xc0   :  { %v7000_v26 = vld [vmem:[%s10783_s1 + $0x9e4] sm:$0xf]  ;;  %3484 = vmatpush.bf16.msrb.mxu0 %v5027_v11  ;;  %v5760_v28 = vld [vmem:[%s10783_s1 + $0x9f0] sm:$0xf0]  ;;  %v5635_v48 = vor.u32 %v6968_v24, %v5632_v25  ;;  %v8662_v25 = vpop.f32.mrf.mxu3 }
  0xc1   :  { %v7032_v29 = vld [vmem:[%s10783_s1 + $0xae4] sm:$0xf]  ;;  %v5888_v30 = vld [vmem:[%s10783_s1 + $0xaf0] sm:$0xf0]  ;;  %3498 = vmatpush.bf16.msrb.mxu1 %v5155_v14  ;;  %v5763_v49 = vor.u32 %v7000_v26, %v5760_v28 }
  0xc2   :  { %3512 = vmatpush.bf16.msrb.mxu2 %v5283_v15  ;;  %v7064_v37 = vld [vmem:[%s10783_s1 + $0xbe4] sm:$0xf]  ;;  %v6016_v42 = vld [vmem:[%s10783_s1 + $0xbf0] sm:$0xf0]  ;;  %v5891_v50 = vor.u32 %v7032_v29, %v5888_v30 }
  0xc3   :  { %3526 = vmatpush.bf16.msrb.mxu3 %v5411_v20  ;;  %v6964_v52 = vld [vmem:[%s10783_s1 + $0x8c4] sm:$0xf]  ;;  %v5616_v53 = vld [vmem:[%s10783_s1 + $0x8d0] sm:$0xf0]  ;;  %v6019_v56 = vor.u32 %v7064_v37, %v6016_v42 }
  0xc4   :  { %v6996_v55 = vld [vmem:[%s10783_s1 + $0x9c4] sm:$0xf]  ;;  %3485 = vmatpush.bf16.msrb.mxu0 %v5011_v27  ;;  %v5744_v57 = vld [vmem:[%s10783_s1 + $0x9d0] sm:$0xf0]  ;;  %v5619_v2 = vor.u32 %v6964_v52, %v5616_v53 }
  0xc5   :  { %v7028_v59 = vld [vmem:[%s10783_s1 + $0xac4] sm:$0xf]  ;;  %v5872_v60 = vld [vmem:[%s10783_s1 + $0xad0] sm:$0xf0]  ;;  %3499 = vmatpush.bf16.msrb.mxu1 %v5139_v33  ;;  %v5747_v3 = vor.u32 %v6996_v55, %v5744_v57 }
  0xc6   :  { %3513 = vmatpush.bf16.msrb.mxu2 %v5267_v34  ;;  %v7060_v61 = vld [vmem:[%s10783_s1 + $0xbc4] sm:$0xf]  ;;  %v6000_v62 = vld [vmem:[%s10783_s1 + $0xbd0] sm:$0xf0]  ;;  %v5875_v4 = vor.u32 %v7028_v59, %v5872_v60  ;;  %v3263_v29 = vpop.f32.mrf.mxu0 }
  0xc7   :  { %3527 = vmatpush.bf16.msrb.mxu3 %v5395_v45  ;;  %v6960_v5 = vld [vmem:[%s10783_s1 + $0x8a4] sm:$0xf]  ;;  %v5600_v6 = vld [vmem:[%s10783_s1 + $0x8b0] sm:$0xf0]  ;;  %3486 = vmatmul.bf16.vlgmr.msrb.gmra.mxu0 %v7738_v39  ;;  %v6003_v8 = vor.u32 %v7060_v61, %v6000_v62  ;;  %v3264_v34 = vadd.f32 %v3263_v29, %v8545_v9 }
  0xc8   :  { %3534 = vmatpush.bf16.msra.mxu0 %v5635_v48  ;;  %v6992_v7 = vld [vmem:[%s10783_s1 + $0x9a4] sm:$0xf]  ;;  %v5728_v11 = vld [vmem:[%s10783_s1 + $0x9b0] sm:$0xf0]  ;;  %3500 = vmatmul.bf16.vlgmr.msrb.gmra.mxu1 %v7751_v44  ;;  %v5603_v16 = vor.u32 %v6960_v5, %v5600_v6  ;;  %v3277_v48 = vpop.f32.mrf.mxu1 }
  0xc9   :  { %3548 = vmatpush.bf16.msra.mxu1 %v5763_v49  ;;  %v7024_v12 = vld [vmem:[%s10783_s1 + $0xaa4] sm:$0xf]  ;;  %v5856_v13 = vld [vmem:[%s10783_s1 + $0xab0] sm:$0xf0]  ;;  %3514 = vmatmul.bf16.vlgmr.msrb.gmra.mxu2 %v7749_v43  ;;  %v5731_v19 = vor.u32 %v6992_v7, %v5728_v11  ;;  %v3278_v53 = vadd.f32 %v3277_v48, %v3264_v34 }
  0xca   :  { %3562 = vmatpush.bf16.msra.mxu2 %v5891_v50  ;;  %v7056_v14 = vld [vmem:[%s10783_s1 + $0xba4] sm:$0xf]  ;;  %v5984_v15 = vld [vmem:[%s10783_s1 + $0xbb0] sm:$0xf0]  ;;  %3528 = vmatmul.bf16.vlgmr.msrb.gmra.mxu3 %v7759_v47  ;;  %v5859_v20 = vor.u32 %v7024_v12, %v5856_v13  ;;  %v3291_v7 = vpop.f32.mrf.mxu2 }
  0xcb   :  { %3576 = vmatpush.bf16.msra.mxu3 %v6019_v56  ;;  %v6956_v21 = vld [vmem:[%s10783_s1 + $0x884] sm:$0xf]  ;;  %v5584_v22 = vld [vmem:[%s10783_s1 + $0x890] sm:$0xf0]  ;;  %v5987_v24 = vor.u32 %v7056_v14, %v5984_v15  ;;  %v3292_v13 = vadd.f32 %v3291_v7, %v3278_v53 }
  0xcc   :  { %3535 = vmatpush.bf16.msra.mxu0 %v5619_v2  ;;  %v6988_v23 = vld [vmem:[%s10783_s1 + $0x984] sm:$0xf]  ;;  %v5712_v26 = vld [vmem:[%s10783_s1 + $0x990] sm:$0xf0]  ;;  %v5587_v37 = vor.u32 %v6956_v21, %v5584_v22 }
  0xcd   :  { %3549 = vmatpush.bf16.msra.mxu1 %v5747_v3  ;;  %v7020_v27 = vld [vmem:[%s10783_s1 + $0xa84] sm:$0xf]  ;;  %v5840_v28 = vld [vmem:[%s10783_s1 + $0xa90] sm:$0xf0]  ;;  %v5715_v42 = vor.u32 %v6988_v23, %v5712_v26 }
  0xce   :  { %3563 = vmatpush.bf16.msra.mxu2 %v5875_v4  ;;  %v7052_v30 = vld [vmem:[%s10783_s1 + $0xb84] sm:$0xf]  ;;  %v5968_v33 = vld [vmem:[%s10783_s1 + $0xb90] sm:$0xf0]  ;;  %v5843_v45 = vor.u32 %v7020_v27, %v5840_v28 }
  0xcf   :  { %3577 = vmatpush.bf16.msra.mxu3 %v6003_v8  ;;  %v6952_v49 = vld [vmem:[%s10783_s1 + $0x864] sm:$0xf]  ;;  %v5568_v50 = vld [vmem:[%s10783_s1 + $0x870] sm:$0xf0]  ;;  %v5971_v9 = vor.u32 %v7052_v30, %v5968_v33 }
  0xd0   :  { %3536 = vmatpush.bf16.msra.mxu0 %v5603_v16  ;;  %v6984_v52 = vld [vmem:[%s10783_s1 + $0x964] sm:$0xf]  ;;  %v5696_v55 = vld [vmem:[%s10783_s1 + $0x970] sm:$0xf0]  ;;  %v5571_v61 = vor.u32 %v6952_v49, %v5568_v50  ;;  %v3305_v16 = vpop.f32.mrf.mxu3 }
  0xd1   :  { %3550 = vmatpush.bf16.msra.mxu1 %v5731_v19  ;;  %v7016_v56 = vld [vmem:[%s10783_s1 + $0xa64] sm:$0xf]  ;;  %v5824_v57 = vld [vmem:[%s10783_s1 + $0xa70] sm:$0xf0]  ;;  %v5699_v62 = vor.u32 %v6984_v52, %v5696_v55 }
  0xd2   :  { %3564 = vmatpush.bf16.msra.mxu2 %v5859_v20  ;;  %v7048_v59 = vld [vmem:[%s10783_s1 + $0xb64] sm:$0xf]  ;;  %v5952_v60 = vld [vmem:[%s10783_s1 + $0xb70] sm:$0xf0]  ;;  %v5827_v2 = vor.u32 %v7016_v56, %v5824_v57  ;;  %v8728_v20 = vadd.f32 %v3305_v16, %v3292_v13 }
  0xd3   :  { %3578 = vmatpush.bf16.msra.mxu3 %v5987_v24  ;;  %v6948_v3 = vld [vmem:[%s10783_s1 + $0x844] sm:$0xf]  ;;  %v5552_v4 = vld [vmem:[%s10783_s1 + $0x850] sm:$0xf0]  ;;  %v5955_v6 = vor.u32 %v7048_v59, %v5952_v60 }
  0xd4   :  { %3537 = vmatpush.bf16.msra.mxu0 %v5587_v37  ;;  %v6980_v5 = vld [vmem:[%s10783_s1 + $0x944] sm:$0xf]  ;;  %v5680_v8 = vld [vmem:[%s10783_s1 + $0x950] sm:$0xf0]  ;;  %v5555_v19 = vor.u32 %v6948_v3, %v5552_v4 }
  0xd5   :  { %3551 = vmatpush.bf16.msra.mxu1 %v5715_v42  ;;  %v7012_v11 = vld [vmem:[%s10783_s1 + $0xa44] sm:$0xf]  ;;  %v5808_v12 = vld [vmem:[%s10783_s1 + $0xa50] sm:$0xf0]  ;;  %v5683_v21 = vor.u32 %v6980_v5, %v5680_v8 }
  0xd6   :  { %3565 = vmatpush.bf16.msra.mxu2 %v5843_v45  ;;  %v7044_v14 = vld [vmem:[%s10783_s1 + $0xb44] sm:$0xf]  ;;  %v5936_v15 = vld [vmem:[%s10783_s1 + $0xb50] sm:$0xf0]  ;;  %v5811_v22 = vor.u32 %v7012_v11, %v5808_v12 }
  0xd7   :  { %3579 = vmatpush.bf16.msra.mxu3 %v5971_v9  ;;  %v6944_v23 = vld [vmem:[%s10783_s1 + $0x824] sm:$0xf]  ;;  %v5536_v24 = vld [vmem:[%s10783_s1 + $0x830] sm:$0xf0]  ;;  %v5939_v27 = vor.u32 %v7044_v14, %v5936_v15 }
  0xd8   :  { %3538 = vmatpush.bf16.msra.mxu0 %v5571_v61  ;;  %v6976_v26 = vld [vmem:[%s10783_s1 + $0x924] sm:$0xf]  ;;  %v5664_v28 = vld [vmem:[%s10783_s1 + $0x930] sm:$0xf0]  ;;  %v5539_v37 = vor.u32 %v6944_v23, %v5536_v24 }
  0xd9   :  { %3552 = vmatpush.bf16.msra.mxu1 %v5699_v62  ;;  %v7008_v29 = vld [vmem:[%s10783_s1 + $0xa24] sm:$0xf]  ;;  %v5792_v30 = vld [vmem:[%s10783_s1 + $0xa30] sm:$0xf0]  ;;  %v5667_v48 = vor.u32 %v6976_v26, %v5664_v28  ;;  %v8820_v26 = vpop.f32.mrf.mxu0 }
  0xda   :  { %3566 = vmatpush.bf16.msra.mxu2 %v5827_v2  ;;  %v7040_v33 = vld [vmem:[%s10783_s1 + $0xb24] sm:$0xf]  ;;  %v5920_v34 = vld [vmem:[%s10783_s1 + $0xb30] sm:$0xf0]  ;;  %v5795_v49 = vor.u32 %v7008_v29, %v5792_v30  ;;  %v8828_v29 = vpop.f32.mrf.mxu1 }
  0xdb   :  { %3580 = vmatpush.bf16.msra.mxu3 %v5955_v6  ;;  %v6940_v42 = vld [vmem:[%s10783_s1 + $0x804] sm:$0xf]  ;;  %v5520_v45 = vld [vmem:[%s10783_s1 + $0x810] sm:$0xf0]  ;;  %v5923_v53 = vor.u32 %v7040_v33, %v5920_v34 }
  0xdc   :  { %3539 = vmatpush.bf16.msra.mxu0 %v5555_v19  ;;  %v6972_v50 = vld [vmem:[%s10783_s1 + $0x904] sm:$0xf]  ;;  %v5648_v52 = vld [vmem:[%s10783_s1 + $0x910] sm:$0xf0]  ;;  %v5523_v62 = vor.u32 %v6940_v42, %v5520_v45 }
  0xdd   :  { %3553 = vmatpush.bf16.msra.mxu1 %v5683_v21  ;;  %v7004_v9 = vld [vmem:[%s10783_s1 + $0xa04] sm:$0xf]  ;;  %v5776_v55 = vld [vmem:[%s10783_s1 + $0xa10] sm:$0xf0]  ;;  %v5651_v5 = vor.u32 %v6972_v50, %v5648_v52 }
  0xde   :  { %3567 = vmatpush.bf16.msra.mxu2 %v5811_v22  ;;  %v7036_v56 = vld [vmem:[%s10783_s1 + $0xb04] sm:$0xf]  ;;  %v5904_v57 = vld [vmem:[%s10783_s1 + $0xb10] sm:$0xf0]  ;;  %v5779_v6 = vor.u32 %v7004_v9, %v5776_v55 }
  0xdf   :  { %3581 = vmatpush.bf16.msra.mxu3 %v5939_v27  ;;  %v7096_v59 = vld [vmem:[%s10783_s1 + $0xce4] sm:$0xf]  ;;  %v6144_v60 = vld [vmem:[%s10783_s1 + $0xcf0] sm:$0xf0]  ;;  %v5907_v11 = vor.u32 %v7036_v56, %v5904_v57 }
  0xe0   :  { %v7128_v61 = vld [vmem:[%s10783_s1 + $0xde4] sm:$0xf]  ;;  %3540 = vmatpush.bf16.msra.mxu0 %v5539_v37  ;;  %v6272_v2 = vld [vmem:[%s10783_s1 + $0xdf0] sm:$0xf0]  ;;  %v6147_v12 = vor.u32 %v7096_v59, %v6144_v60 }
  0xe1   :  { %v7160_v3 = vld [vmem:[%s10783_s1 + $0xee4] sm:$0xf]  ;;  %v6400_v4 = vld [vmem:[%s10783_s1 + $0xef0] sm:$0xf0]  ;;  %3554 = vmatpush.bf16.msra.mxu1 %v5667_v48  ;;  %v6275_v13 = vor.u32 %v7128_v61, %v6272_v2 }
  0xe2   :  { %3568 = vmatpush.bf16.msra.mxu2 %v5795_v49  ;;  %v7192_v7 = vld [vmem:[%s10783_s1 + $0xfe4] sm:$0xf]  ;;  %v6528_v8 = vld [vmem:[%s10783_s1 + $0xff0] sm:$0xf0]  ;;  %v6403_v14 = vor.u32 %v7160_v3, %v6400_v4 }
  0xe3   :  { %3582 = vmatpush.bf16.msra.mxu3 %v5923_v53  ;;  %v7092_v15 = vld [vmem:[%s10783_s1 + $0xcc4] sm:$0xf]  ;;  %v6128_v16 = vld [vmem:[%s10783_s1 + $0xcd0] sm:$0xf0]  ;;  %v6531_v21 = vor.u32 %v7192_v7, %v6528_v8 }
  0xe4   :  { %v7124_v19 = vld [vmem:[%s10783_s1 + $0xdc4] sm:$0xf]  ;;  %3541 = vmatpush.bf16.msra.mxu0 %v5523_v62  ;;  %v6256_v22 = vld [vmem:[%s10783_s1 + $0xdd0] sm:$0xf0]  ;;  %v6131_v30 = vor.u32 %v7092_v15, %v6128_v16  ;;  %v8867_v62 = vpop.f32.mrf.mxu2 }
  0xe5   :  { %v7156_v23 = vld [vmem:[%s10783_s1 + $0xec4] sm:$0xf]  ;;  %v6384_v24 = vld [vmem:[%s10783_s1 + $0xed0] sm:$0xf0]  ;;  %3555 = vmatpush.bf16.msra.mxu1 %v5651_v5  ;;  %v6259_v33 = vor.u32 %v7124_v19, %v6256_v22 }
  0xe6   :  { %3569 = vmatpush.bf16.msra.mxu2 %v5779_v6  ;;  %v7188_v27 = vld [vmem:[%s10783_s1 + $0xfc4] sm:$0xf]  ;;  %v6512_v28 = vld [vmem:[%s10783_s1 + $0xfd0] sm:$0xf0]  ;;  %v6387_v34 = vor.u32 %v7156_v23, %v6384_v24  ;;  %v8878_v6 = vpop.f32.mrf.mxu3 }
  0xe7   :  { %3583 = vmatpush.bf16.msra.mxu3 %v5907_v11  ;;  %v7088_v37 = vld [vmem:[%s10783_s1 + $0xca4] sm:$0xf]  ;;  %v6112_v42 = vld [vmem:[%s10783_s1 + $0xcb0] sm:$0xf0]  ;;  %3542 = vmatmul.bf16.vlgmr.msra.gmra.mxu0 %v7966_v31  ;;  %v6515_v48 = vor.u32 %v7188_v27, %v6512_v28 }
  0xe8   :  { %3590 = vmatpush.bf16.msrb.mxu0 %v6147_v12  ;;  %v7120_v45 = vld [vmem:[%s10783_s1 + $0xda4] sm:$0xf]  ;;  %v6240_v49 = vld [vmem:[%s10783_s1 + $0xdb0] sm:$0xf0]  ;;  %3556 = vmatmul.bf16.vlgmr.msra.gmra.mxu1 %v7979_v36  ;;  %v6115_v55 = vor.u32 %v7088_v37, %v6112_v42  ;;  %v3319_v7 = vpop.f32.mrf.mxu0 }
  0xe9   :  { %3604 = vmatpush.bf16.msrb.mxu1 %v6275_v13  ;;  %v7152_v50 = vld [vmem:[%s10783_s1 + $0xea4] sm:$0xf]  ;;  %v6368_v52 = vld [vmem:[%s10783_s1 + $0xeb0] sm:$0xf0]  ;;  %3570 = vmatmul.bf16.vlgmr.msra.gmra.mxu2 %v7977_v35  ;;  %v6243_v56 = vor.u32 %v7120_v45, %v6240_v49  ;;  %v3320_v12 = vadd.f32 %v3319_v7, %v8728_v20 }
  0xea   :  { %3618 = vmatpush.bf16.msrb.mxu2 %v6403_v14  ;;  %v7184_v9 = vld [vmem:[%s10783_s1 + $0xfa4] sm:$0xf]  ;;  %v6496_v53 = vld [vmem:[%s10783_s1 + $0xfb0] sm:$0xf0]  ;;  %3584 = vmatmul.bf16.vlgmr.msra.gmra.mxu3 %v7987_v40  ;;  %v6371_v57 = vor.u32 %v7152_v50, %v6368_v52  ;;  %v3333_v14 = vpop.f32.mrf.mxu1 }
  0xeb   :  { %3632 = vmatpush.bf16.msrb.mxu3 %v6531_v21  ;;  %v7084_v59 = vld [vmem:[%s10783_s1 + $0xc84] sm:$0xf]  ;;  %v6096_v60 = vld [vmem:[%s10783_s1 + $0xc90] sm:$0xf0]  ;;  %v6499_v2 = vor.u32 %v7184_v9, %v6496_v53  ;;  %v3334_v23 = vadd.f32 %v3333_v14, %v3320_v12 }
  0xec   :  { %3591 = vmatpush.bf16.msrb.mxu0 %v6131_v30  ;;  %v7116_v61 = vld [vmem:[%s10783_s1 + $0xd84] sm:$0xf]  ;;  %v6224_v3 = vld [vmem:[%s10783_s1 + $0xd90] sm:$0xf0]  ;;  %v6099_v13 = vor.u32 %v7084_v59, %v6096_v60  ;;  %v3347_v52 = vpop.f32.mrf.mxu2 }
  0xed   :  { %3605 = vmatpush.bf16.msrb.mxu1 %v6259_v33  ;;  %v7148_v4 = vld [vmem:[%s10783_s1 + $0xe84] sm:$0xf]  ;;  %v6352_v5 = vld [vmem:[%s10783_s1 + $0xe90] sm:$0xf0]  ;;  %v6227_v15 = vor.u32 %v7116_v61, %v6224_v3 }
  0xee   :  { %3619 = vmatpush.bf16.msrb.mxu2 %v6387_v34  ;;  %v7180_v8 = vld [vmem:[%s10783_s1 + $0xf84] sm:$0xf]  ;;  %v6480_v11 = vld [vmem:[%s10783_s1 + $0xf90] sm:$0xf0]  ;;  %v6355_v16 = vor.u32 %v7148_v4, %v6352_v5 }
  0xef   :  { %3633 = vmatpush.bf16.msrb.mxu3 %v6515_v48  ;;  %v7080_v19 = vld [vmem:[%s10783_s1 + $0xc64] sm:$0xf]  ;;  %v6080_v21 = vld [vmem:[%s10783_s1 + $0xc70] sm:$0xf0]  ;;  %v6483_v20 = vor.u32 %v7180_v8, %v6480_v11 }
  0xf0   :  { %3592 = vmatpush.bf16.msrb.mxu0 %v6115_v55  ;;  %v7112_v22 = vld [vmem:[%s10783_s1 + $0xd64] sm:$0xf]  ;;  %v6208_v24 = vld [vmem:[%s10783_s1 + $0xd70] sm:$0xf0]  ;;  %v6083_v34 = vor.u32 %v7080_v19, %v6080_v21 }
  0xf1   :  { %3606 = vmatpush.bf16.msrb.mxu1 %v6243_v56  ;;  %v7144_v27 = vld [vmem:[%s10783_s1 + $0xe64] sm:$0xf]  ;;  %v6336_v28 = vld [vmem:[%s10783_s1 + $0xe70] sm:$0xf0]  ;;  %v6211_v37 = vor.u32 %v7112_v22, %v6208_v24  ;;  %v3348_v56 = vadd.f32 %v3347_v52, %v3334_v23  ;;  %v4870_v52 = vld [vmem:[%s10783_s1 + $0x2e8] sm:$0xf] }
  0xf2   :  { %3620 = vmatpush.bf16.msrb.mxu2 %v6371_v57  ;;  %v7176_v30 = vld [vmem:[%s10783_s1 + $0xf64] sm:$0xf]  ;;  %v6464_v33 = vld [vmem:[%s10783_s1 + $0xf70] sm:$0xf0]  ;;  %v6339_v42 = vor.u32 %v7144_v27, %v6336_v28  ;;  %v3361_v57 = vpop.f32.mrf.mxu3 }
  0xf3   :  { %3634 = vmatpush.bf16.msrb.mxu3 %v6499_v2  ;;  %v7076_v45 = vld [vmem:[%s10783_s1 + $0xc44] sm:$0xf]  ;;  %v6064_v48 = vld [vmem:[%s10783_s1 + $0xc50] sm:$0xf0]  ;;  %v6467_v50 = vor.u32 %v7176_v30, %v6464_v33  ;;  %v8935_v2 = vadd.f32 %v3361_v57, %v3348_v56  ;;  %v4998_v56 = vld [vmem:[%s10783_s1 + $0x3e8] sm:$0xf] }
  0xf4   :  { %3593 = vmatpush.bf16.msrb.mxu0 %v6099_v13  ;;  %v7108_v49 = vld [vmem:[%s10783_s1 + $0xd44] sm:$0xf]  ;;  %v6192_v9 = vld [vmem:[%s10783_s1 + $0xd50] sm:$0xf0]  ;;  %v6067_v61 = vor.u32 %v7076_v45, %v6064_v48  ;;  %v6715_v45 = vld [vmem:[%s10783_s1 + $0xf4] sm:$0xf0] }
  0xf5   :  { %3607 = vmatpush.bf16.msrb.mxu1 %v6227_v15  ;;  %v7140_v53 = vld [vmem:[%s10783_s1 + $0xe44] sm:$0xf]  ;;  %v6320_v55 = vld [vmem:[%s10783_s1 + $0xe50] sm:$0xf0]  ;;  %v6195_v3 = vor.u32 %v7108_v49, %v6192_v9  ;;  %v4742_v48 = vld [vmem:[%s10783_s1 + $0x1e8] sm:$0xf] }
  0xf6   :  { %3621 = vmatpush.bf16.msrb.mxu2 %v6355_v16  ;;  %v7172_v59 = vld [vmem:[%s10783_s1 + $0xf44] sm:$0xf]  ;;  %v6448_v60 = vld [vmem:[%s10783_s1 + $0xf50] sm:$0xf0]  ;;  %v6323_v4 = vor.u32 %v7140_v53, %v6320_v55  ;;  %v6779_v9 = vld [vmem:[%s10783_s1 + $0x2f4] sm:$0xf0] }
  0xf7   :  { %3635 = vmatpush.bf16.msrb.mxu3 %v6483_v20  ;;  %v7072_v5 = vld [vmem:[%s10783_s1 + $0xc24] sm:$0xf]  ;;  %v6048_v7 = vld [vmem:[%s10783_s1 + $0xc30] sm:$0xf0]  ;;  %v6451_v11 = vor.u32 %v7172_v59, %v6448_v60  ;;  %v6811_v57 = vld [vmem:[%s10783_s1 + $0x3f4] sm:$0xf0] }
  0xf8   :  { %3594 = vmatpush.bf16.msrb.mxu0 %v6083_v34  ;;  %v7104_v8 = vld [vmem:[%s10783_s1 + $0xd24] sm:$0xf]  ;;  %v6176_v12 = vld [vmem:[%s10783_s1 + $0xd30] sm:$0xf0]  ;;  %v6051_v19 = vor.u32 %v7072_v5, %v6048_v7  ;;  %v6711_v5 = vld [vmem:[%s10783_s1 + $0xd4] sm:$0xf0] }
  0xf9   :  { %3608 = vmatpush.bf16.msrb.mxu1 %v6211_v37  ;;  %v7136_v13 = vld [vmem:[%s10783_s1 + $0xe24] sm:$0xf]  ;;  %v6304_v14 = vld [vmem:[%s10783_s1 + $0xe30] sm:$0xf0]  ;;  %v6179_v20 = vor.u32 %v7104_v8, %v6176_v12  ;;  %v4726_v7 = vld [vmem:[%s10783_s1 + $0x1c8] sm:$0xf]  ;;  %v4999_v8 = vor.u32 %v6811_v57, %v4998_v56 }
  0xfa   :  { %3622 = vmatpush.bf16.msrb.mxu2 %v6339_v42  ;;  %v7168_v15 = vld [vmem:[%s10783_s1 + $0xf24] sm:$0xf]  ;;  %v6432_v16 = vld [vmem:[%s10783_s1 + $0xf30] sm:$0xf0]  ;;  %v6307_v23 = vor.u32 %v7136_v13, %v6304_v14  ;;  %v4614_v42 = vld [vmem:[%s10783_s1 + $0xe8] sm:$0xf]  ;;  %v9027_v14 = vpop.f32.mrf.mxu0 }
  0xfb   :  { %3636 = vmatpush.bf16.msrb.mxu3 %v6467_v50  ;;  %v7068_v21 = vld [vmem:[%s10783_s1 + $0xc04] sm:$0xf]  ;;  %v6032_v22 = vld [vmem:[%s10783_s1 + $0xc10] sm:$0xf0]  ;;  %v6435_v30 = vor.u32 %v7168_v15, %v6432_v16  ;;  %v6747_v50 = vld [vmem:[%s10783_s1 + $0x1f4] sm:$0xf0]  ;;  %v4615_v60 = vor.u32 %v6715_v45, %v4614_v42 }
  0xfc   :  { %3595 = vmatpush.bf16.msrb.mxu0 %v6067_v61  ;;  %v7100_v24 = vld [vmem:[%s10783_s1 + $0xd04] sm:$0xf]  ;;  %v6160_v27 = vld [vmem:[%s10783_s1 + $0xd10] sm:$0xf0]  ;;  %v6035_v49 = vor.u32 %v7068_v21, %v6032_v22  ;;  %v4743_v61 = vor.u32 %v6747_v50, %v4742_v48  ;;  %v4854_v12 = vld [vmem:[%s10783_s1 + $0x2c8] sm:$0xf] }
  0xfd   :  { %3609 = vmatpush.bf16.msrb.mxu1 %v6195_v3  ;;  %v7132_v28 = vld [vmem:[%s10783_s1 + $0xe04] sm:$0xf]  ;;  %v6288_v33 = vld [vmem:[%s10783_s1 + $0xe10] sm:$0xf0]  ;;  %v6163_v53 = vor.u32 %v7100_v24, %v6160_v27  ;;  %v4871_v3 = vor.u32 %v6779_v9, %v4870_v52  ;;  %v6775_v13 = vld [vmem:[%s10783_s1 + $0x2d4] sm:$0xf0] }
  0xfe   :  { %3623 = vmatpush.bf16.msrb.mxu2 %v6323_v4  ;;  %v7164_v34 = vld [vmem:[%s10783_s1 + $0xf04] sm:$0xf]  ;;  %v6416_v37 = vld [vmem:[%s10783_s1 + $0xf10] sm:$0xf0]  ;;  %v6291_v55 = vor.u32 %v7132_v28, %v6288_v33  ;;  %v4598_v4 = vld [vmem:[%s10783_s1 + $0xc8] sm:$0xf] }
  0xff   :  { %3637 = vmatpush.bf16.msrb.mxu3 %v6451_v11  ;;  %v6419_v59 = vor.u32 %v7164_v34, %v6416_v37  ;;  %v6743_v11 = vld [vmem:[%s10783_s1 + $0x1d4] sm:$0xf0]  ;;  %v4982_v15 = vld [vmem:[%s10783_s1 + $0x3c8] sm:$0xf]  ;;  %v4599_v21 = vor.u32 %v6711_v5, %v4598_v4 }
 0x100   :  { %3596 = vmatpush.bf16.msrb.mxu0 %v6051_v19  ;;  %v6807_v16 = vld [vmem:[%s10783_s1 + $0x3d4] sm:$0xf0]  ;;  %v9035_v19 = vpop.f32.mrf.mxu1  ;;  %v4727_v22 = vor.u32 %v6743_v11, %v4726_v7  ;;  %v4710_v27 = vld [vmem:[%s10783_s1 + $0x1a8] sm:$0xf] }
 0x101   :  { %3610 = vmatpush.bf16.msrb.mxu1 %v6179_v20  ;;  %v4855_v20 = vor.u32 %v6775_v13, %v4854_v12  ;;  %v6707_v24 = vld [vmem:[%s10783_s1 + $0xb4] sm:$0xf0]  ;;  %v4983_v28 = vor.u32 %v6807_v16, %v4982_v15  ;;  %v4838_v33 = vld [vmem:[%s10783_s1 + $0x2a8] sm:$0xf] }
 0x102   :  { %3624 = vmatpush.bf16.msrb.mxu2 %v6307_v23  ;;  %v4582_v23 = vld [vmem:[%s10783_s1 + $0xa8] sm:$0xf]  ;;  %v6771_v34 = vld [vmem:[%s10783_s1 + $0x2b4] sm:$0xf0] }
 0x103   :  { %3638 = vmatpush.bf16.msrb.mxu3 %v6435_v30  ;;  %v6739_v30 = vld [vmem:[%s10783_s1 + $0x1b4] sm:$0xf0]  ;;  %v4966_v37 = vld [vmem:[%s10783_s1 + $0x3a8] sm:$0xf]  ;;  %v4583_v45 = vor.u32 %v6707_v24, %v4582_v23 }
 0x104   :  { %3597 = vmatpush.bf16.msrb.mxu0 %v6035_v49  ;;  %v6803_v42 = vld [vmem:[%s10783_s1 + $0x3b4] sm:$0xf0]  ;;  %v4711_v48 = vor.u32 %v6739_v30, %v4710_v27  ;;  %v4839_v49 = vor.u32 %v6771_v34, %v4838_v33  ;;  %v4566_v50 = vld [vmem:[%s10783_s1 + $0x88] sm:$0xf] }
 0x105   :  { %3611 = vmatpush.bf16.msrb.mxu1 %v6163_v53  ;;  %v6703_v52 = vld [vmem:[%s10783_s1 + $0x94] sm:$0xf0]  ;;  %v4694_v9 = vld [vmem:[%s10783_s1 + $0x188] sm:$0xf]  ;;  %v9074_v53 = vpop.f32.mrf.mxu2 }
 0x106   :  { %3625 = vmatpush.bf16.msrb.mxu2 %v6291_v55  ;;  %v4967_v55 = vor.u32 %v6803_v42, %v4966_v37  ;;  %v6735_v56 = vld [vmem:[%s10783_s1 + $0x194] sm:$0xf0]  ;;  %v4822_v57 = vld [vmem:[%s10783_s1 + $0x288] sm:$0xf]  ;;  %v4567_v7 = vor.u32 %v6703_v52, %v4566_v50 }
 0x107   :  { %3639 = vmatpush.bf16.msrb.mxu3 %v6419_v59  ;;  %3598 = vmatmul.bf16.vlgmr.msrb.gmra.mxu0 %v8194_v32  ;;  %v6767_v59 = vld [vmem:[%s10783_s1 + $0x294] sm:$0xf0]  ;;  %v4695_v11 = vor.u32 %v6735_v56, %v4694_v9  ;;  %v4550_v13 = vld [vmem:[%s10783_s1 + $0x68] sm:$0xf] }
 0x108   :  { %3646 = vmatpush.bf16.msra.mxu0 %v4615_v60  ;;  %3612 = vmatmul.bf16.vlgmr.msrb.gmra.mxu1 %v8207_v41  ;;  %v9085_v60 = vpop.f32.mrf.mxu3  ;;  %v6799_v4 = vld [vmem:[%s10783_s1 + $0x394] sm:$0xf0]  ;;  %v4823_v12 = vor.u32 %v6767_v59, %v4822_v57  ;;  %v4678_v16 = vld [vmem:[%s10783_s1 + $0x168] sm:$0xf] }
 0x109   :  { %3660 = vmatpush.bf16.msra.mxu1 %v4743_v61  ;;  %3626 = vmatmul.bf16.vlgmr.msrb.gmra.mxu2 %v8205_v38  ;;  %v3375_v61 = vpop.f32.mrf.mxu0  ;;  %v6699_v15 = vld [vmem:[%s10783_s1 + $0x74] sm:$0xf0]  ;;  %v4934_v24 = vld [vmem:[%s10783_s1 + $0x368] sm:$0xf] }
 0x10a   :  { %3674 = vmatpush.bf16.msra.mxu2 %v4871_v3  ;;  %3640 = vmatmul.bf16.vlgmr.msrb.gmra.mxu3 %v8215_v46  ;;  %v4950_v3 = vld [vmem:[%s10783_s1 + $0x388] sm:$0xf]  ;;  %v3376_v5 = vadd.f32 %v3375_v61, %v8935_v2  ;;  %v6763_v23 = vld [vmem:[%s10783_s1 + $0x274] sm:$0xf0] }
 0x10b   :  { %3688 = vmatpush.bf16.msra.mxu3 %v4999_v8  ;;  %v3389_v8 = vpop.f32.mrf.mxu1  ;;  %v4951_v2 = vor.u32 %v6799_v4, %v4950_v3  ;;  %v6795_v27 = vld [vmem:[%s10783_s1 + $0x374] sm:$0xf0]  ;;  %v4534_v34 = vld [vmem:[%s10783_s1 + $0x48] sm:$0xf] }
 0x10c   :  { %3647 = vmatpush.bf16.msra.mxu0 %v4599_v21  ;;  %v3390_v21 = vadd.f32 %v3389_v8, %v3376_v5  ;;  %v6695_v37 = vld [vmem:[%s10783_s1 + $0x54] sm:$0xf0]  ;;  %v4662_v42 = vld [vmem:[%s10783_s1 + $0x148] sm:$0xf] }
 0x10d   :  { %3661 = vmatpush.bf16.msra.mxu1 %v4727_v22  ;;  %v6731_v22 = vld [vmem:[%s10783_s1 + $0x174] sm:$0xf0]  ;;  %v4790_v50 = vld [vmem:[%s10783_s1 + $0x248] sm:$0xf]  ;;  %v4535_v59 = vor.u32 %v6695_v37, %v4534_v34 }
 0x10e   :  { %3675 = vmatpush.bf16.msra.mxu2 %v4855_v20  ;;  %v4806_v20 = vld [vmem:[%s10783_s1 + $0x268] sm:$0xf]  ;;  %v4679_v30 = vor.u32 %v6731_v22, %v4678_v16  ;;  %v6759_v52 = vld [vmem:[%s10783_s1 + $0x254] sm:$0xf0] }
 0x10f   :  { %3689 = vmatpush.bf16.msra.mxu3 %v4983_v28  ;;  %v4551_v28 = vor.u32 %v6699_v15, %v4550_v13  ;;  %v4807_v33 = vor.u32 %v6763_v23, %v4806_v20  ;;  %v4918_v56 = vld [vmem:[%s10783_s1 + $0x348] sm:$0xf]  ;;  %v6791_v57 = vld [vmem:[%s10783_s1 + $0x354] sm:$0xf0]  ;;  %v4791_v4 = vor.u32 %v6759_v52, %v4790_v50 }
 0x110   :  { %3648 = vmatpush.bf16.msra.mxu0 %v4583_v45  ;;  %v4935_v45 = vor.u32 %v6795_v27, %v4934_v24  ;;  %v4518_v5 = vld [vmem:[%s10783_s1 + $0x28] sm:$0xf]  ;;  %v6755_v15 = vld [vmem:[%s10783_s1 + $0x234] sm:$0xf0] }
 0x111   :  { %3662 = vmatpush.bf16.msra.mxu1 %v4711_v48  ;;  %v3403_v48 = vpop.f32.mrf.mxu2  ;;  %v4646_v8 = vld [vmem:[%s10783_s1 + $0x128] sm:$0xf]  ;;  %v6687_v20 = vld [vmem:[%s10783_s1 + $0x14] sm:$0xf0] }
 0x112   :  { %3676 = vmatpush.bf16.msra.mxu2 %v4839_v49  ;;  %v6727_v49 = vld [vmem:[%s10783_s1 + $0x154] sm:$0xf0]  ;;  %v3404_v9 = vadd.f32 %v3403_v48, %v3390_v21  ;;  %v4774_v13 = vld [vmem:[%s10783_s1 + $0x228] sm:$0xf] }
 0x113   :  { %3690 = vmatpush.bf16.msra.mxu3 %v4967_v55  ;;  %v3417_v55 = vpop.f32.mrf.mxu3  ;;  %v4663_v3 = vor.u32 %v6727_v49, %v4662_v42  ;;  %v4902_v16 = vld [vmem:[%s10783_s1 + $0x328] sm:$0xf]  ;;  %v4775_v24 = vor.u32 %v6755_v15, %v4774_v13  ;;  %v6751_v34 = vld [vmem:[%s10783_s1 + $0x214] sm:$0xf0] }
 0x114   :  { %3649 = vmatpush.bf16.msra.mxu0 %v4567_v7  ;;  %v9142_v61 = vadd.f32 %v3417_v55, %v3404_v9  ;;  %v6691_v7 = vld [vmem:[%s10783_s1 + $0x34] sm:$0xf0]  ;;  %v4502_v22 = vld [vmem:[%s10783_s1 + $0x8] sm:$0xf] }
 0x115   :  { %3663 = vmatpush.bf16.msra.mxu1 %v4695_v11  ;;  %v4919_v11 = vor.u32 %v6791_v57, %v4918_v56  ;;  %v4519_v21 = vor.u32 %v6691_v7, %v4518_v5  ;;  %v4630_v27 = vld [vmem:[%s10783_s1 + $0x108] sm:$0xf]  ;;  %v6783_v42 = vld [vmem:[%s10783_s1 + $0x314] sm:$0xf0]  ;;  %v4503_v50 = vor.u32 %v6687_v20, %v4502_v22  ;;  %v9234_v22 = vpop.f32.mrf.mxu0 }
 0x116   :  { %3677 = vmatpush.bf16.msra.mxu2 %v4823_v12  ;;  %v6723_v12 = vld [vmem:[%s10783_s1 + $0x134] sm:$0xf0]  ;;  %v4886_v37 = vld [vmem:[%s10783_s1 + $0x308] sm:$0xf] }
 0x117   :  { %3691 = vmatpush.bf16.msra.mxu3 %v4951_v2  ;;  %v6787_v2 = vld [vmem:[%s10783_s1 + $0x334] sm:$0xf0]  ;;  %v4647_v23 = vor.u32 %v6723_v12, %v4646_v8  ;;  %v5254_v49 = vld [vmem:[%s10783_s1 + $0x5e8] sm:$0xf] }
 0x118   :  { %3650 = vmatpush.bf16.msra.mxu0 %v4551_v28  ;;  %v6719_v28 = vld [vmem:[%s10783_s1 + $0x114] sm:$0xf0]  ;;  %v5382_v9 = vld [vmem:[%s10783_s1 + $0x6e8] sm:$0xf] }
 0x119   :  { %3664 = vmatpush.bf16.msra.mxu1 %v4679_v30  ;;  %v4758_v30 = vld [vmem:[%s10783_s1 + $0x208] sm:$0xf]  ;;  %v6843_v48 = vld [vmem:[%s10783_s1 + $0x4f4] sm:$0xf0]  ;;  %v4631_v56 = vor.u32 %v6719_v28, %v4630_v27  ;;  %v9242_v27 = vpop.f32.mrf.mxu1 }
 0x11a   :  { %3678 = vmatpush.bf16.msra.mxu2 %v4807_v33  ;;  %v4903_v33 = vor.u32 %v6787_v2, %v4902_v16  ;;  %v6875_v52 = vld [vmem:[%s10783_s1 + $0x5f4] sm:$0xf0]  ;;  %v4759_v57 = vor.u32 %v6751_v34, %v4758_v30  ;;  %v5238_v13 = vld [vmem:[%s10783_s1 + $0x5c8] sm:$0xf] }
 0x11b   :  { %3692 = vmatpush.bf16.msra.mxu3 %v4935_v45  ;;  %v5126_v45 = vld [vmem:[%s10783_s1 + $0x4e8] sm:$0xf]  ;;  %v6907_v55 = vld [vmem:[%s10783_s1 + $0x6f4] sm:$0xf0]  ;;  %v5255_v7 = vor.u32 %v6875_v52, %v5254_v49 }
 0x11c   :  { %3651 = vmatpush.bf16.msra.mxu0 %v4535_v59  ;;  %v5510_v59 = vld [vmem:[%s10783_s1 + $0x7e8] sm:$0xf]  ;;  %v5127_v5 = vor.u32 %v6843_v48, %v5126_v45  ;;  %v5383_v8 = vor.u32 %v6907_v55, %v5382_v9  ;;  %v6839_v12 = vld [vmem:[%s10783_s1 + $0x4d4] sm:$0xf0]  ;;  %v9275_v55 = vld [vmem:[%s10785_s2] sm:$0xf] }
 0x11d   :  { %3665 = vmatpush.bf16.msra.mxu1 %v4663_v3  ;;  %v6939_v3 = vld [vmem:[%s10783_s1 + $0x7f4] sm:$0xf0]  ;;  %v5366_v2 = vld [vmem:[%s10783_s1 + $0x6c8] sm:$0xf] }
 0x11e   :  { %3679 = vmatpush.bf16.msra.mxu2 %v4791_v4  ;;  %v4887_v4 = vor.u32 %v6783_v42, %v4886_v37  ;;  %v5511_v15 = vor.u32 %v6939_v3, %v5510_v59  ;;  %v6871_v16 = vld [vmem:[%s10783_s1 + $0x5d4] sm:$0xf0]  ;;  %v5494_v20 = vld [vmem:[%s10783_s1 + $0x7c8] sm:$0xf] }
 0x11f   :  { %3693 = vmatpush.bf16.msra.mxu3 %v4919_v11  ;;  %v5110_v11 = vld [vmem:[%s10783_s1 + $0x4c8] sm:$0xf]  ;;  %v5239_v28 = vor.u32 %v6871_v16, %v5238_v13  ;;  %v6835_v34 = vld [vmem:[%s10783_s1 + $0x4b4] sm:$0xf0] }
 0x120   :  { %3652 = vmatpush.bf16.msra.mxu0 %v4519_v21  ;;  %v6903_v21 = vld [vmem:[%s10783_s1 + $0x6d4] sm:$0xf0]  ;;  %v5222_v37 = vld [vmem:[%s10783_s1 + $0x5a8] sm:$0xf] }
 0x121   :  { %3666 = vmatpush.bf16.msra.mxu1 %v4647_v23  ;;  %v6935_v23 = vld [vmem:[%s10783_s1 + $0x7d4] sm:$0xf0]  ;;  %v5367_v30 = vor.u32 %v6903_v21, %v5366_v2  ;;  %v5350_v48 = vld [vmem:[%s10783_s1 + $0x6a8] sm:$0xf]  ;;  %v9304_v21 = vpop.f32.mrf.mxu3 }
 0x122   :  { %3680 = vmatpush.bf16.msra.mxu2 %v4775_v24  ;;  %v5111_v24 = vor.u32 %v6839_v12, %v5110_v11  ;;  %v5495_v42 = vor.u32 %v6935_v23, %v5494_v20  ;;  %v6867_v45 = vld [vmem:[%s10783_s1 + $0x5b4] sm:$0xf0]  ;;  %v5078_v3 = vld [vmem:[%s10783_s1 + $0x488] sm:$0xf] }
 0x123   :  { %3694 = vmatpush.bf16.msra.mxu3 %v4903_v33  ;;  %v5094_v33 = vld [vmem:[%s10783_s1 + $0x4a8] sm:$0xf]  ;;  %v6899_v49 = vld [vmem:[%s10783_s1 + $0x6b4] sm:$0xf0] }
 0x124   :  { %3653 = vmatpush.bf16.msra.mxu0 %v4503_v50  ;;  %v5478_v50 = vld [vmem:[%s10783_s1 + $0x7a8] sm:$0xf]  ;;  %v6931_v52 = vld [vmem:[%s10783_s1 + $0x7b4] sm:$0xf0]  ;;  %v5095_v9 = vor.u32 %v6835_v34, %v5094_v33  ;;  %v5351_v59 = vor.u32 %v6899_v49, %v5350_v48  ;;  %v3431_v2 = vpop.f32.mrf.mxu0 }
 0x125   :  { %3667 = vmatpush.bf16.msra.mxu1 %v4631_v56  ;;  %v551_v56 = vperm.slane %v9275_v55, 1  ;;  %v6863_v11 = vld [vmem:[%s10783_s1 + $0x594] sm:$0xf0]  ;;  %v5334_v12 = vld [vmem:[%s10783_s1 + $0x688] sm:$0xf] }
 0x126   :  { %3681 = vmatpush.bf16.msra.mxu2 %v4759_v57  ;;  %v5223_v57 = vor.u32 %v6867_v45, %v5222_v37  ;;  %v6895_v13 = vld [vmem:[%s10783_s1 + $0x694] sm:$0xf0]  ;;  %v5190_v34 = vld [vmem:[%s10783_s1 + $0x568] sm:$0xf]  ;;  %v3445_v37 = vpop.f32.mrf.mxu1 }
 0x127   :  { %3695 = vmatpush.bf16.msra.mxu3 %v4887_v4  ;;  %3654 = vmatmul.bf16.vlgmr.msra.gmra.mxu0 %v7516_v58  ;;  %v6831_v4 = vld [vmem:[%s10783_s1 + $0x494] sm:$0xf0]  ;;  %v3432_v23 = vadd.f32 %v3431_v2, %v551_v56  ;;  %v5318_v48 = vld [vmem:[%s10783_s1 + $0x668] sm:$0xf] }
 0x128   :  { %3702 = vmatpush.bf16.msrb.mxu0 %v5127_v5  ;;  %3668 = vmatmul.bf16.vlgmr.msra.gmra.mxu1 %v7552_v10  ;;  %v5206_v5 = vld [vmem:[%s10783_s1 + $0x588] sm:$0xf]  ;;  %v6927_v16 = vld [vmem:[%s10783_s1 + $0x794] sm:$0xf0]  ;;  %v5079_v20 = vor.u32 %v6831_v4, %v5078_v3 }
 0x129   :  { %3716 = vmatpush.bf16.msrb.mxu1 %v5255_v7  ;;  %3682 = vmatmul.bf16.vlgmr.msra.gmra.mxu2 %v7530_v1  ;;  %v9287_v7 = vpop.f32.mrf.mxu2  ;;  %v6827_v33 = vld [vmem:[%s10783_s1 + $0x474] sm:$0xf0]  ;;  %v5046_v4 = vld [vmem:[%s10783_s1 + $0x448] sm:$0xf] }
 0x12a   :  { %3730 = vmatpush.bf16.msrb.mxu2 %v5383_v8  ;;  %3696 = vmatmul.bf16.vlgmr.msra.gmra.mxu3 %v7566_v17  ;;  %v5479_v8 = vor.u32 %v6931_v52, %v5478_v50  ;;  %v6859_v45 = vld [vmem:[%s10783_s1 + $0x574] sm:$0xf0]  ;;  %v3446_v50 = vadd.f32 %v3445_v37, %v3432_v23  ;;  %v5446_v52 = vld [vmem:[%s10783_s1 + $0x768] sm:$0xf] }
 0x12b   :  { %3744 = vmatpush.bf16.msrb.mxu3 %v5511_v15  ;;  %v5462_v15 = vld [vmem:[%s10783_s1 + $0x788] sm:$0xf]  ;;  %v6891_v49 = vld [vmem:[%s10783_s1 + $0x674] sm:$0xf0] }
 0x12c   :  { %3703 = vmatpush.bf16.msrb.mxu0 %v5111_v24  ;;  %v5207_v24 = vor.u32 %v6863_v11, %v5206_v5  ;;  %v5319_v3 = vor.u32 %v6891_v49, %v5318_v48  ;;  %v6823_v5 = vld [vmem:[%s10783_s1 + $0x454] sm:$0xf0]  ;;  %v5430_v2 = vld [vmem:[%s10783_s1 + $0x748] sm:$0xf] }
 0x12d   :  { %3717 = vmatpush.bf16.msrb.mxu1 %v5239_v28  ;;  %v5335_v28 = vor.u32 %v6895_v13, %v5334_v12  ;;  %v6855_v12 = vld [vmem:[%s10783_s1 + $0x554] sm:$0xf0]  ;;  %v5302_v13 = vld [vmem:[%s10783_s1 + $0x648] sm:$0xf] }
 0x12e   :  { %3731 = vmatpush.bf16.msrb.mxu2 %v5367_v30  ;;  %v5062_v30 = vld [vmem:[%s10783_s1 + $0x468] sm:$0xf]  ;;  %v6819_v37 = vld [vmem:[%s10783_s1 + $0x434] sm:$0xf0] }
 0x12f   :  { %3745 = vmatpush.bf16.msrb.mxu3 %v5495_v42  ;;  %v5463_v42 = vor.u32 %v6927_v16, %v5462_v15  ;;  %v6887_v15 = vld [vmem:[%s10783_s1 + $0x654] sm:$0xf0] }
 0x130   :  { %3704 = vmatpush.bf16.msrb.mxu0 %v5095_v9  ;;  %v6923_v9 = vld [vmem:[%s10783_s1 + $0x774] sm:$0xf0] }
 0x131   :  { %3718 = vmatpush.bf16.msrb.mxu1 %v5223_v57  ;;  %v5063_v57 = vor.u32 %v6827_v33, %v5062_v30  ;;  %v5447_v11 = vor.u32 %v6923_v9, %v5446_v52  ;;  %v3459_v16 = vpop.f32.mrf.mxu2  ;;  %v5303_v33 = vor.u32 %v6887_v15, %v5302_v13  ;;  %v6851_v49 = vld [vmem:[%s10783_s1 + $0x534] sm:$0xf0]  ;;  %v5414_v9 = vld [vmem:[%s10783_s1 + $0x728] sm:$0xf] }
 0x132   :  { %3732 = vmatpush.bf16.msrb.mxu2 %v5351_v59  ;;  %v5191_v59 = vor.u32 %v6859_v45, %v5190_v34  ;;  %v3460_v23 = vadd.f32 %v3459_v16, %v3446_v50  ;;  %v5030_v34 = vld [vmem:[%s10783_s1 + $0x428] sm:$0xf]  ;;  %v6883_v52 = vld [vmem:[%s10783_s1 + $0x634] sm:$0xf0] }
 0x133   :  { %3746 = vmatpush.bf16.msrb.mxu3 %v5479_v8  ;;  %v5174_v8 = vld [vmem:[%s10783_s1 + $0x548] sm:$0xf]  ;;  %v6879_v16 = vld [vmem:[%s10783_s1 + $0x614] sm:$0xf0] }
 0x134   :  { %3705 = vmatpush.bf16.msrb.mxu0 %v5079_v20  ;;  %v6919_v20 = vld [vmem:[%s10783_s1 + $0x754] sm:$0xf0]  ;;  %v5175_v30 = vor.u32 %v6855_v12, %v5174_v8  ;;  %v5286_v50 = vld [vmem:[%s10783_s1 + $0x628] sm:$0xf] }
 0x135   :  { %3719 = vmatpush.bf16.msrb.mxu1 %v5207_v24  ;;  %v5047_v24 = vor.u32 %v6823_v5, %v5046_v4  ;;  %v5431_v48 = vor.u32 %v6919_v20, %v5430_v2  ;;  %v6815_v4 = vld [vmem:[%s10783_s1 + $0x414] sm:$0xf0]  ;;  %v5287_v8 = vor.u32 %v6883_v52, %v5286_v50  ;;  %v5270_v13 = vld [vmem:[%s10783_s1 + $0x608] sm:$0xf] }
 0x136   :  { %3733 = vmatpush.bf16.msrb.mxu2 %v5335_v28  ;;  %v3473_v28 = vpop.f32.mrf.mxu3  ;;  %v6847_v12 = vld [vmem:[%s10783_s1 + $0x514] sm:$0xf0]  ;;  %v5398_v2 = vld [vmem:[%s10783_s1 + $0x708] sm:$0xf] }
 0x137   :  { %3747 = vmatpush.bf16.msrb.mxu3 %v5463_v42  ;;  %v5158_v42 = vld [vmem:[%s10783_s1 + $0x528] sm:$0xf]  ;;  %v9365_v45 = vadd.f32 %v3473_v28, %v3460_v23  ;;  %v6911_v20 = vld [vmem:[%s10783_s1 + $0x714] sm:$0xf0] }
 0x138   :  { %3706 = vmatpush.bf16.msrb.mxu0 %v5063_v57  ;;  %v6915_v57 = vld [vmem:[%s10783_s1 + $0x734] sm:$0xf0]  ;;  %v5159_v5 = vor.u32 %v6851_v49, %v5158_v42  ;;  %v5638_v23 = vld [vmem:[%s10783_s1 + $0x8e8] sm:$0xf]  ;;  %v5399_v52 = vor.u32 %v6911_v20, %v5398_v2 }
 0x139   :  { %3720 = vmatpush.bf16.msrb.mxu1 %v5191_v59  ;;  %v5031_v59 = vor.u32 %v6819_v37, %v5030_v34  ;;  %v5415_v15 = vor.u32 %v6915_v57, %v5414_v9  ;;  %v5766_v28 = vld [vmem:[%s10783_s1 + $0x9e8] sm:$0xf]  ;;  %v7035_v37 = vld [vmem:[%s10783_s1 + $0xaf4] sm:$0xf0] }
 0x13a   :  { %3734 = vmatpush.bf16.msrb.mxu2 %v5319_v3  ;;  %v5014_v3 = vld [vmem:[%s10783_s1 + $0x408] sm:$0xf]  ;;  %v7067_v50 = vld [vmem:[%s10783_s1 + $0xbf4] sm:$0xf0] }
 0x13b   :  { %3748 = vmatpush.bf16.msrb.mxu3 %v5447_v11  ;;  %v5142_v11 = vld [vmem:[%s10783_s1 + $0x508] sm:$0xf]  ;;  %v7063_v20 = vld [vmem:[%s10783_s1 + $0xbd4] sm:$0xf0] }
 0x13c   :  { %3707 = vmatpush.bf16.msrb.mxu0 %v5047_v24  ;;  %v6971_v24 = vld [vmem:[%s10783_s1 + $0x8f4] sm:$0xf0]  ;;  %v5894_v34 = vld [vmem:[%s10783_s1 + $0xae8] sm:$0xf]  ;;  %v5143_v42 = vor.u32 %v6847_v12, %v5142_v11 }
 0x13d   :  { %3721 = vmatpush.bf16.msrb.mxu1 %v5175_v30  ;;  %v5015_v30 = vor.u32 %v6815_v4, %v5014_v3  ;;  %v6022_v49 = vld [vmem:[%s10783_s1 + $0xbe8] sm:$0xf]  ;;  %v5639_v9 = vor.u32 %v6971_v24, %v5638_v23  ;;  %v3433_v3 = vpop.f32.mrf.mxu0  ;;  %v6999_v12 = vld [vmem:[%s10783_s1 + $0x9d4] sm:$0xf0] }
 0x13e   :  { %3735 = vmatpush.bf16.msrb.mxu2 %v5303_v33  ;;  %v7003_v33 = vld [vmem:[%s10783_s1 + $0x9f4] sm:$0xf0]  ;;  %v5622_v4 = vld [vmem:[%s10783_s1 + $0x8c8] sm:$0xf]  ;;  %v6023_v11 = vor.u32 %v7067_v50, %v6022_v49  ;;  %v3434_v23 = vadd.f32 %v3433_v3, %v551_v56 }
 0x13f   :  { %3749 = vmatpush.bf16.msrb.mxu3 %v5431_v48  ;;  %v5271_v48 = vor.u32 %v6879_v16, %v5270_v13  ;;  %v5767_v57 = vor.u32 %v7003_v33, %v5766_v28  ;;  %v5878_v13 = vld [vmem:[%s10783_s1 + $0xac8] sm:$0xf]  ;;  %v3447_v16 = vpop.f32.mrf.mxu1  ;;  %v6995_v56 = vld [vmem:[%s10783_s1 + $0x9b4] sm:$0xf0] }
 0x140   :  { %3708 = vmatpush.bf16.msrb.mxu0 %v5031_v59  ;;  %v5895_v59 = vor.u32 %v7035_v37, %v5894_v34  ;;  %v6006_v2 = vld [vmem:[%s10783_s1 + $0xbc8] sm:$0xf]  ;;  %v6963_v34 = vld [vmem:[%s10783_s1 + $0x8b4] sm:$0xf0] }
 0x141   :  { %3722 = vmatpush.bf16.msrb.mxu1 %v5159_v5  ;;  %v6967_v5 = vld [vmem:[%s10783_s1 + $0x8d4] sm:$0xf0]  ;;  %v5606_v33 = vld [vmem:[%s10783_s1 + $0x8a8] sm:$0xf]  ;;  %v6007_v55 = vor.u32 %v7063_v20, %v6006_v2 }
 0x142   :  { %3736 = vmatpush.bf16.msrb.mxu2 %v5287_v8  ;;  %v5750_v8 = vld [vmem:[%s10783_s1 + $0x9c8] sm:$0xf]  ;;  %v5623_v24 = vor.u32 %v6967_v5, %v5622_v4  ;;  %v7059_v50 = vld [vmem:[%s10783_s1 + $0xbb4] sm:$0xf0]  ;;  %v3475_v4 = vpop.f32.mrf.mxu3 }
 0x143   :  { %3750 = vmatpush.bf16.msrb.mxu3 %v5415_v15  ;;  %v7031_v15 = vld [vmem:[%s10783_s1 + $0xad4] sm:$0xf0]  ;;  %v5751_v28 = vor.u32 %v6999_v12, %v5750_v8  ;;  %v5734_v37 = vld [vmem:[%s10783_s1 + $0x9a8] sm:$0xf] }
 0x144   :  { %3709 = vmatpush.bf16.msrb.mxu0 %v5015_v30  ;;  %v5879_v30 = vor.u32 %v7031_v15, %v5878_v13  ;;  %v5990_v49 = vld [vmem:[%s10783_s1 + $0xba8] sm:$0xf]  ;;  %v6959_v8 = vld [vmem:[%s10783_s1 + $0x894] sm:$0xf0] }
 0x145   :  { %3723 = vmatpush.bf16.msrb.mxu1 %v5143_v42  ;;  %v5862_v42 = vld [vmem:[%s10783_s1 + $0xaa8] sm:$0xf]  ;;  %v5991_v12 = vor.u32 %v7059_v50, %v5990_v49  ;;  %v6991_v13 = vld [vmem:[%s10783_s1 + $0x994] sm:$0xf0]  ;;  %v3487_v2 = vpop.f32.mrf.mxu0 }
 0x146   :  { %3737 = vmatpush.bf16.msrb.mxu2 %v5271_v48  ;;  %v7027_v48 = vld [vmem:[%s10783_s1 + $0xab4] sm:$0xf0]  ;;  %v5590_v5 = vld [vmem:[%s10783_s1 + $0x888] sm:$0xf] }
 0x147   :  { %3751 = vmatpush.bf16.msrb.mxu3 %v5399_v52  ;;  %3710 = vmatmul.bf16.vlgmr.msrb.gmra.mxu0 %v7738_v39  ;;  %v3448_v52 = vadd.f32 %v3447_v16, %v3434_v23  ;;  %v5863_v3 = vor.u32 %v7027_v48, %v5862_v42  ;;  %v5846_v15 = vld [vmem:[%s10783_s1 + $0xa88] sm:$0xf]  ;;  %v7023_v16 = vld [vmem:[%s10783_s1 + $0xa94] sm:$0xf0] }
 0x148   :  { %3758 = vmatpush.bf16.msra.mxu0 %v5639_v9  ;;  %3724 = vmatmul.bf16.vlgmr.msrb.gmra.mxu1 %v7751_v44  ;;  %v5607_v9 = vor.u32 %v6963_v34, %v5606_v33  ;;  %v5974_v20 = vld [vmem:[%s10783_s1 + $0xb88] sm:$0xf]  ;;  %v7055_v23 = vld [vmem:[%s10783_s1 + $0xb94] sm:$0xf0]  ;;  %v3501_v33 = vpop.f32.mrf.mxu1 }
 0x149   :  { %3772 = vmatpush.bf16.msra.mxu1 %v5767_v57  ;;  %3738 = vmatmul.bf16.vlgmr.msrb.gmra.mxu2 %v7749_v43  ;;  %v3461_v57 = vpop.f32.mrf.mxu2  ;;  %v5702_v42 = vld [vmem:[%s10783_s1 + $0x968] sm:$0xf]  ;;  %v6987_v49 = vld [vmem:[%s10783_s1 + $0x974] sm:$0xf0] }
 0x14a   :  { %3786 = vmatpush.bf16.msra.mxu2 %v5895_v59  ;;  %3752 = vmatmul.bf16.vlgmr.msrb.gmra.mxu3 %v7759_v47  ;;  %v5735_v59 = vor.u32 %v6995_v56, %v5734_v37  ;;  %v5847_v37 = vor.u32 %v7023_v16, %v5846_v15  ;;  %v6955_v56 = vld [vmem:[%s10783_s1 + $0x874] sm:$0xf0]  ;;  %v5830_v50 = vld [vmem:[%s10783_s1 + $0xa68] sm:$0xf] }
 0x14b   :  { %3800 = vmatpush.bf16.msra.mxu3 %v6023_v11  ;;  %v5718_v11 = vld [vmem:[%s10783_s1 + $0x988] sm:$0xf]  ;;  %v6983_v16 = vld [vmem:[%s10783_s1 + $0x954] sm:$0xf0] }
 0x14c   :  { %3759 = vmatpush.bf16.msra.mxu0 %v5623_v24  ;;  %v3462_v24 = vadd.f32 %v3461_v57, %v3448_v52  ;;  %v5719_v34 = vor.u32 %v6991_v13, %v5718_v11  ;;  %v7019_v52 = vld [vmem:[%s10783_s1 + $0xa74] sm:$0xf0]  ;;  %v5558_v11 = vld [vmem:[%s10783_s1 + $0x848] sm:$0xf] }
 0x14d   :  { %3773 = vmatpush.bf16.msra.mxu1 %v5751_v28  ;;  %v3488_v28 = vadd.f32 %v3487_v2, %v9365_v45  ;;  %v5975_v45 = vor.u32 %v7055_v23, %v5974_v20  ;;  %v7051_v57 = vld [vmem:[%s10783_s1 + $0xb74] sm:$0xf0]  ;;  %v5686_v13 = vld [vmem:[%s10783_s1 + $0x948] sm:$0xf] }
 0x14e   :  { %3787 = vmatpush.bf16.msra.mxu2 %v5879_v30  ;;  %v5591_v30 = vor.u32 %v6959_v8, %v5590_v5  ;;  %v5703_v5 = vor.u32 %v6987_v49, %v5702_v42  ;;  %v5831_v8 = vor.u32 %v7019_v52, %v5830_v50  ;;  %v5814_v2 = vld [vmem:[%s10783_s1 + $0xa48] sm:$0xf]  ;;  %v7015_v20 = vld [vmem:[%s10783_s1 + $0xa54] sm:$0xf0]  ;;  %v5687_v42 = vor.u32 %v6983_v16, %v5686_v13 }
 0x14f   :  { %3801 = vmatpush.bf16.msra.mxu3 %v6007_v55  ;;  %v5574_v55 = vld [vmem:[%s10783_s1 + $0x868] sm:$0xf]  ;;  %v3502_v48 = vadd.f32 %v3501_v33, %v3488_v28  ;;  %v3529_v28 = vpop.f32.mrf.mxu3  ;;  %v7047_v33 = vld [vmem:[%s10783_s1 + $0xb54] sm:$0xf0] }
 0x150   :  { %3760 = vmatpush.bf16.msra.mxu0 %v5607_v9  ;;  %v5958_v9 = vld [vmem:[%s10783_s1 + $0xb68] sm:$0xf]  ;;  %v6947_v49 = vld [vmem:[%s10783_s1 + $0x834] sm:$0xf0] }
 0x151   :  { %3774 = vmatpush.bf16.msra.mxu1 %v5735_v59  ;;  %v3476_v59 = vadd.f32 %v3475_v4, %v3462_v24  ;;  %v5959_v4 = vor.u32 %v7051_v57, %v5958_v9  ;;  %v3515_v15 = vpop.f32.mrf.mxu2  ;;  %v3489_v24 = vpop.f32.mrf.mxu0  ;;  %v5670_v50 = vld [vmem:[%s10783_s1 + $0x928] sm:$0xf]  ;;  %v6979_v57 = vld [vmem:[%s10783_s1 + $0x934] sm:$0xf0] }
 0x152   :  { %3788 = vmatpush.bf16.msra.mxu2 %v5863_v3  ;;  %v5575_v3 = vor.u32 %v6955_v56, %v5574_v55  ;;  %v3516_v23 = vadd.f32 %v3515_v15, %v3502_v48  ;;  %v3503_v55 = vpop.f32.mrf.mxu1  ;;  %v5542_v48 = vld [vmem:[%s10783_s1 + $0x828] sm:$0xf]  ;;  %v6943_v13 = vld [vmem:[%s10783_s1 + $0x814] sm:$0xf0] }
 0x153   :  { %3802 = vmatpush.bf16.msra.mxu3 %v5991_v12  ;;  %v6951_v12 = vld [vmem:[%s10783_s1 + $0x854] sm:$0xf0]  ;;  %v5654_v16 = vld [vmem:[%s10783_s1 + $0x908] sm:$0xf] }
 0x154   :  { %3761 = vmatpush.bf16.msra.mxu0 %v5591_v30  ;;  %v5942_v30 = vld [vmem:[%s10783_s1 + $0xb48] sm:$0xf]  ;;  %v9557_v56 = vadd.f32 %v3529_v28, %v3516_v23  ;;  %v7007_v28 = vld [vmem:[%s10783_s1 + $0xa14] sm:$0xf0] }
 0x155   :  { %3775 = vmatpush.bf16.msra.mxu1 %v5719_v34  ;;  %v3490_v34 = vadd.f32 %v3489_v24, %v3476_v59  ;;  %v5943_v52 = vor.u32 %v7047_v33, %v5942_v30  ;;  %v5798_v59 = vld [vmem:[%s10783_s1 + $0xa28] sm:$0xf]  ;;  %v7039_v33 = vld [vmem:[%s10783_s1 + $0xb14] sm:$0xf0] }
 0x156   :  { %3789 = vmatpush.bf16.msra.mxu2 %v5847_v37  ;;  %v5559_v37 = vor.u32 %v6951_v12, %v5558_v11  ;;  %v5543_v11 = vor.u32 %v6947_v49, %v5542_v48  ;;  %v5526_v12 = vld [vmem:[%s10783_s1 + $0x808] sm:$0xf]  ;;  %v7131_v49 = vld [vmem:[%s10783_s1 + $0xdf4] sm:$0xf0] }
 0x157   :  { %3803 = vmatpush.bf16.msra.mxu3 %v5975_v45  ;;  %v5815_v45 = vor.u32 %v7015_v20, %v5814_v2  ;;  %v3504_v9 = vadd.f32 %v3503_v55, %v3490_v34  ;;  %v6975_v2 = vld [vmem:[%s10783_s1 + $0x914] sm:$0xf0]  ;;  %v5782_v20 = vld [vmem:[%s10783_s1 + $0xa08] sm:$0xf]  ;;  %v5527_v48 = vor.u32 %v6943_v13, %v5526_v12 }
 0x158   :  { %3762 = vmatpush.bf16.msra.mxu0 %v5575_v3  ;;  %v7011_v3 = vld [vmem:[%s10783_s1 + $0xa34] sm:$0xf0]  ;;  %v5910_v30 = vld [vmem:[%s10783_s1 + $0xb08] sm:$0xf] }
 0x159   :  { %3776 = vmatpush.bf16.msra.mxu1 %v5703_v5  ;;  %v5926_v5 = vld [vmem:[%s10783_s1 + $0xb28] sm:$0xf]  ;;  %v5799_v15 = vor.u32 %v7011_v3, %v5798_v59  ;;  %v3517_v24 = vpop.f32.mrf.mxu2  ;;  %v5783_v59 = vor.u32 %v7007_v28, %v5782_v20  ;;  %v7127_v20 = vld [vmem:[%s10783_s1 + $0xdd4] sm:$0xf0] }
 0x15a   :  { %3790 = vmatpush.bf16.msra.mxu2 %v5831_v8  ;;  %v7043_v8 = vld [vmem:[%s10783_s1 + $0xb34] sm:$0xf0]  ;;  %v3518_v34 = vadd.f32 %v3517_v24, %v3504_v9  ;;  %v6150_v55 = vld [vmem:[%s10783_s1 + $0xce8] sm:$0xf] }
 0x15b   :  { %3804 = vmatpush.bf16.msra.mxu3 %v5959_v4  ;;  %v5671_v4 = vor.u32 %v6979_v57, %v5670_v50  ;;  %v5927_v23 = vor.u32 %v7043_v8, %v5926_v5  ;;  %v6406_v50 = vld [vmem:[%s10783_s1 + $0xee8] sm:$0xf]  ;;  %v5655_v57 = vor.u32 %v6975_v2, %v5654_v16  ;;  %v7195_v5 = vld [vmem:[%s10783_s1 + $0xff4] sm:$0xf0]  ;;  %v5911_v8 = vor.u32 %v7039_v33, %v5910_v30 }
 0x15c   :  { %3763 = vmatpush.bf16.msra.mxu0 %v5559_v37  ;;  %v3531_v37 = vpop.f32.mrf.mxu3  ;;  %v6534_v3 = vld [vmem:[%s10783_s1 + $0xfe8] sm:$0xf]  ;;  %v7159_v24 = vld [vmem:[%s10783_s1 + $0xed4] sm:$0xf0] }
 0x15d   :  { %3777 = vmatpush.bf16.msra.mxu1 %v5687_v42  ;;  %v7099_v42 = vld [vmem:[%s10783_s1 + $0xcf4] sm:$0xf0]  ;;  %v9625_v9 = vadd.f32 %v3531_v37, %v3518_v34  ;;  %v6262_v16 = vld [vmem:[%s10783_s1 + $0xdc8] sm:$0xf]  ;;  %v6535_v2 = vor.u32 %v7195_v5, %v6534_v3 }
 0x15e   :  { %3791 = vmatpush.bf16.msra.mxu2 %v5815_v45  ;;  %v6278_v45 = vld [vmem:[%s10783_s1 + $0xde8] sm:$0xf]  ;;  %v7191_v30 = vld [vmem:[%s10783_s1 + $0xfd4] sm:$0xf0]  ;;  %v6263_v34 = vor.u32 %v7127_v20, %v6262_v16 }
 0x15f   :  { %3805 = vmatpush.bf16.msra.mxu3 %v5943_v52  ;;  %v7163_v52 = vld [vmem:[%s10783_s1 + $0xef4] sm:$0xf0]  ;;  %v6279_v12 = vor.u32 %v7131_v49, %v6278_v45  ;;  %v6518_v28 = vld [vmem:[%s10783_s1 + $0xfc8] sm:$0xf] }
 0x160   :  { %3764 = vmatpush.bf16.msra.mxu0 %v5543_v11  ;;  %v6151_v11 = vor.u32 %v7099_v42, %v6150_v55  ;;  %v6407_v13 = vor.u32 %v7163_v52, %v6406_v50  ;;  %v6118_v55 = vld [vmem:[%s10783_s1 + $0xca8] sm:$0xf]  ;;  %v7091_v42 = vld [vmem:[%s10783_s1 + $0xcb4] sm:$0xf0] }
 0x161   :  { %3778 = vmatpush.bf16.msra.mxu1 %v5671_v4  ;;  %v6134_v4 = vld [vmem:[%s10783_s1 + $0xcc8] sm:$0xf]  ;;  %v7123_v49 = vld [vmem:[%s10783_s1 + $0xdb4] sm:$0xf0]  ;;  %v6119_v3 = vor.u32 %v7091_v42, %v6118_v55 }
 0x162   :  { %3792 = vmatpush.bf16.msra.mxu2 %v5799_v15  ;;  %v7095_v15 = vld [vmem:[%s10783_s1 + $0xcd4] sm:$0xf0]  ;;  %v6246_v45 = vld [vmem:[%s10783_s1 + $0xda8] sm:$0xf] }
 0x163   :  { %3806 = vmatpush.bf16.msra.mxu3 %v5927_v23  ;;  %v6390_v23 = vld [vmem:[%s10783_s1 + $0xec8] sm:$0xf]  ;;  %v6135_v33 = vor.u32 %v7095_v15, %v6134_v4  ;;  %v7155_v52 = vld [vmem:[%s10783_s1 + $0xeb4] sm:$0xf0]  ;;  %v6247_v5 = vor.u32 %v7123_v49, %v6246_v45 }
 0x164   :  { %3765 = vmatpush.bf16.msra.mxu0 %v5527_v48  ;;  %v6391_v37 = vor.u32 %v7159_v24, %v6390_v23  ;;  %v6519_v48 = vor.u32 %v7191_v30, %v6518_v28  ;;  %v6374_v50 = vld [vmem:[%s10783_s1 + $0xea8] sm:$0xf]  ;;  %v7119_v15 = vld [vmem:[%s10783_s1 + $0xd94] sm:$0xf0]  ;;  %v3543_v20 = vpop.f32.mrf.mxu0 }
 0x165   :  { %3779 = vmatpush.bf16.msra.mxu1 %v5655_v57  ;;  %v6502_v57 = vld [vmem:[%s10783_s1 + $0xfa8] sm:$0xf]  ;;  %v7183_v24 = vld [vmem:[%s10783_s1 + $0xf94] sm:$0xf0]  ;;  %v3544_v28 = vadd.f32 %v3543_v20, %v9557_v56 }
 0x166   :  { %3793 = vmatpush.bf16.msra.mxu2 %v5783_v59  ;;  %v7187_v59 = vld [vmem:[%s10783_s1 + $0xfb4] sm:$0xf0]  ;;  %v6358_v16 = vld [vmem:[%s10783_s1 + $0xe88] sm:$0xf] }
 0x167   :  { %3807 = vmatpush.bf16.msra.mxu3 %v5911_v8  ;;  %3766 = vmatmul.bf16.vlgmr.msra.gmra.mxu0 %v7966_v31  ;;  %v6375_v8 = vor.u32 %v7155_v52, %v6374_v50  ;;  %v6503_v4 = vor.u32 %v7187_v59, %v6502_v57  ;;  %v6486_v23 = vld [vmem:[%s10783_s1 + $0xf88] sm:$0xf]  ;;  %v7083_v42 = vld [vmem:[%s10783_s1 + $0xc74] sm:$0xf0] }
 0x168   :  { %3814 = vmatpush.bf16.msrb.mxu0 %v6151_v11  ;;  %3780 = vmatmul.bf16.vlgmr.msra.gmra.mxu1 %v7979_v36  ;;  %v6102_v11 = vld [vmem:[%s10783_s1 + $0xc88] sm:$0xf]  ;;  %v6487_v56 = vor.u32 %v7183_v24, %v6486_v23  ;;  %v7115_v49 = vld [vmem:[%s10783_s1 + $0xd74] sm:$0xf0] }
 0x169   :  { %3828 = vmatpush.bf16.msrb.mxu1 %v6279_v12  ;;  %3794 = vmatmul.bf16.vlgmr.msra.gmra.mxu2 %v7977_v35  ;;  %v7087_v12 = vld [vmem:[%s10783_s1 + $0xc94] sm:$0xf0]  ;;  %v6086_v55 = vld [vmem:[%s10783_s1 + $0xc68] sm:$0xf] }
 0x16a   :  { %3842 = vmatpush.bf16.msrb.mxu2 %v6407_v13  ;;  %3808 = vmatmul.bf16.vlgmr.msra.gmra.mxu3 %v7987_v40  ;;  %v6230_v13 = vld [vmem:[%s10783_s1 + $0xd88] sm:$0xf]  ;;  %v6103_v30 = vor.u32 %v7087_v12, %v6102_v11  ;;  %v7147_v52 = vld [vmem:[%s10783_s1 + $0xe74] sm:$0xf0] }
 0x16b   :  { %3856 = vmatpush.bf16.msrb.mxu3 %v6535_v2  ;;  %v7151_v2 = vld [vmem:[%s10783_s1 + $0xe94] sm:$0xf0]  ;;  %v6214_v45 = vld [vmem:[%s10783_s1 + $0xd68] sm:$0xf] }
 0x16c   :  { %3815 = vmatpush.bf16.msrb.mxu0 %v6135_v33  ;;  %v3557_v33 = vpop.f32.mrf.mxu1  ;;  %v6342_v50 = vld [vmem:[%s10783_s1 + $0xe68] sm:$0xf]  ;;  %v7179_v59 = vld [vmem:[%s10783_s1 + $0xf74] sm:$0xf0]  ;;  %v3545_v24 = vpop.f32.mrf.mxu0 }
 0x16d   :  { %3829 = vmatpush.bf16.msrb.mxu1 %v6263_v34  ;;  %v6231_v34 = vor.u32 %v7119_v15, %v6230_v13  ;;  %v6470_v57 = vld [vmem:[%s10783_s1 + $0xf68] sm:$0xf]  ;;  %v7079_v12 = vld [vmem:[%s10783_s1 + $0xc54] sm:$0xf0]  ;;  %v3571_v15 = vpop.f32.mrf.mxu2 }
 0x16e   :  { %3843 = vmatpush.bf16.msrb.mxu2 %v6391_v37  ;;  %v6359_v37 = vor.u32 %v7151_v2, %v6358_v16  ;;  %v6070_v11 = vld [vmem:[%s10783_s1 + $0xc48] sm:$0xf]  ;;  %v7111_v16 = vld [vmem:[%s10783_s1 + $0xd54] sm:$0xf0] }
 0x16f   :  { %3857 = vmatpush.bf16.msrb.mxu3 %v6519_v48  ;;  %v3558_v48 = vadd.f32 %v3557_v33, %v3544_v28  ;;  %v6198_v13 = vld [vmem:[%s10783_s1 + $0xd48] sm:$0xf]  ;;  %v7143_v20 = vld [vmem:[%s10783_s1 + $0xe54] sm:$0xf0]  ;;  %v3585_v28 = vpop.f32.mrf.mxu3 }
 0x170   :  { %3816 = vmatpush.bf16.msrb.mxu0 %v6119_v3  ;;  %v6087_v3 = vor.u32 %v7083_v42, %v6086_v55  ;;  %v6326_v2 = vld [vmem:[%s10783_s1 + $0xe48] sm:$0xf]  ;;  %v7175_v33 = vld [vmem:[%s10783_s1 + $0xf54] sm:$0xf0] }
 0x171   :  { %3830 = vmatpush.bf16.msrb.mxu1 %v6247_v5  ;;  %v6215_v5 = vor.u32 %v7115_v49, %v6214_v45  ;;  %v3572_v23 = vadd.f32 %v3571_v15, %v3558_v48  ;;  %v6199_v45 = vor.u32 %v7111_v16, %v6198_v13  ;;  %v6054_v48 = vld [vmem:[%s10783_s1 + $0xc28] sm:$0xf]  ;;  %v7075_v49 = vld [vmem:[%s10783_s1 + $0xc34] sm:$0xf0] }
 0x172   :  { %3844 = vmatpush.bf16.msrb.mxu2 %v6375_v8  ;;  %v6343_v8 = vor.u32 %v7147_v52, %v6342_v50  ;;  %v7071_v13 = vld [vmem:[%s10783_s1 + $0xc14] sm:$0xf0]  ;;  %v6166_v16 = vld [vmem:[%s10783_s1 + $0xd08] sm:$0xf] }
 0x173   :  { %3858 = vmatpush.bf16.msrb.mxu3 %v6503_v4  ;;  %v6471_v4 = vor.u32 %v7179_v59, %v6470_v57  ;;  %v9759_v42 = vadd.f32 %v3585_v28, %v3572_v23  ;;  %v7107_v57 = vld [vmem:[%s10783_s1 + $0xd34] sm:$0xf0]  ;;  %v6310_v59 = vld [vmem:[%s10783_s1 + $0xe28] sm:$0xf] }
 0x174   :  { %3817 = vmatpush.bf16.msrb.mxu0 %v6103_v30  ;;  %v6454_v30 = vld [vmem:[%s10783_s1 + $0xf48] sm:$0xf]  ;;  %v3559_v55 = vpop.f32.mrf.mxu1  ;;  %v7135_v28 = vld [vmem:[%s10783_s1 + $0xe14] sm:$0xf0] }
 0x175   :  { %3831 = vmatpush.bf16.msrb.mxu1 %v6231_v34  ;;  %v3546_v34 = vadd.f32 %v3545_v24, %v9625_v9  ;;  %v6182_v9 = vld [vmem:[%s10783_s1 + $0xd28] sm:$0xf]  ;;  %v6455_v50 = vor.u32 %v7175_v33, %v6454_v30  ;;  %v3573_v24 = vpop.f32.mrf.mxu2  ;;  %v7167_v33 = vld [vmem:[%s10783_s1 + $0xf14] sm:$0xf0] }
 0x176   :  { %3845 = vmatpush.bf16.msrb.mxu2 %v6359_v37  ;;  %v6071_v37 = vor.u32 %v7079_v12, %v6070_v11  ;;  %v6055_v11 = vor.u32 %v7075_v49, %v6054_v48  ;;  %v6038_v12 = vld [vmem:[%s10783_s1 + $0xc08] sm:$0xf]  ;;  %v4744_v49 = vld [vmem:[%s10783_s1 + $0x1f8] sm:$0xf0] }
 0x177   :  { %3859 = vmatpush.bf16.msrb.mxu3 %v6487_v56  ;;  %v6327_v56 = vor.u32 %v7143_v20, %v6326_v2  ;;  %v3560_v52 = vadd.f32 %v3559_v55, %v3546_v34  ;;  %v7103_v2 = vld [vmem:[%s10783_s1 + $0xd14] sm:$0xf0]  ;;  %v6294_v20 = vld [vmem:[%s10783_s1 + $0xe08] sm:$0xf]  ;;  %v6713_v55 = vld [vmem:[%s10783_s1 + $0xec] sm:$0xf]  ;;  %v6039_v48 = vor.u32 %v7071_v13, %v6038_v12 }
 0x178   :  { %3818 = vmatpush.bf16.msrb.mxu0 %v6087_v3  ;;  %v7139_v3 = vld [vmem:[%s10783_s1 + $0xe34] sm:$0xf0]  ;;  %v6422_v30 = vld [vmem:[%s10783_s1 + $0xf08] sm:$0xf] }
 0x179   :  { %3832 = vmatpush.bf16.msrb.mxu1 %v6215_v5  ;;  %v6438_v5 = vld [vmem:[%s10783_s1 + $0xf28] sm:$0xf]  ;;  %v6311_v15 = vor.u32 %v7139_v3, %v6310_v59  ;;  %v3574_v34 = vadd.f32 %v3573_v24, %v3560_v52  ;;  %v6295_v59 = vor.u32 %v7135_v28, %v6294_v20  ;;  %v6809_v3 = vld [vmem:[%s10783_s1 + $0x3ec] sm:$0xf]  ;;  %v4728_v20 = vld [vmem:[%s10783_s1 + $0x1d8] sm:$0xf0] }
 0x17a   :  { %3846 = vmatpush.bf16.msrb.mxu2 %v6343_v8  ;;  %v7171_v8 = vld [vmem:[%s10783_s1 + $0xf34] sm:$0xf0]  ;;  %v4856_v24 = vld [vmem:[%s10783_s1 + $0x2d8] sm:$0xf0]  ;;  %v6805_v28 = vld [vmem:[%s10783_s1 + $0x3cc] sm:$0xf] }
 0x17b   :  { %3860 = vmatpush.bf16.msrb.mxu3 %v6471_v4  ;;  %v6183_v4 = vor.u32 %v7107_v57, %v6182_v9  ;;  %v6439_v23 = vor.u32 %v7171_v8, %v6438_v5  ;;  %v6777_v9 = vld [vmem:[%s10783_s1 + $0x2ec] sm:$0xf]  ;;  %v6167_v57 = vor.u32 %v7103_v2, %v6166_v16  ;;  %v5000_v5 = vld [vmem:[%s10783_s1 + $0x3f8] sm:$0xf0]  ;;  %v6423_v8 = vor.u32 %v7167_v33, %v6422_v30 }
 0x17c   :  { %3819 = vmatpush.bf16.msrb.mxu0 %v6071_v37  ;;  %v3587_v37 = vpop.f32.mrf.mxu3  ;;  %v6741_v16 = vld [vmem:[%s10783_s1 + $0x1cc] sm:$0xf]  ;;  %v5003_v2 = vor.u32 %v6809_v3, %v5000_v5  ;;  %v4984_v30 = vld [vmem:[%s10783_s1 + $0x3d8] sm:$0xf0] }
 0x17d   :  { %3833 = vmatpush.bf16.msrb.mxu1 %v6199_v45  ;;  %v4616_v45 = vld [vmem:[%s10783_s1 + $0xf8] sm:$0xf0]  ;;  %v9827_v52 = vadd.f32 %v3587_v37, %v3574_v34  ;;  %v4731_v34 = vor.u32 %v6741_v16, %v4728_v20  ;;  %v6765_v16 = vld [vmem:[%s10783_s1 + $0x28c] sm:$0xf] }
 0x17e   :  { %3847 = vmatpush.bf16.msrb.mxu2 %v6327_v56  ;;  %v6745_v56 = vld [vmem:[%s10783_s1 + $0x1ec] sm:$0xf] }
 0x17f   :  { %3861 = vmatpush.bf16.msrb.mxu3 %v6455_v50  ;;  %v4872_v50 = vld [vmem:[%s10783_s1 + $0x2f8] sm:$0xf0]  ;;  %v4747_v12 = vor.u32 %v6745_v56, %v4744_v49  ;;  %v6737_v56 = vld [vmem:[%s10783_s1 + $0x1ac] sm:$0xf] }
 0x180   :  { %3820 = vmatpush.bf16.msrb.mxu0 %v6055_v11  ;;  %v4619_v11 = vor.u32 %v6713_v55, %v4616_v45  ;;  %v4875_v13 = vor.u32 %v6777_v9, %v4872_v50  ;;  %v6705_v55 = vld [vmem:[%s10783_s1 + $0xac] sm:$0xf]  ;;  %v4584_v45 = vld [vmem:[%s10783_s1 + $0xb8] sm:$0xf0] }
 0x181   :  { %3834 = vmatpush.bf16.msrb.mxu1 %v6183_v4  ;;  %v6709_v4 = vld [vmem:[%s10783_s1 + $0xcc] sm:$0xf]  ;;  %v4712_v49 = vld [vmem:[%s10783_s1 + $0x1b8] sm:$0xf0]  ;;  %v4587_v3 = vor.u32 %v6705_v55, %v4584_v45 }
 0x182   :  { %3848 = vmatpush.bf16.msrb.mxu2 %v6311_v15  ;;  %v4600_v15 = vld [vmem:[%s10783_s1 + $0xd8] sm:$0xf0]  ;;  %v6769_v9 = vld [vmem:[%s10783_s1 + $0x2ac] sm:$0xf]  ;;  %v4715_v5 = vor.u32 %v6737_v56, %v4712_v49 }
 0x183   :  { %3862 = vmatpush.bf16.msrb.mxu3 %v6439_v23  ;;  %v6773_v23 = vld [vmem:[%s10783_s1 + $0x2cc] sm:$0xf]  ;;  %v4603_v33 = vor.u32 %v6709_v4, %v4600_v15  ;;  %v4840_v50 = vld [vmem:[%s10783_s1 + $0x2b8] sm:$0xf0] }
 0x184   :  { %3821 = vmatpush.bf16.msrb.mxu0 %v6039_v48  ;;  %v4859_v37 = vor.u32 %v6773_v23, %v4856_v24  ;;  %v4987_v48 = vor.u32 %v6805_v28, %v4984_v30  ;;  %v4696_v15 = vld [vmem:[%s10783_s1 + $0x198] sm:$0xf0]  ;;  %v3599_v20 = vpop.f32.mrf.mxu0  ;;  %v6797_v23 = vld [vmem:[%s10783_s1 + $0x38c] sm:$0xf] }
 0x185   :  { %3835 = vmatpush.bf16.msrb.mxu1 %v6167_v57  ;;  %v6801_v57 = vld [vmem:[%s10783_s1 + $0x3ac] sm:$0xf]  ;;  %v4952_v24 = vld [vmem:[%s10783_s1 + $0x398] sm:$0xf0]  ;;  %v3600_v28 = vadd.f32 %v3599_v20, %v9759_v42 }
 0x186   :  { %3849 = vmatpush.bf16.msrb.mxu2 %v6295_v59  ;;  %v4968_v59 = vld [vmem:[%s10783_s1 + $0x3b8] sm:$0xf0]  ;;  %v6697_v55 = vld [vmem:[%s10783_s1 + $0x6c] sm:$0xf]  ;;  %v4955_v42 = vor.u32 %v6797_v23, %v4952_v24 }
 0x187   :  { %3863 = vmatpush.bf16.msrb.mxu3 %v6423_v8  ;;  %3822 = vmatmul.bf16.vlgmr.msrb.gmra.mxu0 %v8194_v32  ;;  %v4843_v8 = vor.u32 %v6769_v9, %v4840_v50  ;;  %v4971_v4 = vor.u32 %v6801_v57, %v4968_v59  ;;  %v4552_v45 = vld [vmem:[%s10783_s1 + $0x78] sm:$0xf0]  ;;  %v6729_v56 = vld [vmem:[%s10783_s1 + $0x16c] sm:$0xf] }
 0x188   :  { %3870 = vmatpush.bf16.msra.mxu0 %v4619_v11  ;;  %3836 = vmatmul.bf16.vlgmr.msrb.gmra.mxu1 %v8207_v41  ;;  %v6701_v11 = vld [vmem:[%s10783_s1 + $0x8c] sm:$0xf]  ;;  %v4680_v49 = vld [vmem:[%s10783_s1 + $0x178] sm:$0xf0] }
 0x189   :  { %3884 = vmatpush.bf16.msra.mxu1 %v4747_v12  ;;  %3850 = vmatmul.bf16.vlgmr.msrb.gmra.mxu2 %v8205_v38  ;;  %v4568_v12 = vld [vmem:[%s10783_s1 + $0x98] sm:$0xf0]  ;;  %v6761_v9 = vld [vmem:[%s10783_s1 + $0x26c] sm:$0xf] }
 0x18a   :  { %3898 = vmatpush.bf16.msra.mxu2 %v4875_v13  ;;  %3864 = vmatmul.bf16.vlgmr.msrb.gmra.mxu3 %v8215_v46  ;;  %v6733_v13 = vld [vmem:[%s10783_s1 + $0x18c] sm:$0xf]  ;;  %v4571_v30 = vor.u32 %v6701_v11, %v4568_v12  ;;  %v4808_v50 = vld [vmem:[%s10783_s1 + $0x278] sm:$0xf0] }
 0x18b   :  { %3912 = vmatpush.bf16.msra.mxu3 %v5003_v2  ;;  %v4824_v2 = vld [vmem:[%s10783_s1 + $0x298] sm:$0xf0]  ;;  %v6793_v57 = vld [vmem:[%s10783_s1 + $0x36c] sm:$0xf]  ;;  %v4811_v11 = vor.u32 %v6761_v9, %v4808_v50 }
 0x18c   :  { %3871 = vmatpush.bf16.msra.mxu0 %v4603_v33  ;;  %v3613_v33 = vpop.f32.mrf.mxu1  ;;  %v4936_v59 = vld [vmem:[%s10783_s1 + $0x378] sm:$0xf0]  ;;  %v3601_v24 = vpop.f32.mrf.mxu0 }
 0x18d   :  { %3885 = vmatpush.bf16.msra.mxu1 %v4731_v34  ;;  %v4699_v34 = vor.u32 %v6733_v13, %v4696_v15  ;;  %v4536_v12 = vld [vmem:[%s10783_s1 + $0x58] sm:$0xf0]  ;;  %v6725_v13 = vld [vmem:[%s10783_s1 + $0x14c] sm:$0xf]  ;;  %v4939_v15 = vor.u32 %v6793_v57, %v4936_v59 }
 0x18e   :  { %3899 = vmatpush.bf16.msra.mxu2 %v4859_v37  ;;  %v4827_v37 = vor.u32 %v6765_v16, %v4824_v2  ;;  %v3627_v16 = vpop.f32.mrf.mxu2  ;;  %v6757_v2 = vld [vmem:[%s10783_s1 + $0x24c] sm:$0xf]  ;;  %v4792_v20 = vld [vmem:[%s10783_s1 + $0x258] sm:$0xf0] }
 0x18f   :  { %3913 = vmatpush.bf16.msra.mxu3 %v4987_v48  ;;  %v3614_v48 = vadd.f32 %v3613_v33, %v3600_v28  ;;  %v3641_v28 = vpop.f32.mrf.mxu3  ;;  %v4920_v33 = vld [vmem:[%s10783_s1 + $0x358] sm:$0xf0]  ;;  %v6753_v57 = vld [vmem:[%s10783_s1 + $0x22c] sm:$0xf] }
 0x190   :  { %3872 = vmatpush.bf16.msra.mxu0 %v4587_v3  ;;  %v4555_v3 = vor.u32 %v6697_v55, %v4552_v45  ;;  %v3602_v55 = vadd.f32 %v3601_v24, %v9827_v52  ;;  %v4648_v52 = vld [vmem:[%s10783_s1 + $0x138] sm:$0xf0] }
 0x191   :  { %3886 = vmatpush.bf16.msra.mxu1 %v4715_v5  ;;  %v6693_v5 = vld [vmem:[%s10783_s1 + $0x4c] sm:$0xf]  ;;  %v3628_v23 = vadd.f32 %v3627_v16, %v3614_v48  ;;  %v4520_v48 = vld [vmem:[%s10783_s1 + $0x38] sm:$0xf0] }
 0x192   :  { %3900 = vmatpush.bf16.msra.mxu2 %v4843_v8  ;;  %v4683_v8 = vor.u32 %v6729_v56, %v4680_v49  ;;  %v4795_v56 = vor.u32 %v6757_v2, %v4792_v20  ;;  %v6721_v49 = vld [vmem:[%s10783_s1 + $0x12c] sm:$0xf]  ;;  %v4776_v59 = vld [vmem:[%s10783_s1 + $0x238] sm:$0xf0] }
 0x193   :  { %3914 = vmatpush.bf16.msra.mxu3 %v4971_v4  ;;  %v4664_v4 = vld [vmem:[%s10783_s1 + $0x158] sm:$0xf0]  ;;  %v9961_v45 = vadd.f32 %v3641_v28, %v3628_v23  ;;  %v6717_v16 = vld [vmem:[%s10783_s1 + $0x10c] sm:$0xf] }
 0x194   :  { %3873 = vmatpush.bf16.msra.mxu0 %v4571_v30  ;;  %v6789_v30 = vld [vmem:[%s10783_s1 + $0x34c] sm:$0xf]  ;;  %v3615_v50 = vpop.f32.mrf.mxu1  ;;  %v4632_v2 = vld [vmem:[%s10783_s1 + $0x118] sm:$0xf0] }
 0x195   :  { %3887 = vmatpush.bf16.msra.mxu1 %v4699_v34  ;;  %v4539_v34 = vor.u32 %v6693_v5, %v4536_v12  ;;  %v4923_v9 = vor.u32 %v6789_v30, %v4920_v33  ;;  %v4904_v5 = vld [vmem:[%s10783_s1 + $0x338] sm:$0xf0]  ;;  %v6749_v20 = vld [vmem:[%s10783_s1 + $0x20c] sm:$0xf] }
 0x196   :  { %3901 = vmatpush.bf16.msra.mxu2 %v4827_v37  ;;  %v4667_v37 = vor.u32 %v6725_v13, %v4664_v4  ;;  %v4504_v12 = vld [vmem:[%s10783_s1 + $0x18] sm:$0xf0]  ;;  %v3616_v13 = vadd.f32 %v3615_v50, %v3602_v55  ;;  %v4651_v4 = vor.u32 %v6721_v49, %v4648_v52  ;;  %v3629_v24 = vpop.f32.mrf.mxu2  ;;  %v6781_v30 = vld [vmem:[%s10783_s1 + $0x30c] sm:$0xf] }
 0x197   :  { %3915 = vmatpush.bf16.msra.mxu3 %v4955_v42  ;;  %v6689_v42 = vld [vmem:[%s10783_s1 + $0x2c] sm:$0xf]  ;;  %v4760_v28 = vld [vmem:[%s10783_s1 + $0x218] sm:$0xf0] }
 0x198   :  { %3874 = vmatpush.bf16.msra.mxu0 %v4555_v3  ;;  %v6785_v3 = vld [vmem:[%s10783_s1 + $0x32c] sm:$0xf]  ;;  %v4888_v33 = vld [vmem:[%s10783_s1 + $0x318] sm:$0xf0] }
 0x199   :  { %3888 = vmatpush.bf16.msra.mxu1 %v4683_v8  ;;  %v4523_v8 = vor.u32 %v6689_v42, %v4520_v48  ;;  %v4907_v23 = vor.u32 %v6785_v3, %v4904_v5  ;;  %v6841_v55 = vld [vmem:[%s10783_s1 + $0x4ec] sm:$0xf]  ;;  %v5256_v49 = vld [vmem:[%s10783_s1 + $0x5f8] sm:$0xf0] }
 0x19a   :  { %3902 = vmatpush.bf16.msra.mxu2 %v4811_v11  ;;  %v6685_v11 = vld [vmem:[%s10783_s1 + $0xc] sm:$0xf]  ;;  %v5384_v50 = vld [vmem:[%s10783_s1 + $0x6f8] sm:$0xf0] }
 0x19b   :  { %3916 = vmatpush.bf16.msra.mxu3 %v4939_v15  ;;  %v4779_v15 = vor.u32 %v6753_v57, %v4776_v59  ;;  %v6873_v42 = vld [vmem:[%s10783_s1 + $0x5ec] sm:$0xf]  ;;  %v4507_v48 = vor.u32 %v6685_v11, %v4504_v12  ;;  %v4635_v57 = vor.u32 %v6717_v16, %v4632_v2  ;;  %v4763_v59 = vor.u32 %v6749_v20, %v4760_v28  ;;  %v5512_v5 = vld [vmem:[%s10783_s1 + $0x7f8] sm:$0xf0] }
 0x19c   :  { %3875 = vmatpush.bf16.msra.mxu0 %v4539_v34  ;;  %v3630_v34 = vadd.f32 %v3629_v24, %v3616_v13  ;;  %v6937_v3 = vld [vmem:[%s10783_s1 + $0x7ec] sm:$0xf]  ;;  %v4095_v13 = vmax.f32 %v9961_v45, 0.0  ;;  %v5112_v2 = vld [vmem:[%s10783_s1 + $0x4d8] sm:$0xf0] }
 0x19d   :  { %3889 = vmatpush.bf16.msra.mxu1 %v4667_v37  ;;  %v3643_v37 = vpop.f32.mrf.mxu3  ;;  %v6837_v12 = vld [vmem:[%s10783_s1 + $0x4cc] sm:$0xf]  ;;  %v5240_v24 = vld [vmem:[%s10783_s1 + $0x5d8] sm:$0xf0] }
 0x19e   :  { %3903 = vmatpush.bf16.msra.mxu2 %v4795_v56  ;;  %v5128_v56 = vld [vmem:[%s10783_s1 + $0x4f8] sm:$0xf0]  ;;  %v3644_v52 = vadd.f32 %v3643_v37, %v3630_v34  ;;  %v6869_v20 = vld [vmem:[%s10783_s1 + $0x5cc] sm:$0xf]  ;;  %v5115_v37 = vor.u32 %v6837_v12, %v5112_v2 }
 0x19f   :  { %3917 = vmatpush.bf16.msra.mxu3 %v4923_v9  ;;  %v6905_v9 = vld [vmem:[%s10783_s1 + $0x6ec] sm:$0xf]  ;;  %v5131_v11 = vor.u32 %v6841_v55, %v5128_v56  ;;  %v5368_v28 = vld [vmem:[%s10783_s1 + $0x6d8] sm:$0xf0]  ;;  %v5243_v55 = vor.u32 %v6869_v20, %v5240_v24 }
 0x1a0   :  { %3876 = vmatpush.bf16.msra.mxu0 %v4523_v8  ;;  %v4891_v8 = vor.u32 %v6781_v30, %v4888_v33  ;;  %v5387_v16 = vor.u32 %v6905_v9, %v5384_v50  ;;  %v6901_v45 = vld [vmem:[%s10783_s1 + $0x6cc] sm:$0xf]  ;;  %v5496_v34 = vld [vmem:[%s10783_s1 + $0x7d8] sm:$0xf0] }
 0x1a1   :  { %3890 = vmatpush.bf16.msra.mxu1 %v4651_v4  ;;  %v4099_v4 = vmax.f32 %v3644_v52, 0.0  ;;  %v6933_v33 = vld [vmem:[%s10783_s1 + $0x7cc] sm:$0xf]  ;;  %v5371_v56 = vor.u32 %v6901_v45, %v5368_v28  ;;  %v5224_v50 = vld [vmem:[%s10783_s1 + $0x5b8] sm:$0xf0] }
 0x1a2   :  { %3904 = vmatpush.bf16.msra.mxu2 %v4779_v15  ;;  %v5259_v15 = vor.u32 %v6873_v42, %v5256_v49  ;;  %v6833_v42 = vld [vmem:[%s10783_s1 + $0x4ac] sm:$0xf]  ;;  %v5499_v9 = vor.u32 %v6933_v33, %v5496_v34  ;;  %v5080_v12 = vld [vmem:[%s10783_s1 + $0x498] sm:$0xf0] }
 0x1a3   :  { %3918 = vmatpush.bf16.msra.mxu3 %v4907_v23  ;;  %v5515_v23 = vor.u32 %v6937_v3, %v5512_v5  ;;  %v10054_v30 = vpack.c.bf16 %v4099_v4, %v4095_v13  ;;  %v6865_v49 = vld [vmem:[%s10783_s1 + $0x5ac] sm:$0xf]  ;;  %v5480_v3 = vld [vmem:[%s10783_s1 + $0x7b8] sm:$0xf0] }
 0x1a4   :  { %3877 = vmatpush.bf16.msra.mxu0 %v4507_v48  ;;  %v5096_v48 = vld [vmem:[%s10783_s1 + $0x4b8] sm:$0xf0]  ;;  %v6897_v52 = vld [vmem:[%s10783_s1 + $0x6ac] sm:$0xf] }
 0x1a5   :  { %3891 = vmatpush.bf16.msra.mxu1 %v4635_v57  ;;  %v5352_v57 = vld [vmem:[%s10783_s1 + $0x6b8] sm:$0xf0]  ;;  %v5099_v5 = vor.u32 %v6833_v42, %v5096_v48  ;;  %v6893_v13 = vld [vmem:[%s10783_s1 + $0x68c] sm:$0xf] }
 0x1a6   :  { %3905 = vmatpush.bf16.msra.mxu2 %v4763_v59  ;;  %v6929_v59 = vld [vmem:[%s10783_s1 + $0x7ac] sm:$0xf]  ;;  %v5336_v4 = vld [vmem:[%s10783_s1 + $0x698] sm:$0xf0] }
 0x1a7   :  { %3919 = vmatpush.bf16.msra.mxu3 %v4891_v8  ;;  %3878 = vmatmul.bf16.vlgmr.msra.gmra.mxu0 %v7516_v58  ;;  %v5227_v8 = vor.u32 %v6865_v49, %v5224_v50  ;;  %v5355_v58 = vor.u32 %v6897_v52, %v5352_v57  ;;  %v6825_v24 = vld [vmem:[%s10783_s1 + $0x46c] sm:$0xf]  ;;  %v5064_v45 = vld [vmem:[%s10783_s1 + $0x478] sm:$0xf0] }
 0x1a8   :  { %3926 = vmatpush.bf16.msrb.mxu0 %v5131_v11  ;;  %3892 = vmatmul.bf16.vlgmr.msra.gmra.mxu1 %v7552_v10  ;;  %v6829_v11 = vld [vmem:[%s10783_s1 + $0x48c] sm:$0xf]  ;;  %v5483_v10 = vor.u32 %v6929_v59, %v5480_v3  ;;  %v5192_v34 = vld [vmem:[%s10783_s1 + $0x578] sm:$0xf0]  ;;  %v5067_v48 = vor.u32 %v6825_v24, %v5064_v45 }
 0x1a9   :  { %3940 = vmatpush.bf16.msrb.mxu1 %v5259_v15  ;;  %3906 = vmatmul.bf16.vlgmr.msra.gmra.mxu2 %v7530_v1  ;;  %v6861_v1 = vld [vmem:[%s10783_s1 + $0x58c] sm:$0xf]  ;;  %v5083_v2 = vor.u32 %v6829_v11, %v5080_v12  ;;  %v5448_v42 = vld [vmem:[%s10783_s1 + $0x778] sm:$0xf0] }
 0x1aa   :  { %3954 = vmatpush.bf16.msrb.mxu2 %v5387_v16  ;;  %3920 = vmatmul.bf16.vlgmr.msra.gmra.mxu3 %v7566_v17  ;;  %v5208_v17 = vld [vmem:[%s10783_s1 + $0x598] sm:$0xf0]  ;;  %v6925_v15 = vld [vmem:[%s10783_s1 + $0x78c] sm:$0xf] }
 0x1ab   :  { %3968 = vmatpush.bf16.msrb.mxu3 %v5515_v23  ;;  %v5464_v16 = vld [vmem:[%s10783_s1 + $0x798] sm:$0xf0]  ;;  %v5211_v20 = vor.u32 %v6861_v1, %v5208_v17  ;;  %v5339_v23 = vor.u32 %v6893_v13, %v5336_v4  ;;  %v6857_v28 = vld [vmem:[%s10783_s1 + $0x56c] sm:$0xf] }
 0x1ac   :  { %3927 = vmatpush.bf16.msrb.mxu0 %v5115_v37  ;;  %v5467_v33 = vor.u32 %v6925_v15, %v5464_v16  ;;  %v6889_v37 = vld [vmem:[%s10783_s1 + $0x66c] sm:$0xf]  ;;  %v5195_v49 = vor.u32 %v6857_v28, %v5192_v34  ;;  %v5048_v52 = vld [vmem:[%s10783_s1 + $0x458] sm:$0xf0] }
 0x1ad   :  { %3941 = vmatpush.bf16.msrb.mxu1 %v5243_v55  ;;  %v5320_v55 = vld [vmem:[%s10783_s1 + $0x678] sm:$0xf0]  ;;  %v6821_v50 = vld [vmem:[%s10783_s1 + $0x44c] sm:$0xf] }
 0x1ae   :  { %3955 = vmatpush.bf16.msrb.mxu2 %v5371_v56  ;;  %v6921_v56 = vld [vmem:[%s10783_s1 + $0x76c] sm:$0xf]  ;;  %v5176_v3 = vld [vmem:[%s10783_s1 + $0x558] sm:$0xf0]  ;;  %v5051_v12 = vor.u32 %v6821_v50, %v5048_v52 }
 0x1af   :  { %3969 = vmatpush.bf16.msrb.mxu3 %v5499_v9  ;;  %v5323_v9 = vor.u32 %v6889_v37, %v5320_v55  ;;  %v6853_v57 = vld [vmem:[%s10783_s1 + $0x54c] sm:$0xf]  ;;  %v5451_v59 = vor.u32 %v6921_v56, %v5448_v42  ;;  %v5432_v11 = vld [vmem:[%s10783_s1 + $0x758] sm:$0xf0] }
 0x1b0   :  { %3928 = vmatpush.bf16.msrb.mxu0 %v5099_v5  ;;  %v6885_v5 = vld [vmem:[%s10783_s1 + $0x64c] sm:$0xf]  ;;  %v5179_v1 = vor.u32 %v6853_v57, %v5176_v3  ;;  %v5032_v13 = vld [vmem:[%s10783_s1 + $0x438] sm:$0xf0] }
 0x1b1   :  { %3942 = vmatpush.bf16.msrb.mxu1 %v5227_v8  ;;  %v5304_v8 = vld [vmem:[%s10783_s1 + $0x658] sm:$0xf0]  ;;  %v6817_v17 = vld [vmem:[%s10783_s1 + $0x42c] sm:$0xf] }
 0x1b2   :  { %3956 = vmatpush.bf16.msrb.mxu2 %v5355_v58  ;;  %v6917_v58 = vld [vmem:[%s10783_s1 + $0x74c] sm:$0xf]  ;;  %v5160_v16 = vld [vmem:[%s10783_s1 + $0x538] sm:$0xf0]  ;;  %v5035_v45 = vor.u32 %v6817_v17, %v5032_v13 }
 0x1b3   :  { %3970 = vmatpush.bf16.msrb.mxu3 %v5483_v10  ;;  %v5307_v10 = vor.u32 %v6885_v5, %v5304_v8  ;;  %v6849_v4 = vld [vmem:[%s10783_s1 + $0x52c] sm:$0xf]  ;;  %v5435_v15 = vor.u32 %v6917_v58, %v5432_v11  ;;  %v5416_v24 = vld [vmem:[%s10783_s1 + $0x738] sm:$0xf0] }
 0x1b4   :  { %3929 = vmatpush.bf16.msrb.mxu0 %v5083_v2  ;;  %v6881_v2 = vld [vmem:[%s10783_s1 + $0x62c] sm:$0xf]  ;;  %v5163_v34 = vor.u32 %v6849_v4, %v5160_v16  ;;  %v5144_v56 = vld [vmem:[%s10783_s1 + $0x518] sm:$0xf0] }
 0x1b5   :  { %3943 = vmatpush.bf16.msrb.mxu1 %v5211_v20  ;;  %v5288_v20 = vld [vmem:[%s10783_s1 + $0x638] sm:$0xf0]  ;;  %v6813_v28 = vld [vmem:[%s10783_s1 + $0x40c] sm:$0xf] }
 0x1b6   :  { %3957 = vmatpush.bf16.msrb.mxu2 %v5339_v23  ;;  %v6913_v23 = vld [vmem:[%s10783_s1 + $0x72c] sm:$0xf]  ;;  %v5291_v37 = vor.u32 %v6881_v2, %v5288_v20  ;;  %v5400_v50 = vld [vmem:[%s10783_s1 + $0x718] sm:$0xf0] }
 0x1b7   :  { %3971 = vmatpush.bf16.msrb.mxu3 %v5467_v33  ;;  %v5016_v33 = vld [vmem:[%s10783_s1 + $0x418] sm:$0xf0]  ;;  %v6845_v55 = vld [vmem:[%s10783_s1 + $0x50c] sm:$0xf] }
 0x1b8   :  { %3930 = vmatpush.bf16.msrb.mxu0 %v5067_v48  ;;  %v6877_v42 = vld [vmem:[%s10783_s1 + $0x60c] sm:$0xf]  ;;  %v5419_v48 = vor.u32 %v6913_v23, %v5416_v24  ;;  %v5640_v57 = vld [vmem:[%s10783_s1 + $0x8f8] sm:$0xf0]  ;;  %v5019_v3 = vor.u32 %v6813_v28, %v5016_v33  ;;  %v5147_v11 = vor.u32 %v6845_v55, %v5144_v56 }
 0x1b9   :  { %3944 = vmatpush.bf16.msrb.mxu1 %v5195_v49  ;;  %v5272_v49 = vld [vmem:[%s10783_s1 + $0x618] sm:$0xf0]  ;;  %v6969_v52 = vld [vmem:[%s10783_s1 + $0x8ec] sm:$0xf] }
 0x1ba   :  { %3958 = vmatpush.bf16.msrb.mxu2 %v5323_v9  ;;  %v6909_v9 = vld [vmem:[%s10783_s1 + $0x70c] sm:$0xf]  ;;  %v5768_v5 = vld [vmem:[%s10783_s1 + $0x9f8] sm:$0xf0]  ;;  %v5643_v13 = vor.u32 %v6969_v52, %v5640_v57 }
 0x1bb   :  { %3972 = vmatpush.bf16.msrb.mxu3 %v5451_v59  ;;  %v7001_v59 = vld [vmem:[%s10783_s1 + $0x9ec] sm:$0xf]  ;;  %v5896_v58 = vld [vmem:[%s10783_s1 + $0xaf8] sm:$0xf0]  ;;  %v5403_v17 = vor.u32 %v6909_v9, %v5400_v50 }
 0x1bc   :  { %3931 = vmatpush.bf16.msrb.mxu0 %v5051_v12  ;;  %v7033_v8 = vld [vmem:[%s10783_s1 + $0xaec] sm:$0xf]  ;;  %v5275_v12 = vor.u32 %v6877_v42, %v5272_v49  ;;  %v5771_v4 = vor.u32 %v7001_v59, %v5768_v5  ;;  %v5624_v2 = vld [vmem:[%s10783_s1 + $0x8d8] sm:$0xf0] }
 0x1bd   :  { %3945 = vmatpush.bf16.msrb.mxu1 %v5179_v1  ;;  %v7065_v1 = vld [vmem:[%s10783_s1 + $0xbec] sm:$0xf]  ;;  %v5752_v24 = vld [vmem:[%s10783_s1 + $0x9d8] sm:$0xf0] }
 0x1be   :  { %3959 = vmatpush.bf16.msrb.mxu2 %v5307_v10  ;;  %v6024_v10 = vld [vmem:[%s10783_s1 + $0xbf8] sm:$0xf0]  ;;  %v6965_v16 = vld [vmem:[%s10783_s1 + $0x8cc] sm:$0xf] }
 0x1bf   :  { %3973 = vmatpush.bf16.msrb.mxu3 %v5435_v15  ;;  %v5899_v15 = vor.u32 %v7033_v8, %v5896_v58  ;;  %v6997_v20 = vld [vmem:[%s10783_s1 + $0x9cc] sm:$0xf]  ;;  %v6027_v23 = vor.u32 %v7065_v1, %v6024_v10  ;;  %v5880_v28 = vld [vmem:[%s10783_s1 + $0xad8] sm:$0xf0] }
 0x1c0   :  { %3932 = vmatpush.bf16.msrb.mxu0 %v5035_v45  ;;  %v7029_v45 = vld [vmem:[%s10783_s1 + $0xacc] sm:$0xf]  ;;  %v5755_v55 = vor.u32 %v6997_v20, %v5752_v24  ;;  %v5736_v50 = vld [vmem:[%s10783_s1 + $0x9b8] sm:$0xf0] }
 0x1c1   :  { %3946 = vmatpush.bf16.msrb.mxu1 %v5163_v34  ;;  %v7061_v33 = vld [vmem:[%s10783_s1 + $0xbcc] sm:$0xf]  ;;  %v6008_v34 = vld [vmem:[%s10783_s1 + $0xbd8] sm:$0xf0]  ;;  %v5883_v56 = vor.u32 %v7029_v45, %v5880_v28 }
 0x1c2   :  { %3960 = vmatpush.bf16.msrb.mxu2 %v5291_v37  ;;  %v5627_v37 = vor.u32 %v6965_v16, %v5624_v2  ;;  %v6961_v42 = vld [vmem:[%s10783_s1 + $0x8ac] sm:$0xf]  ;;  %v6011_v9 = vor.u32 %v7061_v33, %v6008_v34  ;;  %v5864_v57 = vld [vmem:[%s10783_s1 + $0xab8] sm:$0xf0]  ;;  %v10328_v33 = vpop.f32.mrf.mxu0 }
 0x1c3   :  { %3974 = vmatpush.bf16.msrb.mxu3 %v5419_v48  ;;  %v5608_v48 = vld [vmem:[%s10783_s1 + $0x8b8] sm:$0xf0]  ;;  %v6993_v49 = vld [vmem:[%s10783_s1 + $0x9ac] sm:$0xf] }
 0x1c4   :  { %3933 = vmatpush.bf16.msrb.mxu0 %v5019_v3  ;;  %v7025_v52 = vld [vmem:[%s10783_s1 + $0xaac] sm:$0xf]  ;;  %v5992_v59 = vld [vmem:[%s10783_s1 + $0xbb8] sm:$0xf0]  ;;  %v5611_v3 = vor.u32 %v6961_v42, %v5608_v48  ;;  %v5739_v5 = vor.u32 %v6993_v49, %v5736_v50 }
 0x1c5   :  { %3947 = vmatpush.bf16.msrb.mxu1 %v5147_v11  ;;  %v5867_v8 = vor.u32 %v7025_v52, %v5864_v57  ;;  %v6989_v58 = vld [vmem:[%s10783_s1 + $0x98c] sm:$0xf]  ;;  %v5720_v11 = vld [vmem:[%s10783_s1 + $0x998] sm:$0xf0] }
 0x1c6   :  { %3961 = vmatpush.bf16.msrb.mxu2 %v5275_v12  ;;  %v7021_v12 = vld [vmem:[%s10783_s1 + $0xa8c] sm:$0xf]  ;;  %v5848_v1 = vld [vmem:[%s10783_s1 + $0xa98] sm:$0xf0] }
 0x1c7   :  { %3975 = vmatpush.bf16.msrb.mxu3 %v5403_v17  ;;  %3934 = vmatmul.bf16.vlgmr.msrb.gmra.mxu0 %v7738_v39  ;;  %v7057_v39 = vld [vmem:[%s10783_s1 + $0xbac] sm:$0xf]  ;;  %v5976_v17 = vld [vmem:[%s10783_s1 + $0xb98] sm:$0xf0] }
 0x1c8   :  { %3982 = vmatpush.bf16.msra.mxu0 %v5643_v13  ;;  %3948 = vmatmul.bf16.vlgmr.msrb.gmra.mxu1 %v7751_v44  ;;  %v5592_v44 = vld [vmem:[%s10783_s1 + $0x898] sm:$0xf0]  ;;  %v7053_v10 = vld [vmem:[%s10783_s1 + $0xb8c] sm:$0xf] }
 0x1c9   :  { %3996 = vmatpush.bf16.msra.mxu1 %v5771_v4  ;;  %3962 = vmatmul.bf16.vlgmr.msrb.gmra.mxu2 %v7749_v43  ;;  %v6957_v43 = vld [vmem:[%s10783_s1 + $0x88c] sm:$0xf]  ;;  %v5723_v4 = vor.u32 %v6989_v58, %v5720_v11  ;;  %v5576_v2 = vld [vmem:[%s10783_s1 + $0x878] sm:$0xf0] }
 0x1ca   :  { %4010 = vmatpush.bf16.msra.mxu2 %v5899_v15  ;;  %3976 = vmatmul.bf16.vlgmr.msrb.gmra.mxu3 %v7759_v47  ;;  %v5995_v47 = vor.u32 %v7057_v39, %v5992_v59  ;;  %v5595_v13 = vor.u32 %v6957_v43, %v5592_v44  ;;  %v5851_v15 = vor.u32 %v7021_v12, %v5848_v1  ;;  %v6953_v16 = vld [vmem:[%s10783_s1 + $0x86c] sm:$0xf]  ;;  %v5704_v24 = vld [vmem:[%s10783_s1 + $0x978] sm:$0xf0]  ;;  %v10371_v12 = vpop.f32.mrf.mxu2 }
 0x1cb   :  { %4024 = vmatpush.bf16.msra.mxu3 %v6027_v23  ;;  %v6985_v20 = vld [vmem:[%s10783_s1 + $0x96c] sm:$0xf]  ;;  %v5979_v23 = vor.u32 %v7053_v10, %v5976_v17  ;;  %v5832_v28 = vld [vmem:[%s10783_s1 + $0xa78] sm:$0xf0] }
 0x1cc   :  { %3983 = vmatpush.bf16.msra.mxu0 %v5627_v37  ;;  %v7017_v45 = vld [vmem:[%s10783_s1 + $0xa6c] sm:$0xf]  ;;  %v5960_v37 = vld [vmem:[%s10783_s1 + $0xb78] sm:$0xf0]  ;;  %v5707_v42 = vor.u32 %v6985_v20, %v5704_v24  ;;  %v10396_v24 = vpop.f32.mrf.mxu0 }
 0x1cd   :  { %3997 = vmatpush.bf16.msra.mxu1 %v5755_v55  ;;  %v7049_v34 = vld [vmem:[%s10783_s1 + $0xb6c] sm:$0xf]  ;;  %v10336_v55 = vpop.f32.mrf.mxu1  ;;  %v5835_v48 = vor.u32 %v7017_v45, %v5832_v28  ;;  %v5688_v57 = vld [vmem:[%s10783_s1 + $0x958] sm:$0xf0] }
 0x1ce   :  { %4011 = vmatpush.bf16.msra.mxu2 %v5883_v56  ;;  %v5579_v56 = vor.u32 %v6953_v16, %v5576_v2  ;;  %v6949_v49 = vld [vmem:[%s10783_s1 + $0x84c] sm:$0xf]  ;;  %v5963_v52 = vor.u32 %v7049_v34, %v5960_v37  ;;  %v5816_v59 = vld [vmem:[%s10783_s1 + $0xa58] sm:$0xf0] }
 0x1cf   :  { %4025 = vmatpush.bf16.msra.mxu3 %v6011_v9  ;;  %v5560_v9 = vld [vmem:[%s10783_s1 + $0x858] sm:$0xf0]  ;;  %v6981_v50 = vld [vmem:[%s10783_s1 + $0x94c] sm:$0xf] }
 0x1d0   :  { %3984 = vmatpush.bf16.msra.mxu0 %v5611_v3  ;;  %v7013_v39 = vld [vmem:[%s10783_s1 + $0xa4c] sm:$0xf]  ;;  %v5691_v43 = vor.u32 %v6981_v50, %v5688_v57  ;;  %v5672_v10 = vld [vmem:[%s10783_s1 + $0x938] sm:$0xf0] }
 0x1d1   :  { %3998 = vmatpush.bf16.msra.mxu1 %v5739_v5  ;;  %v7045_v3 = vld [vmem:[%s10783_s1 + $0xb4c] sm:$0xf]  ;;  %v5944_v5 = vld [vmem:[%s10783_s1 + $0xb58] sm:$0xf0]  ;;  %v5819_v44 = vor.u32 %v7013_v39, %v5816_v59 }
 0x1d2   :  { %4012 = vmatpush.bf16.msra.mxu2 %v5867_v8  ;;  %v5563_v8 = vor.u32 %v6949_v49, %v5560_v9  ;;  %v6945_v58 = vld [vmem:[%s10783_s1 + $0x82c] sm:$0xf]  ;;  %v5947_v1 = vor.u32 %v7045_v3, %v5944_v5  ;;  %v5928_v16 = vld [vmem:[%s10783_s1 + $0xb38] sm:$0xf0] }
 0x1d3   :  { %4026 = vmatpush.bf16.msra.mxu3 %v5995_v47  ;;  %v5544_v47 = vld [vmem:[%s10783_s1 + $0x838] sm:$0xf0]  ;;  %v6977_v11 = vld [vmem:[%s10783_s1 + $0x92c] sm:$0xf] }
 0x1d4   :  { %3985 = vmatpush.bf16.msra.mxu0 %v5595_v13  ;;  %v7009_v17 = vld [vmem:[%s10783_s1 + $0xa2c] sm:$0xf]  ;;  %v5800_v13 = vld [vmem:[%s10783_s1 + $0xa38] sm:$0xf0]  ;;  %v5547_v2 = vor.u32 %v6945_v58, %v5544_v47  ;;  %v5675_v45 = vor.u32 %v6977_v11, %v5672_v10  ;;  %v10445_v11 = vld [vmem:[%s10785_s2] sm:$0xf] }
 0x1d5   :  { %3999 = vmatpush.bf16.msra.mxu1 %v5723_v4  ;;  %v10382_v4 = vpop.f32.mrf.mxu3  ;;  %v6941_v20 = vld [vmem:[%s10783_s1 + $0x80c] sm:$0xf]  ;;  %v5803_v28 = vor.u32 %v7009_v17, %v5800_v13  ;;  %v5656_v37 = vld [vmem:[%s10783_s1 + $0x918] sm:$0xf0] }
 0x1d6   :  { %4013 = vmatpush.bf16.msra.mxu2 %v5851_v15  ;;  %v7041_v15 = vld [vmem:[%s10783_s1 + $0xb2c] sm:$0xf]  ;;  %v5784_v49 = vld [vmem:[%s10783_s1 + $0xa18] sm:$0xf0] }
 0x1d7   :  { %4027 = vmatpush.bf16.msra.mxu3 %v5979_v23  ;;  %v5528_v23 = vld [vmem:[%s10783_s1 + $0x818] sm:$0xf0]  ;;  %v6973_v34 = vld [vmem:[%s10783_s1 + $0x90c] sm:$0xf] }
 0x1d8   :  { %3986 = vmatpush.bf16.msra.mxu0 %v5579_v56  ;;  %v7005_v56 = vld [vmem:[%s10783_s1 + $0xa0c] sm:$0xf]  ;;  %v5912_v50 = vld [vmem:[%s10783_s1 + $0xb18] sm:$0xf0]  ;;  %v5531_v59 = vor.u32 %v6941_v20, %v5528_v23  ;;  %v10457_v23 = vpop.f32.mrf.mxu2 }
 0x1d9   :  { %4000 = vmatpush.bf16.msra.mxu1 %v5707_v42  ;;  %v10407_v42 = vpop.f32.mrf.mxu1  ;;  %v7037_v9 = vld [vmem:[%s10783_s1 + $0xb0c] sm:$0xf]  ;;  %v6152_v57 = vld [vmem:[%s10783_s1 + $0xcf8] sm:$0xf0] }
 0x1da   :  { %4014 = vmatpush.bf16.msra.mxu2 %v5835_v48  ;;  %v5931_v48 = vor.u32 %v7041_v15, %v5928_v16  ;;  %v7129_v39 = vld [vmem:[%s10783_s1 + $0xdec] sm:$0xf]  ;;  %v6280_v3 = vld [vmem:[%s10783_s1 + $0xdf8] sm:$0xf0]  ;;  %v5915_v10 = vor.u32 %v7037_v9, %v5912_v50  ;;  %v3210_v50 = vadd.f32 %v8595_v51, %v550_v63 }
 0x1db   :  { %4028 = vmatpush.bf16.msra.mxu3 %v5963_v52  ;;  %v7097_v52 = vld [vmem:[%s10783_s1 + $0xcec] sm:$0xf]  ;;  %v6536_v47 = vld [vmem:[%s10783_s1 + $0xff8] sm:$0xf0]  ;;  %v6283_v13 = vor.u32 %v7129_v39, %v6280_v3 }
 0x1dc   :  { %3987 = vmatpush.bf16.msra.mxu0 %v5563_v8  ;;  %v7161_v5 = vld [vmem:[%s10783_s1 + $0xeec] sm:$0xf]  ;;  %v6408_v8 = vld [vmem:[%s10783_s1 + $0xef8] sm:$0xf0]  ;;  %v6155_v17 = vor.u32 %v7097_v52, %v6152_v57  ;;  %v10479_v52 = vpop.f32.mrf.mxu0 }
 0x1dd   :  { %4001 = vmatpush.bf16.msra.mxu1 %v5691_v43  ;;  %v5659_v43 = vor.u32 %v6973_v34, %v5656_v37  ;;  %v7193_v58 = vld [vmem:[%s10783_s1 + $0xfec] sm:$0xf]  ;;  %v6411_v15 = vor.u32 %v7161_v5, %v6408_v8  ;;  %v6392_v37 = vld [vmem:[%s10783_s1 + $0xed8] sm:$0xf0] }
 0x1de   :  { %4015 = vmatpush.bf16.msra.mxu2 %v5819_v44  ;;  %v5787_v44 = vor.u32 %v7005_v56, %v5784_v49  ;;  %v7093_v16 = vld [vmem:[%s10783_s1 + $0xccc] sm:$0xf]  ;;  %v10468_v56 = vpop.f32.mrf.mxu3  ;;  %v6520_v49 = vld [vmem:[%s10783_s1 + $0xfd8] sm:$0xf0] }
 0x1df   :  { %4029 = vmatpush.bf16.msra.mxu3 %v5947_v1  ;;  %v552_v1 = vperm.slane %v10445_v11, 2  ;;  %v7125_v20 = vld [vmem:[%s10783_s1 + $0xdcc] sm:$0xf]  ;;  %v6120_v3 = vld [vmem:[%s10783_s1 + $0xcb8] sm:$0xf0] }
 0x1e0   :  { %3988 = vmatpush.bf16.msra.mxu0 %v5547_v2  ;;  %v6136_v2 = vld [vmem:[%s10783_s1 + $0xcd8] sm:$0xf0]  ;;  %v7157_v34 = vld [vmem:[%s10783_s1 + $0xecc] sm:$0xf] }
 0x1e1   :  { %4002 = vmatpush.bf16.msra.mxu1 %v5675_v45  ;;  %v6539_v45 = vor.u32 %v7193_v58, %v6536_v47  ;;  %v6139_v9 = vor.u32 %v7093_v16, %v6136_v2  ;;  %v6395_v39 = vor.u32 %v7157_v34, %v6392_v37  ;;  %v3656_v63 = vadd.f32 %v10328_v33, %v552_v1  ;;  %v10491_v51 = vpop.f32.mrf.mxu1  ;;  %v6248_v8 = vld [vmem:[%s10783_s1 + $0xdb8] sm:$0xf0]  ;;  %v7149_v16 = vld [vmem:[%s10783_s1 + $0xe8c] sm:$0xf] }
 0x1e2   :  { %4016 = vmatpush.bf16.msra.mxu2 %v5803_v28  ;;  %v6264_v28 = vld [vmem:[%s10783_s1 + $0xdd8] sm:$0xf0]  ;;  %v3224_v47 = vadd.f32 %v8621_v0, %v3210_v50  ;;  %v7113_v50 = vld [vmem:[%s10783_s1 + $0xd6c] sm:$0xf] }
 0x1e3   :  { %4030 = vmatpush.bf16.msra.mxu3 %v5931_v48  ;;  %v7189_v48 = vld [vmem:[%s10783_s1 + $0xfcc] sm:$0xf]  ;;  %v6267_v57 = vor.u32 %v7125_v20, %v6264_v28  ;;  %v6504_v33 = vld [vmem:[%s10783_s1 + $0xfb8] sm:$0xf0]  ;;  %v3658_v20 = vadd.f32 %v10396_v24, %v552_v1  ;;  %v10539_v28 = vpop.f32.mrf.mxu2 }
 0x1e4   :  { %3989 = vmatpush.bf16.msra.mxu0 %v5531_v59  ;;  %v7089_v59 = vld [vmem:[%s10783_s1 + $0xcac] sm:$0xf]  ;;  %v6523_v5 = vor.u32 %v7189_v48, %v6520_v49  ;;  %v6360_v2 = vld [vmem:[%s10783_s1 + $0xe98] sm:$0xf0]  ;;  %v3238_v37 = vadd.f32 %v8651_v18, %v3224_v47 }
 0x1e5   :  { %4003 = vmatpush.bf16.msra.mxu1 %v5659_v43  ;;  %v7153_v43 = vld [vmem:[%s10783_s1 + $0xeac] sm:$0xf]  ;;  %v6123_v58 = vor.u32 %v7089_v59, %v6120_v3  ;;  %v6363_v24 = vor.u32 %v7149_v16, %v6360_v2  ;;  %v6344_v3 = vld [vmem:[%s10783_s1 + $0xe78] sm:$0xf0] }
 0x1e6   :  { %4017 = vmatpush.bf16.msra.mxu2 %v5787_v44  ;;  %v6376_v44 = vld [vmem:[%s10783_s1 + $0xeb8] sm:$0xf0]  ;;  %v10542_v48 = vpop.f32.mrf.mxu3  ;;  %v7081_v1 = vld [vmem:[%s10783_s1 + $0xc6c] sm:$0xf] }
 0x1e7   :  { %4031 = vmatpush.bf16.msra.mxu3 %v5915_v10  ;;  %3990 = vmatmul.bf16.vlgmr.msra.gmra.mxu0 %v7966_v31  ;;  %v7185_v31 = vld [vmem:[%s10783_s1 + $0xfac] sm:$0xf]  ;;  %v6251_v10 = vor.u32 %v7121_v54, %v6248_v8  ;;  %v3672_v54 = vadd.f32 %v10407_v42, %v3658_v20  ;;  %v6056_v20 = vld [vmem:[%s10783_s1 + $0xc38] sm:$0xf0] }
 0x1e8   :  { %4038 = vmatpush.bf16.msrb.mxu0 %v6155_v17  ;;  %4004 = vmatmul.bf16.vlgmr.msra.gmra.mxu1 %v7979_v36  ;;  %v7085_v36 = vld [vmem:[%s10783_s1 + $0xc8c] sm:$0xf]  ;;  %v6104_v17 = vld [vmem:[%s10783_s1 + $0xc98] sm:$0xf0]  ;;  %v6507_v0 = vor.u32 %v7185_v31, %v6504_v33 }
 0x1e9   :  { %4052 = vmatpush.bf16.msrb.mxu1 %v6283_v13  ;;  %4018 = vmatmul.bf16.vlgmr.msra.gmra.mxu2 %v7977_v35  ;;  %v6379_v35 = vor.u32 %v7153_v43, %v6376_v44  ;;  %v3670_v13 = vadd.f32 %v10336_v55, %v3656_v63  ;;  %v7181_v55 = vld [vmem:[%s10783_s1 + $0xf8c] sm:$0xf]  ;;  %v6107_v34 = vor.u32 %v7085_v36, %v6104_v17  ;;  %v10564_v63 = vpop.f32.mrf.mxu0  ;;  %v10572_v8 = vpop.f32.mrf.mxu1  ;;  %v6328_v17 = vld [vmem:[%s10783_s1 + $0xe58] sm:$0xf0] }
 0x1ea   :  { %4066 = vmatpush.bf16.msrb.mxu2 %v6411_v15  ;;  %4032 = vmatmul.bf16.vlgmr.msra.gmra.mxu3 %v7987_v40  ;;  %v7117_v40 = vld [vmem:[%s10783_s1 + $0xd8c] sm:$0xf]  ;;  %v6232_v15 = vld [vmem:[%s10783_s1 + $0xd98] sm:$0xf0]  ;;  %v3252_v44 = vadd.f32 %v8662_v25, %v3238_v37 }
 0x1eb   :  { %4080 = vmatpush.bf16.msrb.mxu3 %v6539_v45  ;;  %v6488_v45 = vld [vmem:[%s10783_s1 + $0xf98] sm:$0xf0]  ;;  %v6235_v49 = vor.u32 %v7117_v40, %v6232_v15  ;;  %v3684_v18 = vadd.f32 %v10371_v12, %v3670_v13  ;;  %v7145_v59 = vld [vmem:[%s10783_s1 + $0xe6c] sm:$0xf]  ;;  %v3686_v40 = vadd.f32 %v10457_v23, %v3672_v54 }
 0x1ec   :  { %4039 = vmatpush.bf16.msrb.mxu0 %v6139_v9  ;;  %v6088_v9 = vld [vmem:[%s10783_s1 + $0xc78] sm:$0xf0]  ;;  %v7177_v12 = vld [vmem:[%s10783_s1 + $0xf6c] sm:$0xf]  ;;  %v6347_v42 = vor.u32 %v7145_v59, %v6344_v3  ;;  %v3266_v15 = vadd.f32 %v8820_v26, %v3252_v44 }
 0x1ed   :  { %4053 = vmatpush.bf16.msrb.mxu1 %v6267_v57  ;;  %v6491_v57 = vor.u32 %v7181_v55, %v6488_v45  ;;  %v6091_v43 = vor.u32 %v7081_v1, %v6088_v9  ;;  %v7077_v33 = vld [vmem:[%s10783_s1 + $0xc4c] sm:$0xf]  ;;  %v6456_v13 = vld [vmem:[%s10783_s1 + $0xf58] sm:$0xf0]  ;;  %v3700_v1 = vadd.f32 %v10468_v56, %v3686_v40 }
 0x1ee   :  { %4067 = vmatpush.bf16.msrb.mxu2 %v6395_v39  ;;  %v6216_v39 = vld [vmem:[%s10783_s1 + $0xd78] sm:$0xf0]  ;;  %v7109_v47 = vld [vmem:[%s10783_s1 + $0xd4c] sm:$0xf]  ;;  %v3755_v9 = vpop.f32.mrf.mxu3  ;;  %v3280_v59 = vadd.f32 %v8828_v29, %v3266_v15 }
 0x1ef   :  { %4081 = vmatpush.bf16.msrb.mxu3 %v6523_v5  ;;  %v6472_v5 = vld [vmem:[%s10783_s1 + $0xf78] sm:$0xf0]  ;;  %v6219_v31 = vor.u32 %v7113_v50, %v6216_v39  ;;  %v7141_v36 = vld [vmem:[%s10783_s1 + $0xe4c] sm:$0xf] }
 0x1f0   :  { %4040 = vmatpush.bf16.msrb.mxu0 %v6123_v58  ;;  %v6072_v58 = vld [vmem:[%s10783_s1 + $0xc58] sm:$0xf0]  ;;  %v6475_v25 = vor.u32 %v7177_v12, %v6472_v5  ;;  %v6331_v2 = vor.u32 %v7141_v36, %v6328_v17  ;;  %v7073_v23 = vld [vmem:[%s10783_s1 + $0xc2c] sm:$0xf] }
 0x1f1   :  { %4054 = vmatpush.bf16.msrb.mxu1 %v6251_v10  ;;  %v3698_v10 = vadd.f32 %v10382_v4, %v3684_v18  ;;  %v7173_v4 = vld [vmem:[%s10783_s1 + $0xf4c] sm:$0xf]  ;;  %v6184_v37 = vld [vmem:[%s10783_s1 + $0xd38] sm:$0xf0]  ;;  %v3767_v50 = vpop.f32.mrf.mxu0  ;;  %v6059_v39 = vor.u32 %v7073_v23, %v6056_v20 }
 0x1f2   :  { %4068 = vmatpush.bf16.msrb.mxu2 %v6379_v35  ;;  %v6200_v35 = vld [vmem:[%s10783_s1 + $0xd58] sm:$0xf0]  ;;  %v7105_v55 = vld [vmem:[%s10783_s1 + $0xd2c] sm:$0xf]  ;;  %v6459_v26 = vor.u32 %v7173_v4, %v6456_v13 }
 0x1f3   :  { %4082 = vmatpush.bf16.msrb.mxu3 %v6507_v0  ;;  %v6075_v0 = vor.u32 %v7077_v33, %v6072_v58  ;;  %v6203_v16 = vor.u32 %v7109_v47, %v6200_v35  ;;  %v3712_v45 = vadd.f32 %v10479_v52, %v3698_v10  ;;  %v7169_v52 = vld [vmem:[%s10783_s1 + $0xf2c] sm:$0xf]  ;;  %v6440_v18 = vld [vmem:[%s10783_s1 + $0xf38] sm:$0xf0]  ;;  %v6187_v3 = vor.u32 %v7105_v55, %v6184_v37 }
 0x1f4   :  { %4041 = vmatpush.bf16.msrb.mxu0 %v6107_v34  ;;  %v3741_v34 = vpop.f32.mrf.mxu2  ;;  %v7069_v54 = vld [vmem:[%s10783_s1 + $0xc0c] sm:$0xf]  ;;  %v6040_v12 = vld [vmem:[%s10783_s1 + $0xc18] sm:$0xf0]  ;;  %v6443_v29 = vor.u32 %v7169_v52, %v6440_v18  ;;  %v3294_v33 = vadd.f32 %v8867_v62, %v3280_v59  ;;  %v3714_v58 = vadd.f32 %v10564_v63, %v3700_v1  ;;  %v7208_v52 = vld [vmem:[%s10786_s3 + $0x60] sm:$0xff] }
 0x1f5   :  { %4055 = vmatpush.bf16.msrb.mxu1 %v6235_v49  ;;  %v7137_v49 = vld [vmem:[%s10783_s1 + $0xe2c] sm:$0xf]  ;;  %v6168_v44 = vld [vmem:[%s10783_s1 + $0xd18] sm:$0xf0]  ;;  %v6043_v10 = vor.u32 %v7069_v54, %v6040_v12 }
 0x1f6   :  { %4069 = vmatpush.bf16.msrb.mxu2 %v6363_v24  ;;  %v6312_v24 = vld [vmem:[%s10783_s1 + $0xe38] sm:$0xf0]  ;;  %v7101_v5 = vld [vmem:[%s10783_s1 + $0xd0c] sm:$0xf]  ;;  %v3308_v40 = vadd.f32 %v8878_v6, %v3294_v33  ;;  %v3728_v4 = vadd.f32 %v10572_v8, %v3714_v58  ;;  %v3809_v13 = vpop.f32.mrf.mxu3  ;;  %v7202_v8 = vld [vmem:[%s10786_s3 + $0x30] sm:$0xff] }
 0x1f7   :  { %4083 = vmatpush.bf16.msrb.mxu3 %v6491_v57  ;;  %v10628_v57 = vpop.f32.mrf.mxu1  ;;  %v6315_v56 = vor.u32 %v7137_v49, %v6312_v24  ;;  %v6424_v47 = vld [vmem:[%s10783_s1 + $0xf18] sm:$0xf0]  ;;  %v7217_v49 = vld [vmem:[%s10786_s3 + $0xa8] sm:$0xff] }
 0x1f8   :  { %4042 = vmatpush.bf16.msrb.mxu0 %v6091_v43  ;;  %v3726_v43 = vadd.f32 %v10491_v51, %v3712_v45  ;;  %v7165_v51 = vld [vmem:[%s10783_s1 + $0xf0c] sm:$0xf]  ;;  %v7203_v63 = vld [vmem:[%s10786_s3 + $0x38] sm:$0xff]  ;;  %v3322_v15 = vadd.f32 %v9027_v14, %v3308_v40  ;;  %v7210_v14 = vld [vmem:[%s10786_s3 + $0x70] sm:$0xff] }
 0x1f9   :  { %4056 = vmatpush.bf16.msrb.mxu1 %v6219_v31  ;;  %v7133_v31 = vld [vmem:[%s10783_s1 + $0xe0c] sm:$0xf]  ;;  %v6427_v62 = vor.u32 %v7165_v51, %v6424_v47  ;;  %v7218_v45 = vld [vmem:[%s10786_s3 + $0xb0] sm:$0xff] }
 0x1fa   :  { %4070 = vmatpush.bf16.msrb.mxu2 %v6347_v42  ;;  %v6296_v42 = vld [vmem:[%s10783_s1 + $0xe18] sm:$0xf0]  ;;  %v3740_v36 = vadd.f32 %v10539_v28, %v3726_v43  ;;  %v3742_v28 = vadd.f32 %v3741_v34, %v3728_v4  ;;  %v7214_v51 = vld [vmem:[%s10786_s3 + $0x90] sm:$0xff] }
 0x1fb   :  { %4084 = vmatpush.bf16.msrb.mxu3 %v6475_v25  ;;  %v6171_v25 = vor.u32 %v7101_v5, %v6168_v44  ;;  %v6299_v35 = vor.u32 %v7133_v31, %v6296_v42  ;;  %v7198_v44 = vld [vmem:[%s10786_s3 + $0x10] sm:$0xff] }
 0x1fc   :  { %4043 = vmatpush.bf16.msrb.mxu0 %v6075_v0  ;;  %v3795_v17 = vpop.f32.mrf.mxu2  ;;  %v7211_v0 = vld [vmem:[%s10786_s3 + $0x78] sm:$0xff]  ;;  %v3754_v6 = vadd.f32 %v10542_v48, %v3740_v36  ;;  %v3336_v48 = vadd.f32 %v9035_v19, %v3322_v15  ;;  %v3756_v55 = vadd.f32 %v3755_v9, %v3742_v28  ;;  %v4094_v15 = vmax.f32 %v9142_v61, 0.0 }
 0x1fd   :  { %4057 = vmatpush.bf16.msrb.mxu1 %v6203_v16  ;;  %v3769_v16 = vpop.f32.mrf.mxu0 }
 0x1fe   :  { %4071 = vmatpush.bf16.msrb.mxu2 %v6331_v2  ;;  %v7219_v2 = vld [vmem:[%s10786_s3 + $0xb8] sm:$0xff]  ;;  %v3768_v20 = vadd.f32 %v3767_v50, %v3754_v6  ;;  %v3350_v34 = vadd.f32 %v9074_v53, %v3336_v48  ;;  %v7200_v53 = vld [vmem:[%s10786_s3 + $0x20] sm:$0xff] }
 0x1ff   :  { %4085 = vmatpush.bf16.msrb.mxu3 %v6459_v26  ;;  %v3783_v23 = vpop.f32.mrf.mxu1  ;;  %v3811_v26 = vpop.f32.mrf.mxu3 }
 0x200   :  { %4044 = vmatpush.bf16.msrb.mxu0 %v6059_v39  ;;  %v3364_v9 = vadd.f32 %v9085_v60, %v3350_v34  ;;  %v7216_v39 = vld [vmem:[%s10786_s3 + $0xa0] sm:$0xff]  ;;  %v7199_v60 = vld [vmem:[%s10786_s3 + $0x18] sm:$0xff]  ;;  %v553_v34 = vperm.slane %v10445_v11, 3 }
 0x201   :  { %4058 = vmatpush.bf16.msrb.mxu1 %v6187_v3  ;;  %v7207_v3 = vld [vmem:[%s10786_s3 + $0x58] sm:$0xff] }
 0x202   :  { %4072 = vmatpush.bf16.msrb.mxu2 %v6315_v56  ;;  %v3378_v18 = vadd.f32 %v9234_v22, %v3364_v9 }
 0x203   :  { %4086 = vmatpush.bf16.msrb.mxu3 %v6443_v29  ;;  %v7215_v29 = vld [vmem:[%s10786_s3 + $0x98] sm:$0xff] }
 0x204   :  { %4045 = vmatpush.bf16.msrb.mxu0 %v6043_v10  ;;  %v3797_v19 = vpop.f32.mrf.mxu2  ;;  %v3392_v22 = vadd.f32 %v9242_v27, %v3378_v18  ;;  %v7206_v27 = vld [vmem:[%s10786_s3 + $0x50] sm:$0xff]  ;;  %v7197_v10 = vld [vmem:[%s10786_s3 + $0x8] sm:$0xff]  ;;  %v7223_v18 = vld [vmem:[%s10786_s3 + $0xd8] sm:$0xff] }
 0x205   :  { %4059 = vmatpush.bf16.msrb.mxu1 %v6171_v25  ;;  %v3823_v37 = vpop.f32.mrf.mxu0 }
 0x206   :  { %4073 = vmatpush.bf16.msrb.mxu2 %v6299_v35  ;;  %v3406_v31 = vadd.f32 %v9287_v7, %v3392_v22  ;;  %v7205_v35 = vld [vmem:[%s10786_s3 + $0x48] sm:$0xff] }
 0x207   :  { %4087 = vmatpush.bf16.msrb.mxu3 %v6427_v62  ;;  %4046 = vmatmul.bf16.vlgmr.msrb.gmra.mxu0 %v8194_v32  ;;  %v7201_v32 = vld [vmem:[%s10786_s3 + $0x28] sm:$0xff]  ;;  %v3837_v1 = vpop.f32.mrf.mxu1 }
 0x208   :  { %4366 = vmatpush.bf16.msra.mxu0 %v7203_v63  ;;  %4060 = vmatmul.bf16.vlgmr.msrb.gmra.mxu1 %v8207_v41  ;;  %v3770_v41 = vadd.f32 %v3769_v16, %v3756_v55  ;;  %v3420_v7 = vadd.f32 %v9304_v21, %v3406_v31  ;;  %v7213_v63 = vld [vmem:[%s10786_s3 + $0x88] sm:$0xff]  ;;  %v7196_v21 = vld [vmem:[%s10786_s3] sm:$0xff] }
 0x209   :  { %4380 = vmatpush.bf16.msra.mxu1 %v7211_v0  ;;  %4074 = vmatmul.bf16.vlgmr.msrb.gmra.mxu2 %v8205_v38  ;;  %v7209_v38 = vld [vmem:[%s10786_s3 + $0x68] sm:$0xff]  ;;  %v7204_v0 = vld [vmem:[%s10786_s3 + $0x40] sm:$0xff] }
 0x20a   :  { %4088 = vmatmul.bf16.vlgmr.msrb.gmra.mxu3 %v8215_v46  ;;  %4394 = vmatpush.bf16.msra.mxu2 %v7219_v2  ;;  %v3782_v46 = vadd.f32 %v10628_v57, %v3768_v20  ;;  %v3784_v50 = vadd.f32 %v3783_v23, %v3770_v41  ;;  %v4098_v4 = vmax.f32 %v3420_v7, 0.0  ;;  %v7212_v16 = vld [vmem:[%s10786_s3 + $0x80] sm:$0xff] }
 0x20b   :  { %v7220_v31 = vld [vmem:[%s10786_s3 + $0xc0] sm:$0xff] }
 0x20c   :  { %4367 = vmatpush.bf16.msra.mxu0 %v7202_v8  ;;  %v3796_v24 = vadd.f32 %v3795_v17, %v3782_v46  ;;  %v3798_v57 = vadd.f32 %v3797_v19, %v3784_v50  ;;  %v3851_v54 = vpop.f32.mrf.mxu2  ;;  %v4102_v6 = vpack.c.bf16 %v4098_v4, %v4094_v15 }
 0x20d   :  { %4381 = vmatpush.bf16.msra.mxu1 %v7210_v14  ;;  %v3825_v5 = vpop.f32.mrf.mxu0  ;;  %v3865_v43 = vpop.f32.mrf.mxu3 }
 0x20e   :  { %4395 = vmatpush.bf16.msra.mxu2 %v7218_v45  ;;  %v3810_v59 = vadd.f32 %v3809_v13, %v3796_v24  ;;  %v3812_v12 = vadd.f32 %v3811_v26, %v3798_v57  ;;  %v7227_v45 = vld [vmem:[%s10786_s3 + $0xf8] sm:$0xff] }
 0x20f   :  { %v3839_v58 = vpop.f32.mrf.mxu1  ;;  %4408 = vmatpush.bf16.msra.mxu3 %v7227_v45 }
 0x210   :  { %4368 = vmatpush.bf16.msra.mxu0 %v7201_v32  ;;  %v3824_v56 = vadd.f32 %v3823_v37, %v3810_v59  ;;  %v3826_v42 = vadd.f32 %v3825_v5, %v3812_v12  ;;  %v7226_v32 = vld [vmem:[%s10786_s3 + $0xf0] sm:$0xff]  ;;  %v7225_v37 = vld [vmem:[%s10786_s3 + $0xe8] sm:$0xff] }
 0x211   :  { %4382 = vmatpush.bf16.msra.mxu1 %v7209_v38  ;;  %v7221_v5 = vld [vmem:[%s10786_s3 + $0xc8] sm:$0xff] }
 0x212   :  { %4396 = vmatpush.bf16.msra.mxu2 %v7217_v49  ;;  %v3838_v33 = vadd.f32 %v3837_v1, %v3824_v56  ;;  %v3840_v25 = vadd.f32 %v3839_v58, %v3826_v42 }
 0x213   :  { %4409 = vmatpush.bf16.msra.mxu3 %v7226_v32 }
 0x214   :  { %4369 = vmatpush.bf16.msra.mxu0 %v7200_v53  ;;  %v3852_v47 = vadd.f32 %v3851_v54, %v3838_v33  ;;  %v3853_v36 = vpop.f32.mrf.mxu2  ;;  %v7224_v53 = vld [vmem:[%s10786_s3 + $0xe0] sm:$0xff] }
 0x215   :  { %4383 = vmatpush.bf16.msra.mxu1 %v7208_v52  ;;  %v3854_v17 = vadd.f32 %v3853_v36, %v3840_v25  ;;  %v3867_v62 = vpop.f32.mrf.mxu3 }
 0x216   :  { %4397 = vmatpush.bf16.msra.mxu2 %v7216_v39  ;;  %v3866_v40 = vadd.f32 %v3865_v43, %v3852_v47 }
 0x217   :  { %v3868_v13 = vadd.f32 %v3867_v62, %v3854_v17  ;;  %4410 = vmatpush.bf16.msra.mxu3 %v7225_v37 }
 0x218   :  { %4370 = vmatpush.bf16.msra.mxu0 %v7199_v60  ;;  %v4096_v2 = vmax.f32 %v3866_v40, 0.0  ;;  %v7222_v60 = vld [vmem:[%s10786_s3 + $0xd0] sm:$0xff] }
 0x219   :  { %4384 = vmatpush.bf16.msra.mxu1 %v7207_v3  ;;  %v4100_v28 = vmax.f32 %v3868_v13, 0.0 }
 0x21a   :  { %4398 = vmatpush.bf16.msra.mxu2 %v7215_v29 }
 0x21b   :  { %v4104_v23 = vpack.c.bf16 %v4100_v28, %v4096_v2  ;;  %4411 = vmatpush.bf16.msra.mxu3 %v7224_v53 }
 0x21c   :  { %4371 = vmatpush.bf16.msra.mxu0 %v7198_v44 }
 0x21d   :  { %4385 = vmatpush.bf16.msra.mxu1 %v7206_v27 }
 0x21e   :  { %4399 = vmatpush.bf16.msra.mxu2 %v7214_v51 }
 0x21f   :  { %4412 = vmatpush.bf16.msra.mxu3 %v7223_v18 }
 0x220   :  { %4372 = vmatpush.bf16.msra.mxu0 %v7197_v10 }
 0x221   :  { %4386 = vmatpush.bf16.msra.mxu1 %v7205_v35 }
 0x222   :  { %4400 = vmatpush.bf16.msra.mxu2 %v7213_v63 }
 0x223   :  { %4413 = vmatpush.bf16.msra.mxu3 %v7222_v60 }
 0x224   :  { %4373 = vmatpush.bf16.msra.mxu0 %v7196_v21  ;;  %v3879_v8 = vpop.f32.mrf.mxu0 }
 0x225   :  { %4387 = vmatpush.bf16.msra.mxu1 %v7204_v0  ;;  %v3893_v14 = vpop.f32.mrf.mxu1  ;;  %v3880_v38 = vadd.f32 %v3879_v8, %v553_v34 }
 0x226   :  { %4401 = vmatpush.bf16.msra.mxu2 %v7212_v16 }
 0x227   :  { %4374 = vmatmul.bf16.vlgmr.msra.gmra.mxu0 %v4102_v6  ;;  %v3894_v26 = vadd.f32 %v3893_v14, %v3880_v38  ;;  %4414 = vmatpush.bf16.msra.mxu3 %v7221_v5 }
 0x228   :  { %4388 = vmatmul.bf16.vlgmr.msra.gmra.mxu1 %v10054_v30 }
 0x229   :  { %4402 = vmatmul.bf16.vlgmr.msra.gmra.mxu2 %v4104_v23 }
 0x22b   :  { %4415 = vmatpush.bf16.msra.mxu3 %v7220_v31 }
 0x22c   :  { %v3907_v20 = vpop.f32.mrf.mxu2  ;;  %v3881_v48 = vpop.f32.mrf.mxu0 }
 0x22d   :  { %v3921_v61 = vpop.f32.mrf.mxu3  ;;  %v3895_v55 = vpop.f32.mrf.mxu1  ;;  %v3882_v49 = vadd.f32 %v3881_v48, %v553_v34  ;;  %v3908_v1 = vadd.f32 %v3907_v20, %v3894_v26 }
 0x22f   :  { %v3896_v9 = vadd.f32 %v3895_v55, %v3882_v49  ;;  %v3922_v52 = vadd.f32 %v3921_v61, %v3908_v1 }
 0x234   :  { %v3909_v41 = vpop.f32.mrf.mxu2 }
 0x235   :  { %v3923_v30 = vpop.f32.mrf.mxu3  ;;  %v3910_v39 = vadd.f32 %v3909_v41, %v3896_v9 }
 0x237   :  { %v3924_v56 = vadd.f32 %v3923_v30, %v3910_v39 }
 0x244   :  { %v3935_v46 = vpop.f32.mrf.mxu0 }
 0x245   :  { %v3949_v19 = vpop.f32.mrf.mxu1  ;;  %v3936_v59 = vadd.f32 %v3935_v46, %v3922_v52 }
 0x247   :  { %v3950_v12 = vadd.f32 %v3949_v19, %v3936_v59  ;;  %v7228_v19 = vld [vmem:[%s10787_s4] ss:$0 sm:$0xff] }
 0x24c   :  { %v3963_v24 = vpop.f32.mrf.mxu2  ;;  %v3937_v50 = vpop.f32.mrf.mxu0 }
 0x24d   :  { %v3977_v11 = vpop.f32.mrf.mxu3  ;;  %v3951_v57 = vpop.f32.mrf.mxu1  ;;  %v3938_v29 = vadd.f32 %v3937_v50, %v3924_v56  ;;  %v3964_v44 = vadd.f32 %v3963_v24, %v3950_v12 }
 0x24f   :  { %v3952_v27 = vadd.f32 %v3951_v57, %v3938_v29  ;;  %v3978_v58 = vadd.f32 %v3977_v11, %v3964_v44 }
 0x254   :  { %v3965_v3 = vpop.f32.mrf.mxu2 }
 0x255   :  { %v3979_v54 = vpop.f32.mrf.mxu3  ;;  %v3966_v51 = vadd.f32 %v3965_v3, %v3952_v27 }
 0x257   :  { %v3980_v25 = vadd.f32 %v3979_v54, %v3966_v51 }
 0x264   :  { %v3991_v22 = vpop.f32.mrf.mxu0 }
 0x265   :  { %v4005_v43 = vpop.f32.mrf.mxu1  ;;  %v3992_v10 = vadd.f32 %v3991_v22, %v3978_v58 }
 0x267   :  { %v4006_v35 = vadd.f32 %v4005_v43, %v3992_v10 }
 0x26c   :  { %v4019_v42 = vpop.f32.mrf.mxu2  ;;  %v3993_v47 = vpop.f32.mrf.mxu0 }
 0x26d   :  { %v4033_v33 = vpop.f32.mrf.mxu3  ;;  %v4007_v7 = vpop.f32.mrf.mxu1  ;;  %v3994_v36 = vadd.f32 %v3993_v47, %v3980_v25  ;;  %v4020_v62 = vadd.f32 %v4019_v42, %v4006_v35 }
 0x26f   :  { %v4008_v21 = vadd.f32 %v4007_v7, %v3994_v36  ;;  %v4034_v13 = vadd.f32 %v4033_v33, %v4020_v62 }
 0x274   :  { %v4021_v17 = vpop.f32.mrf.mxu2 }
 0x275   :  { %v4035_v63 = vpop.f32.mrf.mxu3  ;;  %v4022_v0 = vadd.f32 %v4021_v17, %v4008_v21 }
 0x277   :  { %v4036_v16 = vadd.f32 %v4035_v63, %v4022_v0 }
 0x284   :  { %v4047_v40 = vpop.f32.mrf.mxu0 }
 0x285   :  { %v4061_v4 = vpop.f32.mrf.mxu1  ;;  %v4048_v15 = vadd.f32 %v4047_v40, %v4034_v13 }
 0x287   :  { %v4062_v23 = vadd.f32 %v4061_v4, %v4048_v15 }
 0x28c   :  { %v4075_v28 = vpop.f32.mrf.mxu2  ;;  %v4049_v6 = vpop.f32.mrf.mxu0 }
 0x28d   :  { %v4089_v2 = vpop.f32.mrf.mxu3  ;;  %v4050_v8 = vadd.f32 %v4049_v6, %v4036_v16  ;;  %v4076_v14 = vadd.f32 %v4075_v28, %v4062_v23  ;;  %v4063_v20 = vpop.f32.mrf.mxu1 }
 0x28f   :  { %v4064_v61 = vadd.f32 %v4063_v20, %v4050_v8  ;;  %v4090_v55 = vadd.f32 %v4089_v2, %v4076_v14 }
 0x291   :  { %v4097_v41 = vmax.f32 %v4090_v55, 0.0 }
 0x294   :  { %v4077_v48 = vpop.f32.mrf.mxu2 }
 0x295   :  { %v4078_v45 = vadd.f32 %v4077_v48, %v4064_v61  ;;  %v4091_v32 = vpop.f32.mrf.mxu3 }
 0x297   :  { %v4092_v34 = vadd.f32 %v4091_v32, %v4078_v45 }
 0x299   :  { %v4101_v30 = vmax.f32 %v4092_v34, 0.0 }
 0x29b   :  { %v4105_v38 = vpack.c.bf16 %v4101_v30, %v4097_v41 }
 0x29d   :  { %4416 = vmatmul.bf16.vlgmr.msra.gmra.mxu3 %v4105_v38 }
 0x2a4   :  { %v4375_v46 = vpop.f32.mrf.mxu0 }
 0x2a5   :  { %v4376_v26 = vadd.f32 %v7228_v19, %v4375_v46  ;;  %v4389_v37 = vpop.f32.mrf.mxu1 }
 0x2a7   :  { %v4390_v24 = vadd.f32 %v4389_v37, %v4376_v26 }
 0x2ac   :  { %v4403_v49 = vpop.f32.mrf.mxu2  ;;  %v4377_v53 = vpop.f32.mrf.mxu0 }
 0x2ad   :  { %v4404_v1 = vadd.f32 %v4403_v49, %v4390_v24  ;;  %v4378_v9 = vadd.f32 %v7228_v19, %v4377_v53  ;;  %v4391_v52 = vpop.f32.mrf.mxu1 }
 0x2af   :  { %v4392_v57 = vadd.f32 %v4391_v52, %v4378_v9 }
 0x2b4   :  { %v4405_v18 = vpop.f32.mrf.mxu2 }
 0x2b5   :  { %v4406_v39 = vadd.f32 %v4405_v18, %v4392_v57 }
 0x320   :  { %v4417_v11 = vpop.f32.mrf.mxu3 }
 0x321   :  { %v4418_v50 = vadd.f32 %v4417_v11, %v4404_v1 }
 0x323   :  { %4422 = vst [vmem:[%s10788_s5] sm:$0xff] %v4418_v50 }
 0x328   :  { %v4419_v59 = vpop.f32.mrf.mxu3 }
 0x329   :  { %v4420_v60 = vadd.f32 %v4419_v59, %v4406_v39 }
 0x32b   :  { %4423 = vst [vmem:[%s10788_s5 + $0x8] sm:$0xff] %v4420_v60 }

</bundles_post_ra>
